<compile_context>
chip_gen: v7x
topology: tpu7x:2x2x1
jax: 0.10.0
libtpu: 0.0.40
codegen_flags: <defaults>
</compile_context>

<pallas_src>
import jax
import jax.numpy as jnp
from jax import lax
from jax.experimental import pallas as pl
from jax.experimental.pallas import tpu as pltpu

# ---------------------------------------------------------------------------
# Problem sizes: Encoder(hidden_dimension=32, state_embedding_dimension=32,
#                        width_height=(16, 16), num_channels=4), batch=2.
# ---------------------------------------------------------------------------
N, C    = 2, 4            # batch, input channels
HH, WW  = 16, 16          # spatial
HD, EMB = 32, 32          # hidden dim, state embedding dim
P       = HH * WW         # 256: torch `view(-1, input_dimension)` width
TOT     = N * P           # 512 valid cells (BatchNorm population size)
HP, WP  = HH + 2, WW + 2  # per-image padded grid for 3x3 "same" convs
PPI     = HP * WP         # 324 padded cells per image
NPP     = N * PPI         # 648 padded cells total (lane axis)
LP      = 32              # extra zero lanes at each end for tap windows
EPS     = 1e-5

F32, BF16 = jnp.float32, jnp.bfloat16


# ---------------------------------------------------------------------------
# Fused kernel (channels on sublanes, padded flattened positions on lanes)
# ---------------------------------------------------------------------------
def encoder_kernel(x_ref, mask_ref, w1_ref, w2_ref, bn_ref, mlpb_ref,
                   lw1p_ref, lwk_ref, out_ref):
    mask = mask_ref[...]                                   # (1, NPP) f32, 1 at real cells

    def conv3x3(src_bf16, w_ref, cin):
        # Zero-extend the lane axis so every tap window is a static in-bounds
        # lane slice.  Per-image borders already live inside NPP, so outputs at
        # real cells never read across images; garbage only lands on border
        # cells, which are masked below.
        zpad = jnp.zeros((cin, LP), BF16)
        srcp = jnp.concatenate([zpad, src_bf16, zpad], axis=1)   # (cin, NPP + 2*LP)
        acc = jnp.zeros((HD, NPP), F32)
        for t in range(9):                                 # static unroll, MXU dots
            off = (t // 3 - 1) * WP + (t % 3 - 1)          # lane shift for this tap
            win = srcp[:, LP + off: LP + off + NPP]        # (cin, NPP) bf16
            acc = acc + jnp.dot(w_ref[t], win, preferred_element_type=F32)
        return acc

    def bn_relu(h, g, b, apply_mask):
        # Training-mode BatchNorm over the TOT real cells (one-pass stats).
        hm    = h * mask
        mean  = jnp.sum(hm, axis=1, keepdims=True) * (1.0 / TOT)
        msq   = jnp.sum(hm * h, axis=1, keepdims=True) * (1.0 / TOT)
        scale = lax.rsqrt(msq - mean * mean + EPS) * g
        out   = jnp.maximum(h * scale + (b - mean * scale), 0.0)
        return out * mask if apply_mask else out

    # ---- conv1 (3x3, pad 1) + BN + ReLU  (conv bias cancelled by BN) --------
    h = conv3x3(x_ref[...], w1_ref, C)
    h = bn_relu(h, bn_ref[:, 0:1], bn_ref[:, 1:2], apply_mask=True)   # zero borders for conv2

    # ---- conv2 (3x3, pad 1) + BN + ReLU --------------------------------------
    h = conv3x3(h.astype(BF16), w2_ref, HD)
    h = bn_relu(h, bn_ref[:, 2:3], bn_ref[:, 3:4], apply_mask=False)  # borders die in lw1p

    # ---- conv3 (1x1 -> 1 channel) + ReLU --------------------------------------
    w3row = mlpb_ref[5:6, :].astype(BF16)                             # (1, HD)
    col = jnp.dot(w3row, h.astype(BF16), preferred_element_type=F32)
    col = jnp.maximum(col + mlpb_ref[6:7, 0:1], 0.0)                  # (1, NPP)

    # ---- torch `h1.view(-1, P)` + Linear(P, HD): per-image dot against the
    #      padded-layout copy of lw1 (zero rows at border cells) ----------------
    colb = col.astype(BF16)
    zs = [jnp.dot(colb[:, n * PPI:(n + 1) * PPI], lw1p_ref[...],
                  preferred_element_type=F32) for n in range(N)]
    z = jnp.concatenate(zs, axis=0)                                   # (N, HD)
    z = jnp.maximum(z + mlpb_ref[0:1, :], 0.0)

    # ---- Linear -> LayerNorm -> ReLU -> Linear --------------------------------
    z = jnp.dot(z.astype(BF16), lwk_ref[0:HD, :],
                preferred_element_type=F32) + mlpb_ref[1:2, :]
    mu = jnp.mean(z, axis=-1, keepdims=True)
    m2 = jnp.mean(z * z, axis=-1, keepdims=True)
    z = (z - mu) * lax.rsqrt(m2 - mu * mu + EPS) * mlpb_ref[2:3, :] + mlpb_ref[3:4, :]
    z = jnp.maximum(z, 0.0)
    out_ref[...] = jnp.dot(z.astype(BF16), lwk_ref[HD:2 * HD, :],
                           preferred_element_type=F32) + mlpb_ref[4:5, :]


# ---------------------------------------------------------------------------
# Single gridless pallas_call: everything resident in VMEM, no scratch needed.
# ---------------------------------------------------------------------------
_VMEM = pl.BlockSpec(memory_space=pltpu.MemorySpace.VMEM)

_encoder_call = pl.pallas_call(
    encoder_kernel,
    out_shape=jax.ShapeDtypeStruct((N, EMB), jnp.float32),
    in_specs=[_VMEM] * 8,
    out_specs=_VMEM,
)


# ---------------------------------------------------------------------------
# One-time parameter packing (bf16 pre-cast, merged slabs -> 8 input DMAs)
# ---------------------------------------------------------------------------
def prepare_params(p):
    # conv weights: (3,3,Cin,Cout) -> (9, Cout, Cin) bf16 (per-tap (HD_out, HD_in))
    w1 = jnp.transpose(p["w1"].reshape(9, C, HD), (0, 2, 1)).astype(BF16)
    w2 = jnp.transpose(p["w2"].reshape(9, HD, HD), (0, 2, 1)).astype(BF16)
    # BatchNorm params: columns [gamma1, beta1, gamma2, beta2], channel on sublanes
    bn = jnp.stack([p["g1"], p["bt1"], p["g2"], p["bt2"]], axis=1).astype(F32)
    # small vectors slab (EMB == HD so all rows are width HD):
    # rows: lb1, lb2, ln_gamma, ln_beta, lb3, w3 (as a row), b3 (broadcast), pad
    mlpb = jnp.stack([p["lb1"], p["lb2"], p["lng"], p["lnb"], p["lb3"],
                      p["w3"].reshape(HD),
                      jnp.full((HD,), p["b3"][0], F32),
                      jnp.zeros((HD,), F32)], axis=0).astype(F32)
    # first Linear weight re-laid into the padded per-image grid (zero border rows)
    lw1p = jnp.pad(p["lw1"].reshape(HH, WW, HD),
                   ((1, 1), (1, 1), (0, 0))).reshape(PPI, HD).astype(BF16)
    # Linear(HD,HD) and Linear(HD,EMB) stacked along sublanes
    lwk = jnp.concatenate([p["lw2"], p["lw3"]], axis=0).astype(BF16)
    # validity mask over the padded flattened positions
    mask = jnp.pad(jnp.ones((N, HH, WW), F32),
                   ((0, 0), (1, 1), (1, 1))).reshape(1, NPP)
    return dict(mask=mask, w1=w1, w2=w2, bn=bn, mlpb=mlpb, lw1p=lw1p, lwk=lwk)


@jax.jit
def encoder_forward(x_nchw, kp):
    # Per-call glue: NCHW -> channels-first, per-image spatially padded,
    # flattened-on-lanes bf16 layout.
    xp = jnp.pad(x_nchw, ((0, 0), (0, 0), (1, 1), (1, 1)))        # (N, C, HP, WP)
    xp = jnp.transpose(xp, (1, 0, 2, 3)).reshape(C, NPP).astype(BF16)
    return _encoder_call(xp, kp["mask"], kp["w1"], kp["w2"], kp["bn"],
                         kp["mlpb"], kp["lw1p"], kp["lwk"])


# ---------------------------------------------------------------------------
# Pure-JAX reference (same bf16-operand / f32-accumulate treatment)
# ---------------------------------------------------------------------------
def reference_forward(x_nchw, params):
    bf = jnp.bfloat16
    x = jnp.transpose(x_nchw, (0, 2, 3, 1)).astype(jnp.float32)   # NHWC

    def conv(h, w_hwio, b):
        o = lax.conv_general_dilated(h.astype(bf), w_hwio.astype(bf), (1, 1),
                                     ((1, 1), (1, 1)),
                                     dimension_numbers=("NHWC", "HWIO", "NHWC"),
                                     preferred_element_type=jnp.float32)
        return o + b

    def bn(h, g, b):
        m  = jnp.mean(h, axis=(0, 1, 2))
        m2 = jnp.mean(h * h, axis=(0, 1, 2))
        s  = lax.rsqrt(m2 - m * m + EPS) * g
        return h * s + (b - m * s)

    h = jax.nn.relu(bn(conv(x, params["w1"], params["b1"]), params["g1"], params["bt1"]))
    h = jax.nn.relu(bn(conv(h, params["w2"], params["b2"]), params["g2"], params["bt2"]))
    h = jax.nn.relu(jnp.einsum("nhwc,co->nhwo", h.astype(bf), params["w3"].astype(bf),
                               preferred_element_type=jnp.float32) + params["b3"])
    h = h[..., 0].reshape(N, P)

    z = jax.nn.relu(jnp.dot(h.astype(bf), params["lw1"].astype(bf),
                            preferred_element_type=jnp.float32) + params["lb1"])
    z = jnp.dot(z.astype(bf), params["lw2"].astype(bf),
                preferred_element_type=jnp.float32) + params["lb2"]
    mu  = jnp.mean(z, axis=-1, keepdims=True)
    mu2 = jnp.mean(z * z, axis=-1, keepdims=True)
    z = (z - mu) * lax.rsqrt(mu2 - mu * mu + EPS) * params["lng"] + params["lnb"]
    z = jax.nn.relu(z)
    return jnp.dot(z.astype(bf), params["lw3"].astype(bf),
                   preferred_element_type=jnp.float32) + params["lb3"]


# ---------------------------------------------------------------------------
# Deterministic parameter init (shapes follow Encoder.__init__)
# ---------------------------------------------------------------------------
def init_params(key):
    ks = jax.random.split(key, 20)

    def nrm(k, shape, scale):
        return scale * jax.random.normal(k, shape, jnp.float32)

    return {
        # conv1: Conv2d(C, HD, 3x3, pad 1) + BatchNorm2d(HD)
        "w1": nrm(ks[0], (3, 3, C, HD), (9 * C) ** -0.5),
        "b1": nrm(ks[1], (HD,), 0.05),
        "g1": 1.0 + nrm(ks[2], (HD,), 0.05),
        "bt1": nrm(ks[3], (HD,), 0.05),
        # conv2: Conv2d(HD, HD, 3x3, pad 1) + BatchNorm2d(HD)
        "w2": nrm(ks[4], (3, 3, HD, HD), (9 * HD) ** -0.5),
        "b2": nrm(ks[5], (HD,), 0.05),
        "g2": 1.0 + nrm(ks[6], (HD,), 0.05),
        "bt2": nrm(ks[7], (HD,), 0.05),
        # conv3: Conv2d(HD, 1, 1x1)
        "w3": nrm(ks[8], (HD, 1), HD ** -0.5),
        "b3": nrm(ks[9], (1,), 0.05),
        # linear stack
        "lw1": nrm(ks[10], (P, HD), P ** -0.5),
        "lb1": nrm(ks[11], (HD,), 0.05),
        "lw2": nrm(ks[12], (HD, HD), HD ** -0.5),
        "lb2": nrm(ks[13], (HD,), 0.05),
        "lng": 1.0 + nrm(ks[14], (HD,), 0.05),
        "lnb": nrm(ks[15], (HD,), 0.05),
        "lw3": nrm(ks[16], (HD, EMB), HD ** -0.5),
        "lb3": nrm(ks[17], (EMB,), 0.05),
    }


if __name__ == "__main__":
    key = jax.random.PRNGKey(0)
    pkey, xkey = jax.random.split(key)
    params = init_params(pkey)
    kparams = prepare_params(params)
    x = jax.random.normal(xkey, (N, C, HH, WW), jnp.float32)

    out = jax.block_until_ready(encoder_forward(x, kparams))
    assert out.shape == (N, EMB), out.shape

    ref = reference_forward(x, params)
    max_err = float(jnp.max(jnp.abs(out - ref)))
    # bf16 MXU operands everywhere (matching the reference's treatment); 1e-2
    # comfortably separates fp noise from real bugs (which would be O(0.1+)).
    assert max_err < 1e-2, f"max abs error {max_err}"
    print("KERNEL_OK")
</pallas_src>

<mosaic_0001>
module attributes {stable_mosaic.version = 11 : i64} {
  func.func @encoder_kernel(%arg0: memref<4x648xbf16, #tpu.memory_space<vmem>>, %arg1: memref<1x648xf32, #tpu.memory_space<vmem>>, %arg2: memref<9x32x4xbf16, #tpu.memory_space<vmem>>, %arg3: memref<9x32x32xbf16, #tpu.memory_space<vmem>>, %arg4: memref<32x4xf32, #tpu.memory_space<vmem>>, %arg5: memref<8x32xf32, #tpu.memory_space<vmem>>, %arg6: memref<324x32xbf16, #tpu.memory_space<vmem>>, %arg7: memref<64x32xbf16, #tpu.memory_space<vmem>>, %arg8: memref<2x32xf32, #tpu.memory_space<vmem>>) attributes {dimension_semantics = [], scalar_prefetch = 0 : i64, scratch_operands = 0 : i64, tpu.core_type = #tpu.core_type<tc>} {
    %c0 = arith.constant 0 : index
    %c0_0 = arith.constant 0 : index
    %0 = vector.load %arg1[%c0, %c0_0] : memref<1x648xf32, #tpu.memory_space<vmem>>, vector<1x648xf32>
    %c0_1 = arith.constant 0 : index
    %c0_2 = arith.constant 0 : index
    %1 = vector.load %arg0[%c0_1, %c0_2] : memref<4x648xbf16, #tpu.memory_space<vmem>>, vector<4x648xbf16>
    %cst = arith.constant 0.000000e+00 : bf16
    %2 = vector.broadcast %cst : bf16 to vector<4x32xbf16>
    %3 = tpu.concatenate %2, %1, %2 in 1 : vector<4x32xbf16>, vector<4x648xbf16>, vector<4x32xbf16> -> vector<4x712xbf16>
    %cst_3 = arith.constant 0.000000e+00 : f32
    %4 = vector.broadcast %cst_3 : f32 to vector<32x648xf32>
    %5 = vector.extract_strided_slice %3 {offsets = [0, 13], sizes = [4, 648], strides = [1, 1]} : vector<4x712xbf16> to vector<4x648xbf16>
    %c0_4 = arith.constant 0 : index
    %c0_5 = arith.constant 0 : index
    %c0_6 = arith.constant 0 : index
    %6 = vector.load %arg2[%c0_4, %c0_5, %c0_6] : memref<9x32x4xbf16, #tpu.memory_space<vmem>>, vector<1x32x4xbf16>
    %7 = vector.shape_cast %6 : vector<1x32x4xbf16> to vector<32x4xbf16>
    %cst_7 = arith.constant dense<0.000000e+00> : vector<32x648xf32>
    %8 = tpu.matmul %7, %5, %cst_7 {dimension_numbers = #tpu.dot_dimension_numbers<[1], [0], [0], [1], [0, 0, 1, 1], [], []>} : vector<32x4xbf16>, vector<4x648xbf16>, vector<32x648xf32> -> vector<32x648xf32>
    %9 = arith.addf %4, %8 : vector<32x648xf32>
    %10 = vector.extract_strided_slice %3 {offsets = [0, 14], sizes = [4, 648], strides = [1, 1]} : vector<4x712xbf16> to vector<4x648xbf16>
    %c1 = arith.constant 1 : index
    %c0_8 = arith.constant 0 : index
    %c0_9 = arith.constant 0 : index
    %11 = vector.load %arg2[%c1, %c0_8, %c0_9] : memref<9x32x4xbf16, #tpu.memory_space<vmem>>, vector<1x32x4xbf16>
    %12 = vector.shape_cast %11 : vector<1x32x4xbf16> to vector<32x4xbf16>
    %cst_10 = arith.constant dense<0.000000e+00> : vector<32x648xf32>
    %13 = tpu.matmul %12, %10, %cst_10 {dimension_numbers = #tpu.dot_dimension_numbers<[1], [0], [0], [1], [0, 0, 1, 1], [], []>} : vector<32x4xbf16>, vector<4x648xbf16>, vector<32x648xf32> -> vector<32x648xf32>
    %14 = arith.addf %9, %13 : vector<32x648xf32>
    %15 = vector.extract_strided_slice %3 {offsets = [0, 15], sizes = [4, 648], strides = [1, 1]} : vector<4x712xbf16> to vector<4x648xbf16>
    %c2 = arith.constant 2 : index
    %c0_11 = arith.constant 0 : index
    %c0_12 = arith.constant 0 : index
    %16 = vector.load %arg2[%c2, %c0_11, %c0_12] : memref<9x32x4xbf16, #tpu.memory_space<vmem>>, vector<1x32x4xbf16>
    %17 = vector.shape_cast %16 : vector<1x32x4xbf16> to vector<32x4xbf16>
    %cst_13 = arith.constant dense<0.000000e+00> : vector<32x648xf32>
    %18 = tpu.matmul %17, %15, %cst_13 {dimension_numbers = #tpu.dot_dimension_numbers<[1], [0], [0], [1], [0, 0, 1, 1], [], []>} : vector<32x4xbf16>, vector<4x648xbf16>, vector<32x648xf32> -> vector<32x648xf32>
    %19 = arith.addf %14, %18 : vector<32x648xf32>
    %20 = vector.extract_strided_slice %3 {offsets = [0, 31], sizes = [4, 648], strides = [1, 1]} : vector<4x712xbf16> to vector<4x648xbf16>
    %c3 = arith.constant 3 : index
    %c0_14 = arith.constant 0 : index
    %c0_15 = arith.constant 0 : index
    %21 = vector.load %arg2[%c3, %c0_14, %c0_15] : memref<9x32x4xbf16, #tpu.memory_space<vmem>>, vector<1x32x4xbf16>
    %22 = vector.shape_cast %21 : vector<1x32x4xbf16> to vector<32x4xbf16>
    %cst_16 = arith.constant dense<0.000000e+00> : vector<32x648xf32>
    %23 = tpu.matmul %22, %20, %cst_16 {dimension_numbers = #tpu.dot_dimension_numbers<[1], [0], [0], [1], [0, 0, 1, 1], [], []>} : vector<32x4xbf16>, vector<4x648xbf16>, vector<32x648xf32> -> vector<32x648xf32>
    %24 = arith.addf %19, %23 : vector<32x648xf32>
    %25 = vector.extract_strided_slice %3 {offsets = [0, 32], sizes = [4, 648], strides = [1, 1]} : vector<4x712xbf16> to vector<4x648xbf16>
    %c4 = arith.constant 4 : index
    %c0_17 = arith.constant 0 : index
    %c0_18 = arith.constant 0 : index
    %26 = vector.load %arg2[%c4, %c0_17, %c0_18] : memref<9x32x4xbf16, #tpu.memory_space<vmem>>, vector<1x32x4xbf16>
    %27 = vector.shape_cast %26 : vector<1x32x4xbf16> to vector<32x4xbf16>
    %cst_19 = arith.constant dense<0.000000e+00> : vector<32x648xf32>
    %28 = tpu.matmul %27, %25, %cst_19 {dimension_numbers = #tpu.dot_dimension_numbers<[1], [0], [0], [1], [0, 0, 1, 1], [], []>} : vector<32x4xbf16>, vector<4x648xbf16>, vector<32x648xf32> -> vector<32x648xf32>
    %29 = arith.addf %24, %28 : vector<32x648xf32>
    %30 = vector.extract_strided_slice %3 {offsets = [0, 33], sizes = [4, 648], strides = [1, 1]} : vector<4x712xbf16> to vector<4x648xbf16>
    %c5 = arith.constant 5 : index
    %c0_20 = arith.constant 0 : index
    %c0_21 = arith.constant 0 : index
    %31 = vector.load %arg2[%c5, %c0_20, %c0_21] : memref<9x32x4xbf16, #tpu.memory_space<vmem>>, vector<1x32x4xbf16>
    %32 = vector.shape_cast %31 : vector<1x32x4xbf16> to vector<32x4xbf16>
    %cst_22 = arith.constant dense<0.000000e+00> : vector<32x648xf32>
    %33 = tpu.matmul %32, %30, %cst_22 {dimension_numbers = #tpu.dot_dimension_numbers<[1], [0], [0], [1], [0, 0, 1, 1], [], []>} : vector<32x4xbf16>, vector<4x648xbf16>, vector<32x648xf32> -> vector<32x648xf32>
    %34 = arith.addf %29, %33 : vector<32x648xf32>
    %35 = vector.extract_strided_slice %3 {offsets = [0, 49], sizes = [4, 648], strides = [1, 1]} : vector<4x712xbf16> to vector<4x648xbf16>
    %c6 = arith.constant 6 : index
    %c0_23 = arith.constant 0 : index
    %c0_24 = arith.constant 0 : index
    %36 = vector.load %arg2[%c6, %c0_23, %c0_24] : memref<9x32x4xbf16, #tpu.memory_space<vmem>>, vector<1x32x4xbf16>
    %37 = vector.shape_cast %36 : vector<1x32x4xbf16> to vector<32x4xbf16>
    %cst_25 = arith.constant dense<0.000000e+00> : vector<32x648xf32>
    %38 = tpu.matmul %37, %35, %cst_25 {dimension_numbers = #tpu.dot_dimension_numbers<[1], [0], [0], [1], [0, 0, 1, 1], [], []>} : vector<32x4xbf16>, vector<4x648xbf16>, vector<32x648xf32> -> vector<32x648xf32>
    %39 = arith.addf %34, %38 : vector<32x648xf32>
    %40 = vector.extract_strided_slice %3 {offsets = [0, 50], sizes = [4, 648], strides = [1, 1]} : vector<4x712xbf16> to vector<4x648xbf16>
    %c7 = arith.constant 7 : index
    %c0_26 = arith.constant 0 : index
    %c0_27 = arith.constant 0 : index
    %41 = vector.load %arg2[%c7, %c0_26, %c0_27] : memref<9x32x4xbf16, #tpu.memory_space<vmem>>, vector<1x32x4xbf16>
    %42 = vector.shape_cast %41 : vector<1x32x4xbf16> to vector<32x4xbf16>
    %cst_28 = arith.constant dense<0.000000e+00> : vector<32x648xf32>
    %43 = tpu.matmul %42, %40, %cst_28 {dimension_numbers = #tpu.dot_dimension_numbers<[1], [0], [0], [1], [0, 0, 1, 1], [], []>} : vector<32x4xbf16>, vector<4x648xbf16>, vector<32x648xf32> -> vector<32x648xf32>
    %44 = arith.addf %39, %43 : vector<32x648xf32>
    %45 = vector.extract_strided_slice %3 {offsets = [0, 51], sizes = [4, 648], strides = [1, 1]} : vector<4x712xbf16> to vector<4x648xbf16>
    %c8 = arith.constant 8 : index
    %c0_29 = arith.constant 0 : index
    %c0_30 = arith.constant 0 : index
    %46 = vector.load %arg2[%c8, %c0_29, %c0_30] : memref<9x32x4xbf16, #tpu.memory_space<vmem>>, vector<1x32x4xbf16>
    %47 = vector.shape_cast %46 : vector<1x32x4xbf16> to vector<32x4xbf16>
    %cst_31 = arith.constant dense<0.000000e+00> : vector<32x648xf32>
    %48 = tpu.matmul %47, %45, %cst_31 {dimension_numbers = #tpu.dot_dimension_numbers<[1], [0], [0], [1], [0, 0, 1, 1], [], []>} : vector<32x4xbf16>, vector<4x648xbf16>, vector<32x648xf32> -> vector<32x648xf32>
    %49 = arith.addf %44, %48 : vector<32x648xf32>
    %c0_32 = arith.constant 0 : index
    %c0_33 = arith.constant 0 : index
    %50 = vector.load %arg4[%c0_32, %c0_33] : memref<32x4xf32, #tpu.memory_space<vmem>>, vector<32x1xf32>
    %c0_34 = arith.constant 0 : index
    %c1_35 = arith.constant 1 : index
    %51 = vector.load %arg4[%c0_34, %c1_35] : memref<32x4xf32, #tpu.memory_space<vmem>>, vector<32x1xf32>
    %52 = vector.broadcast %0 : vector<1x648xf32> to vector<32x648xf32>
    %53 = arith.mulf %49, %52 : vector<32x648xf32>
    %cst_36 = arith.constant dense<0.000000e+00> : vector<32xf32>
    %54 = vector.multi_reduction <add>, %53, %cst_36 [1] : vector<32x648xf32> to vector<32xf32>
    %55 = vector.shape_cast %54 : vector<32xf32> to vector<32x1xf32>
    %cst_37 = arith.constant 0.001953125 : f32
    %56 = vector.broadcast %cst_37 : f32 to vector<32x1xf32>
    %57 = arith.mulf %55, %56 : vector<32x1xf32>
    %58 = arith.mulf %53, %49 : vector<32x648xf32>
    %cst_38 = arith.constant dense<0.000000e+00> : vector<32xf32>
    %59 = vector.multi_reduction <add>, %58, %cst_38 [1] : vector<32x648xf32> to vector<32xf32>
    %60 = vector.shape_cast %59 : vector<32xf32> to vector<32x1xf32>
    %cst_39 = arith.constant 0.001953125 : f32
    %61 = vector.broadcast %cst_39 : f32 to vector<32x1xf32>
    %62 = arith.mulf %60, %61 : vector<32x1xf32>
    %63 = arith.mulf %57, %57 : vector<32x1xf32>
    %64 = arith.subf %62, %63 : vector<32x1xf32>
    %cst_40 = arith.constant 9.99999974E-6 : f32
    %65 = vector.broadcast %cst_40 : f32 to vector<32x1xf32>
    %66 = arith.addf %64, %65 : vector<32x1xf32>
    %67 = math.rsqrt %66 : vector<32x1xf32>
    %68 = arith.mulf %67, %50 : vector<32x1xf32>
    %69 = vector.broadcast %68 : vector<32x1xf32> to vector<32x648xf32>
    %70 = arith.mulf %49, %69 : vector<32x648xf32>
    %71 = arith.mulf %57, %68 : vector<32x1xf32>
    %72 = arith.subf %51, %71 : vector<32x1xf32>
    %73 = vector.broadcast %72 : vector<32x1xf32> to vector<32x648xf32>
    %74 = arith.addf %70, %73 : vector<32x648xf32>
    %cst_41 = arith.constant 0.000000e+00 : f32
    %75 = vector.broadcast %cst_41 : f32 to vector<32x648xf32>
    %76 = arith.maximumf %74, %75 : vector<32x648xf32>
    %77 = vector.broadcast %0 : vector<1x648xf32> to vector<32x648xf32>
    %78 = arith.mulf %76, %77 : vector<32x648xf32>
    %79 = arith.truncf %78 : vector<32x648xf32> to vector<32x648xbf16>
    %cst_42 = arith.constant 0.000000e+00 : bf16
    %80 = vector.broadcast %cst_42 : bf16 to vector<32x32xbf16>
    %81 = tpu.concatenate %80, %79, %80 in 1 : vector<32x32xbf16>, vector<32x648xbf16>, vector<32x32xbf16> -> vector<32x712xbf16>
    %cst_43 = arith.constant 0.000000e+00 : f32
    %82 = vector.broadcast %cst_43 : f32 to vector<32x648xf32>
    %83 = vector.extract_strided_slice %81 {offsets = [0, 13], sizes = [32, 648], strides = [1, 1]} : vector<32x712xbf16> to vector<32x648xbf16>
    %c0_44 = arith.constant 0 : index
    %c0_45 = arith.constant 0 : index
    %c0_46 = arith.constant 0 : index
    %84 = vector.load %arg3[%c0_44, %c0_45, %c0_46] : memref<9x32x32xbf16, #tpu.memory_space<vmem>>, vector<1x32x32xbf16>
    %85 = vector.shape_cast %84 : vector<1x32x32xbf16> to vector<32x32xbf16>
    %cst_47 = arith.constant dense<0.000000e+00> : vector<32x648xf32>
    %86 = tpu.matmul %85, %83, %cst_47 {dimension_numbers = #tpu.dot_dimension_numbers<[1], [0], [0], [1], [0, 0, 1, 1], [], []>} : vector<32x32xbf16>, vector<32x648xbf16>, vector<32x648xf32> -> vector<32x648xf32>
    %87 = arith.addf %82, %86 : vector<32x648xf32>
    %88 = vector.extract_strided_slice %81 {offsets = [0, 14], sizes = [32, 648], strides = [1, 1]} : vector<32x712xbf16> to vector<32x648xbf16>
    %c1_48 = arith.constant 1 : index
    %c0_49 = arith.constant 0 : index
    %c0_50 = arith.constant 0 : index
    %89 = vector.load %arg3[%c1_48, %c0_49, %c0_50] : memref<9x32x32xbf16, #tpu.memory_space<vmem>>, vector<1x32x32xbf16>
    %90 = vector.shape_cast %89 : vector<1x32x32xbf16> to vector<32x32xbf16>
    %cst_51 = arith.constant dense<0.000000e+00> : vector<32x648xf32>
    %91 = tpu.matmul %90, %88, %cst_51 {dimension_numbers = #tpu.dot_dimension_numbers<[1], [0], [0], [1], [0, 0, 1, 1], [], []>} : vector<32x32xbf16>, vector<32x648xbf16>, vector<32x648xf32> -> vector<32x648xf32>
    %92 = arith.addf %87, %91 : vector<32x648xf32>
    %93 = vector.extract_strided_slice %81 {offsets = [0, 15], sizes = [32, 648], strides = [1, 1]} : vector<32x712xbf16> to vector<32x648xbf16>
    %c2_52 = arith.constant 2 : index
    %c0_53 = arith.constant 0 : index
    %c0_54 = arith.constant 0 : index
    %94 = vector.load %arg3[%c2_52, %c0_53, %c0_54] : memref<9x32x32xbf16, #tpu.memory_space<vmem>>, vector<1x32x32xbf16>
    %95 = vector.shape_cast %94 : vector<1x32x32xbf16> to vector<32x32xbf16>
    %cst_55 = arith.constant dense<0.000000e+00> : vector<32x648xf32>
    %96 = tpu.matmul %95, %93, %cst_55 {dimension_numbers = #tpu.dot_dimension_numbers<[1], [0], [0], [1], [0, 0, 1, 1], [], []>} : vector<32x32xbf16>, vector<32x648xbf16>, vector<32x648xf32> -> vector<32x648xf32>
    %97 = arith.addf %92, %96 : vector<32x648xf32>
    %98 = vector.extract_strided_slice %81 {offsets = [0, 31], sizes = [32, 648], strides = [1, 1]} : vector<32x712xbf16> to vector<32x648xbf16>
    %c3_56 = arith.constant 3 : index
    %c0_57 = arith.constant 0 : index
    %c0_58 = arith.constant 0 : index
    %99 = vector.load %arg3[%c3_56, %c0_57, %c0_58] : memref<9x32x32xbf16, #tpu.memory_space<vmem>>, vector<1x32x32xbf16>
    %100 = vector.shape_cast %99 : vector<1x32x32xbf16> to vector<32x32xbf16>
    %cst_59 = arith.constant dense<0.000000e+00> : vector<32x648xf32>
    %101 = tpu.matmul %100, %98, %cst_59 {dimension_numbers = #tpu.dot_dimension_numbers<[1], [0], [0], [1], [0, 0, 1, 1], [], []>} : vector<32x32xbf16>, vector<32x648xbf16>, vector<32x648xf32> -> vector<32x648xf32>
    %102 = arith.addf %97, %101 : vector<32x648xf32>
    %103 = vector.extract_strided_slice %81 {offsets = [0, 32], sizes = [32, 648], strides = [1, 1]} : vector<32x712xbf16> to vector<32x648xbf16>
    %c4_60 = arith.constant 4 : index
    %c0_61 = arith.constant 0 : index
    %c0_62 = arith.constant 0 : index
    %104 = vector.load %arg3[%c4_60, %c0_61, %c0_62] : memref<9x32x32xbf16, #tpu.memory_space<vmem>>, vector<1x32x32xbf16>
    %105 = vector.shape_cast %104 : vector<1x32x32xbf16> to vector<32x32xbf16>
    %cst_63 = arith.constant dense<0.000000e+00> : vector<32x648xf32>
    %106 = tpu.matmul %105, %103, %cst_63 {dimension_numbers = #tpu.dot_dimension_numbers<[1], [0], [0], [1], [0, 0, 1, 1], [], []>} : vector<32x32xbf16>, vector<32x648xbf16>, vector<32x648xf32> -> vector<32x648xf32>
    %107 = arith.addf %102, %106 : vector<32x648xf32>
    %108 = vector.extract_strided_slice %81 {offsets = [0, 33], sizes = [32, 648], strides = [1, 1]} : vector<32x712xbf16> to vector<32x648xbf16>
    %c5_64 = arith.constant 5 : index
    %c0_65 = arith.constant 0 : index
    %c0_66 = arith.constant 0 : index
    %109 = vector.load %arg3[%c5_64, %c0_65, %c0_66] : memref<9x32x32xbf16, #tpu.memory_space<vmem>>, vector<1x32x32xbf16>
    %110 = vector.shape_cast %109 : vector<1x32x32xbf16> to vector<32x32xbf16>
    %cst_67 = arith.constant dense<0.000000e+00> : vector<32x648xf32>
    %111 = tpu.matmul %110, %108, %cst_67 {dimension_numbers = #tpu.dot_dimension_numbers<[1], [0], [0], [1], [0, 0, 1, 1], [], []>} : vector<32x32xbf16>, vector<32x648xbf16>, vector<32x648xf32> -> vector<32x648xf32>
    %112 = arith.addf %107, %111 : vector<32x648xf32>
    %113 = vector.extract_strided_slice %81 {offsets = [0, 49], sizes = [32, 648], strides = [1, 1]} : vector<32x712xbf16> to vector<32x648xbf16>
    %c6_68 = arith.constant 6 : index
    %c0_69 = arith.constant 0 : index
    %c0_70 = arith.constant 0 : index
    %114 = vector.load %arg3[%c6_68, %c0_69, %c0_70] : memref<9x32x32xbf16, #tpu.memory_space<vmem>>, vector<1x32x32xbf16>
    %115 = vector.shape_cast %114 : vector<1x32x32xbf16> to vector<32x32xbf16>
    %cst_71 = arith.constant dense<0.000000e+00> : vector<32x648xf32>
    %116 = tpu.matmul %115, %113, %cst_71 {dimension_numbers = #tpu.dot_dimension_numbers<[1], [0], [0], [1], [0, 0, 1, 1], [], []>} : vector<32x32xbf16>, vector<32x648xbf16>, vector<32x648xf32> -> vector<32x648xf32>
    %117 = arith.addf %112, %116 : vector<32x648xf32>
    %118 = vector.extract_strided_slice %81 {offsets = [0, 50], sizes = [32, 648], strides = [1, 1]} : vector<32x712xbf16> to vector<32x648xbf16>
    %c7_72 = arith.constant 7 : index
    %c0_73 = arith.constant 0 : index
    %c0_74 = arith.constant 0 : index
    %119 = vector.load %arg3[%c7_72, %c0_73, %c0_74] : memref<9x32x32xbf16, #tpu.memory_space<vmem>>, vector<1x32x32xbf16>
    %120 = vector.shape_cast %119 : vector<1x32x32xbf16> to vector<32x32xbf16>
    %cst_75 = arith.constant dense<0.000000e+00> : vector<32x648xf32>
    %121 = tpu.matmul %120, %118, %cst_75 {dimension_numbers = #tpu.dot_dimension_numbers<[1], [0], [0], [1], [0, 0, 1, 1], [], []>} : vector<32x32xbf16>, vector<32x648xbf16>, vector<32x648xf32> -> vector<32x648xf32>
    %122 = arith.addf %117, %121 : vector<32x648xf32>
    %123 = vector.extract_strided_slice %81 {offsets = [0, 51], sizes = [32, 648], strides = [1, 1]} : vector<32x712xbf16> to vector<32x648xbf16>
    %c8_76 = arith.constant 8 : index
    %c0_77 = arith.constant 0 : index
    %c0_78 = arith.constant 0 : index
    %124 = vector.load %arg3[%c8_76, %c0_77, %c0_78] : memref<9x32x32xbf16, #tpu.memory_space<vmem>>, vector<1x32x32xbf16>
    %125 = vector.shape_cast %124 : vector<1x32x32xbf16> to vector<32x32xbf16>
    %cst_79 = arith.constant dense<0.000000e+00> : vector<32x648xf32>
    %126 = tpu.matmul %125, %123, %cst_79 {dimension_numbers = #tpu.dot_dimension_numbers<[1], [0], [0], [1], [0, 0, 1, 1], [], []>} : vector<32x32xbf16>, vector<32x648xbf16>, vector<32x648xf32> -> vector<32x648xf32>
    %127 = arith.addf %122, %126 : vector<32x648xf32>
    %c0_80 = arith.constant 0 : index
    %c2_81 = arith.constant 2 : index
    %128 = vector.load %arg4[%c0_80, %c2_81] : memref<32x4xf32, #tpu.memory_space<vmem>>, vector<32x1xf32>
    %c0_82 = arith.constant 0 : index
    %c3_83 = arith.constant 3 : index
    %129 = vector.load %arg4[%c0_82, %c3_83] : memref<32x4xf32, #tpu.memory_space<vmem>>, vector<32x1xf32>
    %130 = vector.broadcast %0 : vector<1x648xf32> to vector<32x648xf32>
    %131 = arith.mulf %127, %130 : vector<32x648xf32>
    %cst_84 = arith.constant dense<0.000000e+00> : vector<32xf32>
    %132 = vector.multi_reduction <add>, %131, %cst_84 [1] : vector<32x648xf32> to vector<32xf32>
    %133 = vector.shape_cast %132 : vector<32xf32> to vector<32x1xf32>
    %cst_85 = arith.constant 0.001953125 : f32
    %134 = vector.broadcast %cst_85 : f32 to vector<32x1xf32>
    %135 = arith.mulf %133, %134 : vector<32x1xf32>
    %136 = arith.mulf %131, %127 : vector<32x648xf32>
    %cst_86 = arith.constant dense<0.000000e+00> : vector<32xf32>
    %137 = vector.multi_reduction <add>, %136, %cst_86 [1] : vector<32x648xf32> to vector<32xf32>
    %138 = vector.shape_cast %137 : vector<32xf32> to vector<32x1xf32>
    %cst_87 = arith.constant 0.001953125 : f32
    %139 = vector.broadcast %cst_87 : f32 to vector<32x1xf32>
    %140 = arith.mulf %138, %139 : vector<32x1xf32>
    %141 = arith.mulf %135, %135 : vector<32x1xf32>
    %142 = arith.subf %140, %141 : vector<32x1xf32>
    %cst_88 = arith.constant 9.99999974E-6 : f32
    %143 = vector.broadcast %cst_88 : f32 to vector<32x1xf32>
    %144 = arith.addf %142, %143 : vector<32x1xf32>
    %145 = math.rsqrt %144 : vector<32x1xf32>
    %146 = arith.mulf %145, %128 : vector<32x1xf32>
    %147 = vector.broadcast %146 : vector<32x1xf32> to vector<32x648xf32>
    %148 = arith.mulf %127, %147 : vector<32x648xf32>
    %149 = arith.mulf %135, %146 : vector<32x1xf32>
    %150 = arith.subf %129, %149 : vector<32x1xf32>
    %151 = vector.broadcast %150 : vector<32x1xf32> to vector<32x648xf32>
    %152 = arith.addf %148, %151 : vector<32x648xf32>
    %cst_89 = arith.constant 0.000000e+00 : f32
    %153 = vector.broadcast %cst_89 : f32 to vector<32x648xf32>
    %154 = arith.maximumf %152, %153 : vector<32x648xf32>
    %c5_90 = arith.constant 5 : index
    %c0_91 = arith.constant 0 : index
    %155 = vector.load %arg5[%c5_90, %c0_91] : memref<8x32xf32, #tpu.memory_space<vmem>>, vector<1x32xf32>
    %156 = arith.truncf %155 : vector<1x32xf32> to vector<1x32xbf16>
    %157 = arith.truncf %154 : vector<32x648xf32> to vector<32x648xbf16>
    %cst_92 = arith.constant dense<0.000000e+00> : vector<1x648xf32>
    %158 = tpu.matmul %156, %157, %cst_92 {dimension_numbers = #tpu.dot_dimension_numbers<[1], [0], [0], [1], [0, 0, 1, 1], [], []>} : vector<1x32xbf16>, vector<32x648xbf16>, vector<1x648xf32> -> vector<1x648xf32>
    %c6_93 = arith.constant 6 : index
    %c0_94 = arith.constant 0 : index
    %159 = vector.load %arg5[%c6_93, %c0_94] : memref<8x32xf32, #tpu.memory_space<vmem>>, vector<1x1xf32>
    %160 = vector.broadcast %159 : vector<1x1xf32> to vector<1x648xf32>
    %161 = arith.addf %158, %160 : vector<1x648xf32>
    %cst_95 = arith.constant 0.000000e+00 : f32
    %162 = vector.broadcast %cst_95 : f32 to vector<1x648xf32>
    %163 = arith.maximumf %161, %162 : vector<1x648xf32>
    %164 = arith.truncf %163 : vector<1x648xf32> to vector<1x648xbf16>
    %165 = vector.extract_strided_slice %164 {offsets = [0, 0], sizes = [1, 324], strides = [1, 1]} : vector<1x648xbf16> to vector<1x324xbf16>
    %c0_96 = arith.constant 0 : index
    %c0_97 = arith.constant 0 : index
    %166 = vector.load %arg6[%c0_96, %c0_97] : memref<324x32xbf16, #tpu.memory_space<vmem>>, vector<324x32xbf16>
    %cst_98 = arith.constant dense<0.000000e+00> : vector<1x32xf32>
    %167 = tpu.matmul %165, %166, %cst_98 {dimension_numbers = #tpu.dot_dimension_numbers<[1], [0], [0], [1], [0, 0, 1, 1], [], []>} : vector<1x324xbf16>, vector<324x32xbf16>, vector<1x32xf32> -> vector<1x32xf32>
    %168 = vector.extract_strided_slice %164 {offsets = [0, 324], sizes = [1, 324], strides = [1, 1]} : vector<1x648xbf16> to vector<1x324xbf16>
    %c0_99 = arith.constant 0 : index
    %c0_100 = arith.constant 0 : index
    %169 = vector.load %arg6[%c0_99, %c0_100] : memref<324x32xbf16, #tpu.memory_space<vmem>>, vector<324x32xbf16>
    %cst_101 = arith.constant dense<0.000000e+00> : vector<1x32xf32>
    %170 = tpu.matmul %168, %169, %cst_101 {dimension_numbers = #tpu.dot_dimension_numbers<[1], [0], [0], [1], [0, 0, 1, 1], [], []>} : vector<1x324xbf16>, vector<324x32xbf16>, vector<1x32xf32> -> vector<1x32xf32>
    %171 = tpu.concatenate %167, %170 in 0 : vector<1x32xf32>, vector<1x32xf32> -> vector<2x32xf32>
    %c0_102 = arith.constant 0 : index
    %c0_103 = arith.constant 0 : index
    %172 = vector.load %arg5[%c0_102, %c0_103] : memref<8x32xf32, #tpu.memory_space<vmem>>, vector<1x32xf32>
    %173 = vector.broadcast %172 : vector<1x32xf32> to vector<2x32xf32>
    %174 = arith.addf %171, %173 : vector<2x32xf32>
    %cst_104 = arith.constant 0.000000e+00 : f32
    %175 = vector.broadcast %cst_104 : f32 to vector<2x32xf32>
    %176 = arith.maximumf %174, %175 : vector<2x32xf32>
    %177 = arith.truncf %176 : vector<2x32xf32> to vector<2x32xbf16>
    %c0_105 = arith.constant 0 : index
    %c0_106 = arith.constant 0 : index
    %178 = vector.load %arg7[%c0_105, %c0_106] : memref<64x32xbf16, #tpu.memory_space<vmem>>, vector<32x32xbf16>
    %cst_107 = arith.constant dense<0.000000e+00> : vector<2x32xf32>
    %179 = tpu.matmul %177, %178, %cst_107 {dimension_numbers = #tpu.dot_dimension_numbers<[1], [0], [0], [1], [0, 0, 1, 1], [], []>} : vector<2x32xbf16>, vector<32x32xbf16>, vector<2x32xf32> -> vector<2x32xf32>
    %c1_108 = arith.constant 1 : index
    %c0_109 = arith.constant 0 : index
    %180 = vector.load %arg5[%c1_108, %c0_109] : memref<8x32xf32, #tpu.memory_space<vmem>>, vector<1x32xf32>
    %181 = vector.broadcast %180 : vector<1x32xf32> to vector<2x32xf32>
    %182 = arith.addf %179, %181 : vector<2x32xf32>
    %cst_110 = arith.constant dense<0.000000e+00> : vector<2xf32>
    %183 = vector.multi_reduction <add>, %182, %cst_110 [1] : vector<2x32xf32> to vector<2xf32>
    %184 = vector.shape_cast %183 : vector<2xf32> to vector<2x1xf32>
    %cst_111 = arith.constant 3.200000e+01 : f32
    %185 = vector.broadcast %cst_111 : f32 to vector<2x1xf32>
    %186 = arith.divf %184, %185 : vector<2x1xf32>
    %187 = arith.mulf %182, %182 : vector<2x32xf32>
    %cst_112 = arith.constant dense<0.000000e+00> : vector<2xf32>
    %188 = vector.multi_reduction <add>, %187, %cst_112 [1] : vector<2x32xf32> to vector<2xf32>
    %189 = vector.shape_cast %188 : vector<2xf32> to vector<2x1xf32>
    %cst_113 = arith.constant 3.200000e+01 : f32
    %190 = vector.broadcast %cst_113 : f32 to vector<2x1xf32>
    %191 = arith.divf %189, %190 : vector<2x1xf32>
    %192 = vector.broadcast %186 : vector<2x1xf32> to vector<2x32xf32>
    %193 = arith.subf %182, %192 : vector<2x32xf32>
    %194 = arith.mulf %186, %186 : vector<2x1xf32>
    %195 = arith.subf %191, %194 : vector<2x1xf32>
    %cst_114 = arith.constant 9.99999974E-6 : f32
    %196 = vector.broadcast %cst_114 : f32 to vector<2x1xf32>
    %197 = arith.addf %195, %196 : vector<2x1xf32>
    %198 = math.rsqrt %197 : vector<2x1xf32>
    %199 = vector.broadcast %198 : vector<2x1xf32> to vector<2x32xf32>
    %200 = arith.mulf %193, %199 : vector<2x32xf32>
    %c2_115 = arith.constant 2 : index
    %c0_116 = arith.constant 0 : index
    %201 = vector.load %arg5[%c2_115, %c0_116] : memref<8x32xf32, #tpu.memory_space<vmem>>, vector<1x32xf32>
    %202 = vector.broadcast %201 : vector<1x32xf32> to vector<2x32xf32>
    %203 = arith.mulf %200, %202 : vector<2x32xf32>
    %c3_117 = arith.constant 3 : index
    %c0_118 = arith.constant 0 : index
    %204 = vector.load %arg5[%c3_117, %c0_118] : memref<8x32xf32, #tpu.memory_space<vmem>>, vector<1x32xf32>
    %205 = vector.broadcast %204 : vector<1x32xf32> to vector<2x32xf32>
    %206 = arith.addf %203, %205 : vector<2x32xf32>
    %cst_119 = arith.constant 0.000000e+00 : f32
    %207 = vector.broadcast %cst_119 : f32 to vector<2x32xf32>
    %208 = arith.maximumf %206, %207 : vector<2x32xf32>
    %209 = arith.truncf %208 : vector<2x32xf32> to vector<2x32xbf16>
    %c32 = arith.constant 32 : index
    %c0_120 = arith.constant 0 : index
    %210 = vector.load %arg7[%c32, %c0_120] : memref<64x32xbf16, #tpu.memory_space<vmem>>, vector<32x32xbf16>
    %cst_121 = arith.constant dense<0.000000e+00> : vector<2x32xf32>
    %211 = tpu.matmul %209, %210, %cst_121 {dimension_numbers = #tpu.dot_dimension_numbers<[1], [0], [0], [1], [0, 0, 1, 1], [], []>} : vector<2x32xbf16>, vector<32x32xbf16>, vector<2x32xf32> -> vector<2x32xf32>
    %c4_122 = arith.constant 4 : index
    %c0_123 = arith.constant 0 : index
    %212 = vector.load %arg5[%c4_122, %c0_123] : memref<8x32xf32, #tpu.memory_space<vmem>>, vector<1x32xf32>
    %213 = vector.broadcast %212 : vector<1x32xf32> to vector<2x32xf32>
    %214 = arith.addf %211, %213 : vector<2x32xf32>
    %c0_124 = arith.constant 0 : index
    %c0_125 = arith.constant 0 : index
    %215 = vector.load %arg8[%c0_124, %c0_125] : memref<2x32xf32, #tpu.memory_space<vmem>>, vector<2x32xf32>
    tpu.vector_store %arg8[%c0_124, %c0_125], %214 {strides = array<i32>} : memref<2x32xf32, #tpu.memory_space<vmem>>, vector<2x32xf32>,
    return
  }
}

</mosaic_0001>

<bundles_post_ra>
// kernel: encoder_forward.1
= control target key start
LH: loop header
LB: loop body
LE: loop exit
PB: predicated region body
PF: predicated region fallthrough
CT: control target
= control target key end

     0   :  { %v40_v1 = vlaneseq  ;;  %v6683_v2 = vmov 1983009808   ;;  %s6684_s9 = smov 32   ;;  %s8443_s0 = inlined_call_operand.vmem [shape: bf16[4,648], index: 0, kind: input, shape index: {}]   ;;  %s8444_s1 = inlined_call_operand.vmem [shape: f32[1,648], index: 1, kind: input, shape index: {}]   ;;  %s8445_s2 = inlined_call_operand.vmem [shape: bf16[9,32,4], index: 2, kind: input, shape index: {}]   ;;  %s8446_s3 = inlined_call_operand.vmem [shape: bf16[9,32,32], index: 3, kind: input, shape index: {}]   ;;  %s8447_s4 = inlined_call_operand.vmem [shape: f32[32,4], index: 4, kind: input, shape index: {}]   ;;  %s8448_s5 = inlined_call_operand.vmem [shape: f32[8,32], index: 5, kind: input, shape index: {}]   ;;  %s8449_s6 = inlined_call_operand.vmem [shape: bf16[324,32], index: 6, kind: input, shape index: {}]   ;;  %s8450_s7 = inlined_call_operand.vmem [shape: bf16[64,32], index: 7, kind: input, shape index: {}]   ;;  %s8451_s8 = inlined_call_operand.hbm [shape: f32[2,32], index: 8, kind: output, shape index: {}]  }
   0x1   :  { %v32_v0 = vld [vmem:[%s8443_s0] sm:$0xff]  ;;  %v38_v3 = vunpack.c.l.s4 %v6683_v2  ;;  %v5781_v10 = vld.sshfl [vmem:[%s8443_s0 + $0x8] sm:$0x33 pattern:$0x76325410] }
   0x2   :  { %v6751_v4 = vshrl.u32 %v40_v1, 7  ;;  %v36_v6 = vcombine.high %v32_v0, %v32_v0  ;;  %v60_v13 = vcombine.high %v5781_v10, %v5781_v10 }
   0x3   :  { %v39_v5 = vunpack.c.0.s8 %v38_v3 }
   0x5   :  { %v42_v7 = vsub.s32 %v39_v5, %v6751_v4 }
   0x7   :  { %v43_v8 = vrot.slane %v32_v0, %v42_v7  ;;  %v50_v9 = vrot.slane %v36_v6, %v42_v7 }
   0x9   :  { %61 = vrot.lane.b32.xlu0 %v43_v8, %s6684_s9  ;;  %v51_v11 = vcombine.high %v43_v8, %v43_v8  ;;  %65 = vrot.lane.b32.xlu1 %v50_v9, %s6684_s9  ;;  %v52_v12 = vcombine.high %v50_v9, %v50_v9 }
   0xd   :  { %63 = vrot.lane.b32.xlu0 %v51_v11, %s6684_s9  ;;  %67 = vrot.lane.b32.xlu1 %v52_v12, %s6684_s9 }
  0x11   :  { %69 = vrot.lane.b32.xlu0 %v5781_v10, %s6684_s9  ;;  %71 = vrot.lane.b32.xlu1 %v60_v13, %s6684_s9 }
  0x12   :  { %13 = vsyncpa [#allocation3], 0  ;;  %v6685_v14 = vmov 0   ;;  %vm73_vm0 = vcmask 261120   ;;  %s6686_s0 = smov 114   ;;  %vm83_vm1 = vcmask 326656  }
  0x13   :  { %183 = vmatprep.mubr.bf16.mxu0 %v6685_v14  ;;  %1153 = vmatprep.mubr.bf16.mxu1 %v6685_v14  ;;  %s6687_s10 = smov 115   ;;  %s6688_s11 = smov 113   ;;  %vm119_vm2 = vcmask 932864   ;;  %vm132_vm3 = vcmask 1041408   ;;  %v6576_v34 = vld [vmem:[%s8445_s2 + $0x10] sm:$0xff]   ;;  %vm125_vm4 = vcmask 31744  }
  0x14   :  { %6566 = vset.pattern.permute.xlu0 %v6685_v14  ;;  %6567 = vset.pattern.permute.xlu1 %v6685_v14  ;;  %s6689_s12 = smov 97   ;;  %s6690_s13 = smov 96   ;;  %v6577_v42 = vld [vmem:[%s8445_s2 + $0x18] sm:$0xff]   ;;  %vm332_vm5 = vcmask 941056   ;;  %v6578_v6 = vld [vmem:[%s8445_s2] sm:$0xff]   ;;  %vm1028_vm6 = vcmask 785408  }
  0x15   :  { %s6691_s14 = smov 95   ;;  %s6692_s15 = smov 79   ;;  %vm548_vm7 = vcmask 924672   ;;  %vm1268_vm8 = vcmask 777216   ;;  %vm1508_vm9 = vcmask 646144   ;;  %vm1748_vm10 = vcmask 637952  }
  0x16   :  { %s6693_s16 = smov 78   ;;  %s6694_s17 = smov 77   ;;  %vm1988_vm11 = vcmask 629760   ;;  %vm788_vm12 = vcmask 793600   ;;  %vm2264_vm13 = vcmask 64512   ;;  %vm6700_vm14 = vmmov 0  }
  0x17   :  { %s6695_s19 = smov 1   ;;  %vm5406_vm15 = vcmask 556032  }
  0x7b   :  { %v62_v15 = vpop.permute.xlu0 %61  ;;  %v66_v16 = vpop.permute.xlu1 %65 }
  0x7c   :  { %v6768_v17 = vsel %vm73_vm0, 0, %v62_v15 }
  0x7d   :  { %107 = vrot.lane.b32.xlu0 %v6768_v17, %s6686_s0 }
  0x7f   :  { %v64_v18 = vpop.permute.xlu0 %63  ;;  %v68_v19 = vpop.permute.xlu1 %67 }
  0x80   :  { %v6773_v20 = vsel %vm73_vm0, %v62_v15, %v64_v18  ;;  %v6776_v21 = vsel %vm73_vm0, %v64_v18, %v66_v16  ;;  %v76_v24 = vsel %vm73_vm0, %v66_v16, %v68_v19  ;;  %v6951_v15 = vld [vmem:[%s8445_s2 + $0x48] sm:$0xff]  }
  0x81   :  { %111 = vrot.lane.b32.xlu0 %v6776_v21, %s6686_s0  ;;  %109 = vrot.lane.b32.xlu1 %v6773_v20, %s6686_s0  ;;  %v6579_v18 = vld [vmem:[%s8445_s2 + $0x8] sm:$0xff]  }
  0x83   :  { %v70_v22 = vpop.permute.xlu0 %69  ;;  %v72_v23 = vpop.permute.xlu1 %71 }
  0x84   :  { %v77_v25 = vsel %vm73_vm0, %v68_v19, %v70_v22  ;;  %v78_v26 = vsel %vm73_vm0, %v70_v22, %v72_v23 }
  0x85   :  { %115 = vrot.lane.b32.xlu0 %v77_v25, %s6686_s0  ;;  %113 = vrot.lane.b32.xlu1 %v76_v24, %s6686_s0  ;;  %v85_v27 = vsel %vm83_vm1, %v78_v26, 0 }
  0x89   :  { %320 = vrot.lane.b32.xlu0 %v6768_v17, %s6687_s10  ;;  %117 = vrot.lane.b32.xlu1 %v85_v27, %s6686_s0 }
  0x8d   :  { %324 = vrot.lane.b32.xlu0 %v6776_v21, %s6687_s10  ;;  %322 = vrot.lane.b32.xlu1 %v6773_v20, %s6687_s10 }
  0x91   :  { %328 = vrot.lane.b32.xlu0 %v77_v25, %s6687_s10  ;;  %326 = vrot.lane.b32.xlu1 %v76_v24, %s6687_s10 }
  0x95   :  { %536 = vrot.lane.b32.xlu0 %v6768_v17, %s6688_s11  ;;  %330 = vrot.lane.b32.xlu1 %v85_v27, %s6687_s10 }
  0x99   :  { %540 = vrot.lane.b32.xlu0 %v6776_v21, %s6688_s11  ;;  %538 = vrot.lane.b32.xlu1 %v6773_v20, %s6688_s11 }
  0x9d   :  { %544 = vrot.lane.b32.xlu0 %v77_v25, %s6688_s11  ;;  %542 = vrot.lane.b32.xlu1 %v76_v24, %s6688_s11 }
  0xa1   :  { %776 = vrot.lane.b32.xlu0 %v6768_v17, %s6689_s12  ;;  %546 = vrot.lane.b32.xlu1 %v85_v27, %s6688_s11 }
  0xa5   :  { %780 = vrot.lane.b32.xlu0 %v6776_v21, %s6689_s12  ;;  %778 = vrot.lane.b32.xlu1 %v6773_v20, %s6689_s12 }
  0xa9   :  { %784 = vrot.lane.b32.xlu0 %v77_v25, %s6689_s12  ;;  %782 = vrot.lane.b32.xlu1 %v76_v24, %s6689_s12 }
  0xad   :  { %1016 = vrot.lane.b32.xlu0 %v6768_v17, %s6690_s13  ;;  %786 = vrot.lane.b32.xlu1 %v85_v27, %s6689_s12 }
  0xb1   :  { %1020 = vrot.lane.b32.xlu0 %v6776_v21, %s6690_s13  ;;  %1018 = vrot.lane.b32.xlu1 %v6773_v20, %s6690_s13 }
  0xb5   :  { %1024 = vrot.lane.b32.xlu0 %v77_v25, %s6690_s13  ;;  %1022 = vrot.lane.b32.xlu1 %v76_v24, %s6690_s13 }
  0xb9   :  { %1256 = vrot.lane.b32.xlu0 %v6768_v17, %s6691_s14  ;;  %1026 = vrot.lane.b32.xlu1 %v85_v27, %s6690_s13 }
  0xbd   :  { %1260 = vrot.lane.b32.xlu0 %v6776_v21, %s6691_s14  ;;  %1258 = vrot.lane.b32.xlu1 %v6773_v20, %s6691_s14 }
  0xc1   :  { %1266 = vrot.lane.b32.xlu0 %v85_v27, %s6691_s14  ;;  %1264 = vrot.lane.b32.xlu1 %v77_v25, %s6691_s14 }
  0xc5   :  { %1498 = vrot.lane.b32.xlu0 %v6773_v20, %s6692_s15  ;;  %1496 = vrot.lane.b32.xlu1 %v6768_v17, %s6692_s15 }
  0xc9   :  { %1504 = vrot.lane.b32.xlu0 %v77_v25, %s6692_s15  ;;  %1500 = vrot.lane.b32.xlu1 %v6776_v21, %s6692_s15 }
  0xcd   :  { %1262 = vrot.lane.b32.xlu0 %v76_v24, %s6691_s14  ;;  %1506 = vrot.lane.b32.xlu1 %v85_v27, %s6692_s15 }
  0xd1   :  { %1738 = vrot.lane.b32.xlu0 %v6773_v20, %s6693_s16  ;;  %1736 = vrot.lane.b32.xlu1 %v6768_v17, %s6693_s16 }
  0xd5   :  { %1502 = vrot.lane.b32.xlu0 %v76_v24, %s6692_s15  ;;  %1740 = vrot.lane.b32.xlu1 %v6776_v21, %s6693_s16 }
  0xd9   :  { %1746 = vrot.lane.b32.xlu0 %v85_v27, %s6693_s16  ;;  %1744 = vrot.lane.b32.xlu1 %v77_v25, %s6693_s16 }
  0xdd   :  { %1976 = vrot.lane.b32.xlu0 %v6768_v17, %s6694_s17  ;;  %1742 = vrot.lane.b32.xlu1 %v76_v24, %s6693_s16 }
  0xe1   :  { %1980 = vrot.lane.b32.xlu0 %v6776_v21, %s6694_s17  ;;  %1978 = vrot.lane.b32.xlu1 %v6773_v20, %s6694_s17 }
  0xe5   :  { %1984 = vrot.lane.b32.xlu0 %v77_v25, %s6694_s17  ;;  %1982 = vrot.lane.b32.xlu1 %v76_v24, %s6694_s17 }
  0xe9   :  { %1986 = vrot.lane.b32.xlu1 %v85_v27, %s6694_s17 }
  0xef   :  { %v108_v28 = vpop.permute.xlu0 %107 }
  0xf3   :  { %v112_v29 = vpop.permute.xlu0 %111  ;;  %v110_v30 = vpop.permute.xlu1 %109 }
  0xf4   :  { %v121_v31 = vsel %vm119_vm2, %v110_v30, %v112_v29  ;;  %v120_v32 = vsel %vm119_vm2, %v108_v28, %v110_v30 }
  0xf5   :  { %5788 = vmatprep.subr.msk.bf16.mxu0 %vm132_vm3, %v121_v31  ;;  %v134_v33 = vsel %vm132_vm3, %v120_v32, 0 }
  0xf6   :  { %152 = vmatpush1.bf16.msra.mxu0 %v134_v33 }
  0xf7   :  { %v116_v35 = vpop.permute.xlu0 %115  ;;  %v114_v36 = vpop.permute.xlu1 %113 }
  0xf8   :  { %v122_v37 = vsel %vm119_vm2, %v112_v29, %v114_v36  ;;  %v123_v38 = vsel %vm119_vm2, %v114_v36, %v116_v35 }
  0xf9   :  { %5789 = vmatmul.mubr.msk.bf16.vlgmr.msra.gmra.mrb[0].mxu0 %vm125_vm4, %v6576_v34  ;;  %5791 = vmatprep.subr.msk.bf16.mxu0 %vm132_vm3, %v123_v38  ;;  %v140_v39 = vsel %vm132_vm3, %v122_v37, 0 }
  0xfa   :  { %205 = vmatpush1.bf16.msra.mxu0 %v140_v39  ;;  %193 = vmatprep.mubr.bf16.mxu0 %v6685_v14 }
  0xfb   :  { %v321_v40 = vpop.permute.xlu0 %320  ;;  %v118_v41 = vpop.permute.xlu1 %117 }
  0xfc   :  { %5794 = vmatprep.subr.msk.bf16.mxu0 %vm132_vm3, %v118_v41  ;;  %v124_v47 = vsel %vm119_vm2, %v116_v35, %v118_v41  ;;  %v7005_v35 = vld [vmem:[%s8445_s2 + $0x50] sm:$0xff]  }
  0xfd   :  { %v146_v50 = vsel %vm132_vm3, %v124_v47, 0 }
  0xff   :  { %v325_v43 = vpop.permute.xlu0 %324  ;;  %v323_v44 = vpop.permute.xlu1 %322 }
 0x100   :  { %v334_v51 = vsel %vm332_vm5, %v323_v44, %v325_v43  ;;  %v333_v58 = vsel %vm332_vm5, %v321_v40, %v323_v44 }
 0x101   :  { %5790 = vmatmul.mubr.msk.bf16.gmra.mrb[4].mxu0 %vm125_vm4, %v6577_v42  ;;  %v345_v61 = vsel %vm132_vm3, %v333_v58, 0 }
 0x102   :  { %236 = vmatprep.mubr.bf16.mxu0 %v6685_v14 }
 0x103   :  { %v6880_v45 = vpop.permute.xlu0 %328  ;;  %v327_v46 = vpop.permute.xlu1 %326 }
 0x104   :  { %v336_v62 = vsel %vm332_vm5, %v327_v46, %v6880_v45  ;;  %v335_v7 = vsel %vm332_vm5, %v325_v43, %v327_v46 }
 0x105   :  { %v351_v12 = vsel %vm132_vm3, %v335_v7, 0  ;;  %v6584_v7 = vld [vmem:[%s8445_s2 + $0x20] sm:$0xff]  }
 0x107   :  { %v6883_v48 = vpop.permute.xlu0 %536  ;;  %v331_v49 = vpop.permute.xlu1 %330 }
 0x108   :  { %v337_v23 = vsel %vm332_vm5, %v6880_v45, %v331_v49  ;;  %v7031_v45 = vld [vmem:[%s8445_s2 + $0x58] sm:$0xff]  }
 0x109   :  { %5792 = vmatmul.mubr.msk.bf16.vlgmr.msra.gmra.mrb[8].mxu0 %vm125_vm4, %v6576_v34  ;;  %v357_v26 = vsel %vm132_vm3, %v337_v23, 0 }
 0x10a   :  { %258 = vmatpush1.bf16.msra.mxu0 %v146_v50  ;;  %246 = vmatprep.mubr.bf16.mxu0 %v6685_v14 }
 0x10b   :  { %5799 = vmatprep.subr.msk.bf16.mxu0 %vm132_vm3, %v334_v51  ;;  %v6890_v52 = vpop.permute.xlu0 %540  ;;  %v6892_v53 = vpop.permute.xlu1 %538 }
 0x10c   :  { %v550_v27 = vsel %vm548_vm7, %v6892_v53, %v6890_v52  ;;  %v549_v38 = vsel %vm548_vm7, %v6883_v48, %v6892_v53  ;;  %v7054_v53 = vld [vmem:[%s8445_s2 + $0x60] sm:$0xff]  }
 0x10d   :  { %v561_v43 = vsel %vm132_vm3, %v549_v38, 0 }
 0x10f   :  { %v6894_v54 = vpop.permute.xlu0 %544  ;;  %v6896_v55 = vpop.permute.xlu1 %542 }
 0x110   :  { %v552_v46 = vsel %vm548_vm7, %v6896_v55, %v6894_v54 }
 0x111   :  { %5793 = vmatmul.mubr.msk.bf16.gmra.mrb[12].mxu0 %vm125_vm4, %v6577_v42 }
 0x112   :  { %289 = vmatprep.mubr.bf16.mxu0 %v6685_v14 }
 0x113   :  { %v6900_v56 = vpop.permute.xlu0 %776  ;;  %v6902_v57 = vpop.permute.xlu1 %546 }
 0x117   :  { %v6905_v59 = vpop.permute.xlu0 %780  ;;  %v6907_v60 = vpop.permute.xlu1 %778 }
 0x118   :  { %v790_v38 = vsel %vm788_vm12, %v6907_v60, %v6905_v59 }
 0x119   :  { %5795 = vmatmul.mubr.msk.bf16.vlgmr.msra.gmra.mrb[16].mxu0 %vm125_vm4, %v6576_v34 }
 0x11a   :  { %363 = vmatpush1.bf16.msra.mxu0 %v345_v61  ;;  %299 = vmatprep.mubr.bf16.mxu0 %v6685_v14 }
 0x11b   :  { %5802 = vmatprep.subr.msk.bf16.mxu0 %vm132_vm3, %v336_v62  ;;  %v6915_v63 = vpop.permute.xlu0 %784  ;;  %v6917_v0 = vpop.permute.xlu1 %782 }
 0x11f   :  { %v6919_v1 = vpop.permute.xlu0 %1016  ;;  %v6921_v2 = vpop.permute.xlu1 %786 }
 0x121   :  { %5796 = vmatmul.mubr.msk.bf16.gmra.mrb[20].mxu0 %vm125_vm4, %v6577_v42 }
 0x122   :  { %394 = vmatprep.mubr.bf16.mxu0 %v6685_v14 }
 0x123   :  { %v6925_v3 = vpop.permute.xlu0 %1020  ;;  %v6927_v5 = vpop.permute.xlu1 %1018 }
 0x127   :  { %v6933_v8 = vpop.permute.xlu0 %1024  ;;  %v1023_v9 = vpop.permute.xlu1 %1022 }
 0x128   :  { %v6937_v10 = vsel %vm1028_vm6, %v1023_v9, %v6933_v8  ;;  %v1031_v11 = vsel %vm1028_vm6, %v6925_v3, %v1023_v9  ;;  %v551_v9 = vsel %vm548_vm7, %v6890_v52, %v6896_v55  ;;  %v7083_v52 = vld [vmem:[%s8445_s2 + $0x68] sm:$0xff]  }
 0x129   :  { %5800 = vmatmul.mubr.msk.bf16.vlgmr.msra.gmra.mrb[0].mxu0 %vm125_vm4, %v6578_v6  ;;  %6160 = vmatprep.subr.msk.bf16.mxu1 %vm132_vm3, %v6937_v10  ;;  %v6946_v13 = vsel %vm132_vm3, %v1031_v11, 0  ;;  %v567_v23 = vsel %vm132_vm3, %v551_v9, 0  ;;  %v6586_v55 = vld [vmem:[%s8445_s2 + $0x28] sm:$0xff]  }
 0x12a   :  { %416 = vmatpush1.bf16.msra.mxu0 %v351_v12  ;;  %6161 = vmatpush1.bf16.msra.mxu1 %v6946_v13 }
 0x12b   :  { %5805 = vmatprep.subr.msk.bf16.mxu0 %vm132_vm3, %v331_v49  ;;  %v6955_v16 = vpop.permute.xlu0 %1256  ;;  %v6957_v17 = vpop.permute.xlu1 %1026  ;;  %404 = vmatprep.mubr.bf16.mxu0 %v6685_v14 }
 0x12d   :  { %5849 = vmatmul.mubr.msk.bf16.vlgmr.msra.gmra.mrb[0].mxu1 %vm125_vm4, %v6951_v15 }
 0x12e   :  { %1383 = vmatprep.mubr.bf16.mxu1 %v6685_v14 }
 0x12f   :  { %v6966_v19 = vpop.permute.xlu0 %1260  ;;  %v6968_v20 = vpop.permute.xlu1 %1258 }
 0x131   :  { %5801 = vmatmul.mubr.msk.bf16.gmra.mrb[4].mxu0 %vm125_vm4, %v6579_v18 }
 0x132   :  { %447 = vmatprep.mubr.bf16.mxu0 %v6685_v14 }
 0x133   :  { %v6972_v21 = vpop.permute.xlu0 %1266  ;;  %v6974_v22 = vpop.permute.xlu1 %1264 }
 0x137   :  { %v6978_v24 = vpop.permute.xlu0 %1498  ;;  %v6980_v25 = vpop.permute.xlu1 %1496 }
 0x139   :  { %5803 = vmatmul.mubr.msk.bf16.vlgmr.msra.gmra.mrb[8].mxu0 %vm125_vm4, %v6578_v6 }
 0x13a   :  { %469 = vmatpush1.bf16.msra.mxu0 %v357_v26  ;;  %457 = vmatprep.mubr.bf16.mxu0 %v6685_v14  ;;  %v7098_v26 = vld [vmem:[%s8445_s2 + $0x70] sm:$0xff]  }
 0x13b   :  { %5814 = vmatprep.subr.msk.bf16.mxu0 %vm132_vm3, %v550_v27  ;;  %v6989_v28 = vpop.permute.xlu0 %1504  ;;  %v6991_v29 = vpop.permute.xlu1 %1500 }
 0x13f   :  { %v1263_v30 = vpop.permute.xlu0 %1262  ;;  %v6993_v31 = vpop.permute.xlu1 %1506 }
 0x140   :  { %v1271_v32 = vsel %vm1268_vm8, %v6966_v19, %v1263_v30  ;;  %v1272_v33 = vsel %vm1268_vm8, %v1263_v30, %v6974_v22 }
 0x141   :  { %5804 = vmatmul.mubr.msk.bf16.gmra.mrb[12].mxu0 %vm125_vm4, %v6579_v18  ;;  %5862 = vmatprep.subr.msk.bf16.mxu1 %vm132_vm3, %v1272_v33  ;;  %v1287_v34 = vsel %vm132_vm3, %v1271_v32, 0  ;;  %v553_v32 = vsel %vm548_vm7, %v6894_v54, %v6902_v57  ;;  %v7129_v54 = vld [vmem:[%s8445_s2 + $0x80] sm:$0xff]  }
 0x142   :  { %1352 = vmatpush1.bf16.msra.mxu1 %v1287_v34  ;;  %500 = vmatprep.mubr.bf16.mxu0 %v6685_v14  ;;  %v573_v33 = vsel %vm132_vm3, %v553_v32, 0  ;;  %v7115_v34 = vld [vmem:[%s8445_s2 + $0x78] sm:$0xff]  }
 0x143   :  { %v7008_v36 = vpop.permute.xlu0 %1738  ;;  %v7010_v37 = vpop.permute.xlu1 %1736 }
 0x145   :  { %5863 = vmatmul.mubr.msk.bf16.vlgmr.msra.gmra.mrb[4].mxu1 %vm125_vm4, %v7005_v35 }
 0x146   :  { %1393 = vmatprep.mubr.bf16.mxu1 %v6685_v14 }
 0x147   :  { %v1503_v39 = vpop.permute.xlu0 %1502  ;;  %v7018_v40 = vpop.permute.xlu1 %1740 }
 0x148   :  { %v1511_v41 = vsel %vm1508_vm9, %v6991_v29, %v1503_v39  ;;  %v1512_v42 = vsel %vm1508_vm9, %v1503_v39, %v6989_v28 }
 0x149   :  { %5806 = vmatmul.mubr.msk.bf16.vlgmr.msra.gmra.mrb[16].mxu0 %vm125_vm4, %v6578_v6  ;;  %5877 = vmatprep.subr.msk.bf16.mxu1 %vm132_vm3, %v1512_v42  ;;  %v1527_v44 = vsel %vm132_vm3, %v1511_v41, 0  ;;  %v7143_v41 = vld [vmem:[%s8445_s2 + $0x88] sm:$0xff]   ;;  %v792_v42 = vsel %vm788_vm12, %v6917_v0, %v6915_v63 }
 0x14a   :  { %579 = vmatpush1.bf16.msra.mxu0 %v561_v43  ;;  %1592 = vmatpush1.bf16.msra.mxu1 %v1527_v44  ;;  %v6589_v44 = vld [vmem:[%s8445_s2 + $0x38] sm:$0xff]  }
 0x14b   :  { %5817 = vmatprep.subr.msk.bf16.mxu0 %vm132_vm3, %v552_v46  ;;  %v7037_v47 = vpop.permute.xlu0 %1746  ;;  %v7039_v48 = vpop.permute.xlu1 %1744  ;;  %510 = vmatprep.mubr.bf16.mxu0 %v6685_v14  ;;  %v1030_v46 = vsel %vm1028_vm6, %v6927_v5, %v6925_v3  ;;  %v6593_v3 = vld [vmem:[%s8445_s2 + $0x40] sm:$0xff]  }
 0x14d   :  { %5864 = vmatmul.mubr.msk.bf16.gmra.mrb[0].mxu1 %vm125_vm4, %v7031_v45 }
 0x14e   :  { %1623 = vmatprep.mubr.bf16.mxu1 %v6685_v14 }
 0x14f   :  { %v7045_v49 = vpop.permute.xlu0 %1976  ;;  %v1743_v50 = vpop.permute.xlu1 %1742 }
 0x150   :  { %v1752_v51 = vsel %vm1748_vm10, %v1743_v50, %v7039_v48  ;;  %v1751_v58 = vsel %vm1748_vm10, %v7018_v40, %v1743_v50 }
 0x151   :  { %5807 = vmatmul.mubr.msk.bf16.gmra.mrb[20].mxu0 %vm125_vm4, %v6579_v18  ;;  %5892 = vmatprep.subr.msk.bf16.mxu1 %vm132_vm3, %v1752_v51  ;;  %v1767_v6 = vsel %vm132_vm3, %v1751_v58, 0 }
 0x152   :  { %610 = vmatprep.mubr.bf16.mxu0 %v6685_v14 }
 0x153   :  { %v7059_v61 = vpop.permute.xlu0 %1980  ;;  %v7061_v62 = vpop.permute.xlu1 %1978 }
 0x155   :  { %5878 = vmatmul.mubr.msk.bf16.vlgmr.msra.gmra.mrb[4].mxu1 %vm125_vm4, %v7054_v53 }
 0x156   :  { %1832 = vmatpush1.bf16.msra.mxu1 %v1767_v6  ;;  %1633 = vmatprep.mubr.bf16.mxu1 %v6685_v14 }
 0x157   :  { %v7073_v11 = vpop.permute.xlu0 %1984  ;;  %v1983_v12 = vpop.permute.xlu1 %1982 }
 0x158   :  { %v1992_v18 = vsel %vm1988_vm11, %v1983_v12, %v7073_v11  ;;  %v1991_v27 = vsel %vm1988_vm11, %v7059_v61, %v1983_v12 }
 0x159   :  { %5815 = vmatmul.mubr.msk.bf16.vlgmr.msra.gmra.mrb[0].mxu0 %vm125_vm4, %v6584_v7  ;;  %5907 = vmatprep.subr.msk.bf16.mxu1 %vm132_vm3, %v1992_v18  ;;  %v2007_v30 = vsel %vm132_vm3, %v1991_v27, 0 }
 0x15a   :  { %632 = vmatpush1.bf16.msra.mxu0 %v567_v23  ;;  %620 = vmatprep.mubr.bf16.mxu0 %v6685_v14 }
 0x15b   :  { %5820 = vmatprep.subr.msk.bf16.mxu0 %vm132_vm3, %v6902_v57  ;;  %v789_v57 = vsel %vm788_vm12, %v6900_v56, %v6907_v60  ;;  %v6588_v56 = vld [vmem:[%s8445_s2 + $0x30] sm:$0xff]   ;;  %v791_v60 = vsel %vm788_vm12, %v6905_v59, %v6917_v0  ;;  %v793_v59 = vsel %vm788_vm12, %v6915_v63, %v6921_v2  ;;  %v1029_v63 = vsel %vm1028_vm6, %v6919_v1, %v6927_v5 }
 0x15c   :  { %v801_v39 = vsel %vm132_vm3, %v789_v57, 0  ;;  %v807_v43 = vsel %vm132_vm3, %v791_v60, 0  ;;  %v813_v0 = vsel %vm132_vm3, %v793_v59, 0  ;;  %v1033_v1 = vsel %vm1028_vm6, %v6933_v8, %v6957_v17 }
 0x15d   :  { %5879 = vmatmul.mubr.msk.bf16.gmra.mrb[0].mxu1 %vm125_vm4, %v7083_v52  ;;  %v1053_v5 = vsel %vm132_vm3, %v1033_v1, 0  ;;  %v2212_v57 = vsub.s32 1, %v6751_v4  ;;  %v2216_v60 = vsub.s32 2, %v6751_v4 }
 0x15e   :  { %1863 = vmatprep.mubr.bf16.mxu1 %v6685_v14 }
 0x161   :  { %5816 = vmatmul.mubr.msk.bf16.gmra.mrb[4].mxu0 %vm125_vm4, %v6586_v55 }
 0x162   :  { %663 = vmatprep.mubr.bf16.mxu0 %v6685_v14 }
 0x165   :  { %5893 = vmatmul.mubr.msk.bf16.vlgmr.msra.gmra.mrb[4].mxu1 %vm125_vm4, %v7098_v26 }
 0x166   :  { %2072 = vmatpush1.bf16.msra.mxu1 %v2007_v30  ;;  %1873 = vmatprep.mubr.bf16.mxu1 %v6685_v14 }
 0x169   :  { %5818 = vmatmul.mubr.msk.bf16.vlgmr.msra.gmra.mrb[8].mxu0 %vm125_vm4, %v6584_v7 }
 0x16a   :  { %685 = vmatpush1.bf16.msra.mxu0 %v573_v33  ;;  %673 = vmatprep.mubr.bf16.mxu0 %v6685_v14 }
 0x16b   :  { %5829 = vmatprep.subr.msk.bf16.mxu0 %vm132_vm3, %v790_v38 }
 0x16d   :  { %5894 = vmatmul.mubr.msk.bf16.gmra.mrb[0].mxu1 %vm125_vm4, %v7115_v34 }
 0x16e   :  { %2103 = vmatprep.mubr.bf16.mxu1 %v6685_v14 }
 0x171   :  { %5819 = vmatmul.mubr.msk.bf16.gmra.mrb[12].mxu0 %vm125_vm4, %v6586_v55 }
 0x172   :  { %716 = vmatprep.mubr.bf16.mxu0 %v6685_v14 }
 0x175   :  { %5908 = vmatmul.mubr.msk.bf16.vlgmr.msra.gmra.mrb[4].mxu1 %vm125_vm4, %v7129_v54 }
 0x176   :  { %2113 = vmatprep.mubr.bf16.mxu1 %v6685_v14 }
 0x179   :  { %5821 = vmatmul.mubr.msk.bf16.vlgmr.msra.gmra.mrb[16].mxu0 %vm125_vm4, %v6584_v7 }
 0x17a   :  { %819 = vmatpush1.bf16.msra.mxu0 %v801_v39  ;;  %726 = vmatprep.mubr.bf16.mxu0 %v6685_v14  ;;  %v31_v39 = vld [vmem:[%s8444_s1] sm:$0x3f] }
 0x17b   :  { %5832 = vmatprep.subr.msk.bf16.mxu0 %vm132_vm3, %v792_v42  ;;  %v7340_v42 = vrot.slane %v31_v39, %v2212_v57 }
 0x17d   :  { %5909 = vmatmul.mubr.msk.bf16.gmra.mrb[0].mxu1 %vm125_vm4, %v7143_v41 }
 0x17e   :  { %2710 = vmatprep.mubr.bf16.mxu1 %v6685_v14 }
 0x181   :  { %5822 = vmatmul.mubr.msk.bf16.gmra.mrb[20].mxu0 %vm125_vm4, %v6586_v55 }
 0x182   :  { %850 = vmatprep.mubr.bf16.mxu0 %v6685_v14 }
 0x189   :  { %5830 = vmatmul.mubr.msk.bf16.vlgmr.msra.gmra.mrb[0].mxu0 %vm125_vm4, %v6588_v56 }
 0x18a   :  { %872 = vmatpush1.bf16.msra.mxu0 %v807_v43  ;;  %860 = vmatprep.mubr.bf16.mxu0 %v6685_v14 }
 0x18b   :  { %5835 = vmatprep.subr.msk.bf16.mxu0 %vm132_vm3, %v6921_v2  ;;  %v1041_v2 = vsel %vm132_vm3, %v1029_v63, 0 }
 0x191   :  { %5831 = vmatmul.mubr.msk.bf16.gmra.mrb[4].mxu0 %vm125_vm4, %v6589_v44 }
 0x192   :  { %903 = vmatprep.mubr.bf16.mxu0 %v6685_v14 }
 0x199   :  { %5833 = vmatmul.mubr.msk.bf16.vlgmr.msra.gmra.mrb[8].mxu0 %vm125_vm4, %v6588_v56 }
 0x19a   :  { %925 = vmatpush1.bf16.msra.mxu0 %v813_v0  ;;  %913 = vmatprep.mubr.bf16.mxu0 %v6685_v14 }
 0x19b   :  { %5844 = vmatprep.subr.msk.bf16.mxu0 %vm132_vm3, %v1030_v46 }
 0x1a1   :  { %5834 = vmatmul.mubr.msk.bf16.gmra.mrb[12].mxu0 %vm125_vm4, %v6589_v44 }
 0x1a2   :  { %956 = vmatprep.mubr.bf16.mxu0 %v6685_v14 }
 0x1a9   :  { %5836 = vmatmul.mubr.msk.bf16.vlgmr.msra.gmra.mrb[16].mxu0 %vm125_vm4, %v6588_v56 }
 0x1aa   :  { %1059 = vmatpush1.bf16.msra.mxu0 %v1041_v2  ;;  %966 = vmatprep.mubr.bf16.mxu0 %v6685_v14 }
 0x1ab   :  { %5847 = vmatprep.subr.msk.bf16.mxu0 %vm132_vm3, %v6937_v10  ;;  %v1270_v10 = vsel %vm1268_vm8, %v6968_v20, %v6966_v19  ;;  %v1510_v19 = vsel %vm1508_vm9, %v6978_v24, %v6991_v29  ;;  %v1753_v29 = vsel %vm1748_vm10, %v7039_v48, %v7037_v47 }
 0x1b1   :  { %5837 = vmatmul.mubr.msk.bf16.gmra.mrb[20].mxu0 %vm125_vm4, %v6589_v44 }
 0x1b2   :  { %1090 = vmatprep.mubr.bf16.mxu0 %v6685_v14 }
 0x1b9   :  { %5845 = vmatmul.mubr.msk.bf16.vlgmr.msra.gmra.mrb[0].mxu0 %vm125_vm4, %v6593_v3 }
 0x1ba   :  { %1112 = vmatpush1.bf16.msra.mxu0 %v6946_v13  ;;  %1100 = vmatprep.mubr.bf16.mxu0 %v6685_v14  ;;  %v1269_v13 = vsel %vm1268_vm8, %v6955_v16, %v6968_v20 }
 0x1bb   :  { %5850 = vmatprep.subr.msk.bf16.mxu0 %vm132_vm3, %v6957_v17  ;;  %v1281_v8 = vsel %vm132_vm3, %v1269_v13, 0  ;;  %v1273_v17 = vsel %vm1268_vm8, %v6974_v22, %v6972_v21  ;;  %v2224_v13 = vsub.s32 4, %v6751_v4 }
 0x1bc   :  { %v1293_v16 = vsel %vm132_vm3, %v1273_v17, 0 }
 0x1c1   :  { %5846 = vmatmul.mubr.msk.bf16.gmra.mrb[4].mxu0 %vm125_vm4, %v6951_v15 }
 0x1c2   :  { %1143 = vmatprep.mubr.bf16.mxu0 %v6685_v14 }
 0x1c9   :  { %5848 = vmatmul.mubr.msk.bf16.vlgmr.msra.gmra.mrb[8].mxu0 %vm125_vm4, %v6593_v3 }
 0x1ca   :  { %1165 = vmatpush1.bf16.msra.mxu0 %v1053_v5  ;;  %1196 = vmatprep.mubr.bf16.mxu0 %v6685_v14 }
 0x1cb   :  { %5859 = vmatprep.subr.msk.bf16.mxu0 %vm132_vm3, %v1270_v10  ;;  %v2220_v10 = vsub.s32 3, %v6751_v4 }
 0x1d1   :  { %5851 = vmatmul.mubr.msk.bf16.vlgmr.msra.gmra.mrb[16].mxu0 %vm125_vm4, %v6593_v3 }
 0x1d2   :  { %1299 = vmatpush1.bf16.msra.mxu0 %v1281_v8  ;;  %1206 = vmatprep.mubr.bf16.mxu0 %v6685_v14  ;;  %v7363_v8 = vrot.slane %v31_v39, %v2216_v60 }
 0x1d3   :  { %5865 = vmatprep.subr.msk.bf16.mxu0 %vm132_vm3, %v6972_v21  ;;  %v1513_v21 = vsel %vm1508_vm9, %v6989_v28, %v6993_v31 }
 0x1d4   :  { %v1533_v22 = vsel %vm132_vm3, %v1513_v21, 0 }
 0x1d9   :  { %5852 = vmatmul.mubr.msk.bf16.gmra.mrb[20].mxu0 %vm125_vm4, %v6951_v15  ;;  %v1509_v15 = vsel %vm1508_vm9, %v6980_v25, %v6978_v24  ;;  %v1750_v24 = vsel %vm1748_vm10, %v7008_v36, %v7018_v40  ;;  %v1749_v25 = vsel %vm1748_vm10, %v7010_v37, %v7008_v36  ;;  %v1989_v36 = vsel %vm1988_vm11, %v7045_v49, %v7061_v62  ;;  %v1987_v40 = vpop.permute.xlu1 %1986 }
 0x1da   :  { %1330 = vmatprep.mubr.bf16.mxu0 %v6685_v14  ;;  %v1521_v20 = vsel %vm132_vm3, %v1509_v15, 0  ;;  %v1761_v28 = vsel %vm132_vm3, %v1749_v25, 0  ;;  %v2001_v37 = vsel %vm132_vm3, %v1989_v36, 0  ;;  %v7372_v25 = vrot.slane %v31_v39, %v2220_v10 }
 0x1e1   :  { %5860 = vmatmul.mubr.msk.bf16.vlgmr.msra.gmra.mrb[0].mxu0 %vm125_vm4, %v7005_v35 }
 0x1e2   :  { %1405 = vmatpush1.bf16.msra.mxu0 %v1293_v16  ;;  %1340 = vmatprep.mubr.bf16.mxu0 %v6685_v14  ;;  %v2228_v16 = vsub.s32 5, %v6751_v4 }
 0x1e3   :  { %5874 = vmatprep.subr.msk.bf16.mxu0 %vm132_vm3, %v1510_v19 }
 0x1e9   :  { %5861 = vmatmul.mubr.msk.bf16.gmra.mrb[4].mxu0 %vm125_vm4, %v7031_v45 }
 0x1ea   :  { %1436 = vmatprep.mubr.bf16.mxu0 %v6685_v14 }
 0x1f1   :  { %5866 = vmatmul.mubr.msk.bf16.vlgmr.msra.gmra.mrb[16].mxu0 %vm125_vm4, %v7005_v35  ;;  %v1990_v35 = vsel %vm1988_vm11, %v7061_v62, %v7059_v61 }
 0x1f2   :  { %1539 = vmatpush1.bf16.msra.mxu0 %v1521_v20  ;;  %1446 = vmatprep.mubr.bf16.mxu0 %v6685_v14 }
 0x1f3   :  { %5880 = vmatprep.subr.msk.bf16.mxu0 %vm132_vm3, %v6993_v31  ;;  %v1773_v31 = vsel %vm132_vm3, %v1753_v29, 0 }
 0x1f9   :  { %5867 = vmatmul.mubr.msk.bf16.gmra.mrb[20].mxu0 %vm125_vm4, %v7031_v45  ;;  %v1993_v45 = vsel %vm1988_vm11, %v7073_v11, %v1987_v40 }
 0x1fa   :  { %1570 = vmatprep.mubr.bf16.mxu0 %v6685_v14 }
 0x201   :  { %5875 = vmatmul.mubr.msk.bf16.vlgmr.msra.gmra.mrb[0].mxu0 %vm125_vm4, %v7054_v53 }
 0x202   :  { %1645 = vmatpush1.bf16.msra.mxu0 %v1533_v22  ;;  %1580 = vmatprep.mubr.bf16.mxu0 %v6685_v14 }
 0x203   :  { %5889 = vmatprep.subr.msk.bf16.mxu0 %vm132_vm3, %v1750_v24 }
 0x209   :  { %5876 = vmatmul.mubr.msk.bf16.gmra.mrb[4].mxu0 %vm125_vm4, %v7083_v52 }
 0x20a   :  { %1676 = vmatprep.mubr.bf16.mxu0 %v6685_v14 }
 0x211   :  { %5881 = vmatmul.mubr.msk.bf16.vlgmr.msra.gmra.mrb[16].mxu0 %vm125_vm4, %v7054_v53 }
 0x212   :  { %1779 = vmatpush1.bf16.msra.mxu0 %v1761_v28  ;;  %1686 = vmatprep.mubr.bf16.mxu0 %v6685_v14  ;;  %v7374_v28 = vrot.slane %v31_v39, %v2224_v13 }
 0x213   :  { %5895 = vmatprep.subr.msk.bf16.mxu0 %vm132_vm3, %v7037_v47  ;;  %v2013_v47 = vsel %vm132_vm3, %v1993_v45, 0 }
 0x219   :  { %5882 = vmatmul.mubr.msk.bf16.gmra.mrb[20].mxu0 %vm125_vm4, %v7083_v52 }
 0x21a   :  { %1810 = vmatprep.mubr.bf16.mxu0 %v6685_v14 }
 0x221   :  { %5890 = vmatmul.mubr.msk.bf16.vlgmr.msra.gmra.mrb[0].mxu0 %vm125_vm4, %v7098_v26 }
 0x222   :  { %1885 = vmatpush1.bf16.msra.mxu0 %v1773_v31  ;;  %1820 = vmatprep.mubr.bf16.mxu0 %v6685_v14 }
 0x223   :  { %5904 = vmatprep.subr.msk.bf16.mxu0 %vm132_vm3, %v1990_v35  ;;  %v7382_v35 = vrot.slane %v31_v39, %v2228_v16 }
 0x229   :  { %5891 = vmatmul.mubr.msk.bf16.gmra.mrb[4].mxu0 %vm125_vm4, %v7115_v34 }
 0x22a   :  { %1916 = vmatprep.mubr.bf16.mxu0 %v6685_v14 }
 0x231   :  { %5896 = vmatmul.mubr.msk.bf16.vlgmr.msra.gmra.mrb[16].mxu0 %vm125_vm4, %v7098_v26 }
 0x232   :  { %2019 = vmatpush1.bf16.msra.mxu0 %v2001_v37  ;;  %1926 = vmatprep.mubr.bf16.mxu0 %v6685_v14 }
 0x233   :  { %5910 = vmatprep.subr.msk.bf16.mxu0 %vm132_vm3, %v1987_v40 }
 0x239   :  { %5897 = vmatmul.mubr.msk.bf16.gmra.mrb[20].mxu0 %vm125_vm4, %v7115_v34 }
 0x23a   :  { %2050 = vmatprep.mubr.bf16.mxu0 %v6685_v14 }
 0x241   :  { %5905 = vmatmul.mubr.msk.bf16.vlgmr.msra.gmra.mrb[0].mxu0 %vm125_vm4, %v7129_v54 }
 0x242   :  { %2125 = vmatpush1.bf16.msra.mxu0 %v2013_v47  ;;  %2060 = vmatprep.mubr.bf16.mxu0 %v6685_v14 }
 0x248   :  { %v2105_v48 = vpop.f32.mrb[4].mxu1 }
 0x249   :  { %5906 = vmatmul.mubr.msk.bf16.gmra.mrb[4].mxu0 %vm125_vm4, %v7143_v41  ;;  %v2107_v49 = vpop.f32.mrb[5].mxu1 }
 0x24a   :  { %2156 = vmatprep.mubr.bf16.mxu0 %v6685_v14  ;;  %v2109_v50 = vpop.f32.mrb[6].mxu1 }
 0x24b   :  { %v2111_v51 = vpop.f32.mrb[7].mxu1 }
 0x250   :  { %v2115_v53 = vpop.f32.mrb[0].mxu1 }
 0x251   :  { %5911 = vmatmul.mubr.msk.bf16.vlgmr.msra.gmra.mrb[16].mxu0 %vm125_vm4, %v7129_v54  ;;  %v2117_v58 = vpop.f32.mrb[1].mxu1  ;;  %v2208_v54 = vsub.s32 0, %v6751_v4 }
 0x252   :  { %2166 = vmatprep.mubr.bf16.mxu0 %v6685_v14  ;;  %v2119_v61 = vpop.f32.mrb[2].mxu1 }
 0x253   :  { %v2121_v62 = vpop.f32.mrb[3].mxu1 }
 0x259   :  { %5912 = vmatmul.mubr.msk.bf16.gmra.mrb[20].mxu0 %vm125_vm4, %v7143_v41  ;;  %v7338_v41 = vrot.slane %v31_v39, %v2208_v54 }
 0x25a   :  { %5139 = vmatprep.mubr.bf16.mxu0 %v6685_v14 }
 0x274   :  { %v915_v6 = vpop.f32.mrb[12].mxu0 }
 0x275   :  { %v7317_v7 = vadd.f32 %v2115_v53, %v915_v6  ;;  %v917_v9 = vpop.f32.mrb[13].mxu0 }
 0x276   :  { %v7319_v11 = vadd.f32 %v2117_v58, %v917_v9  ;;  %v919_v12 = vpop.f32.mrb[14].mxu0 }
 0x277   :  { %v7321_v18 = vadd.f32 %v2119_v61, %v919_v12  ;;  %v921_v23 = vpop.f32.mrb[15].mxu0  ;;  %v2250_v36 = vmul.f32 %v7317_v7, %v7363_v8 }
 0x278   :  { %v7323_v52 = vadd.f32 %v2121_v62, %v921_v23  ;;  %v2251_v54 = vmul.f32 %v7319_v11, %v7372_v25 }
 0x279   :  { %v2256_v37 = vmul.f32 %v7321_v18, %v7363_v8  ;;  %v2311_v39 = vmul.f32 %v7317_v7, %v2250_v36 }
 0x27a   :  { %v2257_v60 = vmul.f32 %v7323_v52, %v7372_v25 }
 0x27b   :  { %v2317_v10 = vmul.f32 %v7321_v18, %v2256_v37 }
 0x29c   :  { %v1145_v55 = vpop.f32.mrb[8].mxu0 }
 0x29d   :  { %v7325_v26 = vadd.f32 %v2105_v48, %v1145_v55  ;;  %v1147_v27 = vpop.f32.mrb[9].mxu0 }
 0x29e   :  { %v7327_v30 = vadd.f32 %v2107_v49, %v1147_v27  ;;  %v1149_v32 = vpop.f32.mrb[10].mxu0 }
 0x29f   :  { %v7329_v33 = vadd.f32 %v2109_v50, %v1149_v32  ;;  %v1151_v34 = vpop.f32.mrb[11].mxu0  ;;  %v2238_v21 = vmul.f32 %v7325_v26, %v7363_v8 }
 0x2a0   :  { %v7331_v38 = vadd.f32 %v2111_v51, %v1151_v34  ;;  %v2239_v48 = vmul.f32 %v7327_v30, %v7372_v25 }
 0x2a1   :  { %v2244_v29 = vmul.f32 %v7329_v33, %v7363_v8  ;;  %v2299_v47 = vmul.f32 %v7325_v26, %v2238_v21 }
 0x2a2   :  { %v2245_v53 = vmul.f32 %v7331_v38, %v7372_v25 }
 0x2a3   :  { %v2305_v6 = vmul.f32 %v7329_v33, %v2244_v29 }
 0x314   :  { %v7342_v56 = vpop.f32.mrb[0].mxu0 }
 0x315   :  { %v2236_v43 = vmul.f32 %v7338_v41, %v7342_v56  ;;  %v7347_v44 = vpop.f32.mrb[1].mxu0 }
 0x316   :  { %v2237_v59 = vmul.f32 %v7340_v42, %v7347_v44  ;;  %v7351_v0 = vpop.f32.mrb[2].mxu0 }
 0x317   :  { %v2297_v46 = vmul.f32 %v2236_v43, %v7342_v56  ;;  %v2242_v63 = vmul.f32 %v7338_v41, %v7351_v0  ;;  %v7356_v2 = vpop.f32.mrb[3].mxu0 }
 0x318   :  { %v2260_v3 = vadd.f32 %v2237_v59, %v2236_v43  ;;  %v2298_v1 = vmul.f32 %v2237_v59, %v7347_v44  ;;  %v2243_v5 = vmul.f32 %v7340_v42, %v7356_v2  ;;  %v2300_v43 = vmul.f32 %v7327_v30, %v2239_v48 }
 0x319   :  { %v2303_v17 = vmul.f32 %v2242_v63, %v7351_v0 }
 0x31a   :  { %v2321_v19 = vadd.f32 %v2298_v1, %v2297_v46  ;;  %v2269_v15 = vadd.f32 %v2243_v5, %v2242_v63  ;;  %v2304_v20 = vmul.f32 %v2243_v5, %v7356_v2  ;;  %v2261_v12 = vadd.f32 %v2260_v3, %v2238_v21 }
 0x31b   :  { %v2306_v63 = vmul.f32 %v7331_v38, %v2245_v53 }
 0x31c   :  { %v2329_v22 = vadd.f32 %v2304_v20, %v2303_v17  ;;  %v7370_v24 = vpop.f32.mrb[4].mxu0  ;;  %v2270_v23 = vadd.f32 %v2269_v15, %v2244_v29  ;;  %v2322_v34 = vadd.f32 %v2321_v19, %v2299_v47  ;;  %v2262_v5 = vadd.f32 %v2261_v12, %v2239_v48 }
 0x31d   :  { %v2248_v4 = vmul.f32 %v7338_v41, %v7370_v24  ;;  %v7380_v31 = vpop.f32.mrb[5].mxu0 }
 0x31e   :  { %v2249_v40 = vmul.f32 %v7340_v42, %v7380_v31  ;;  %v7390_v45 = vpop.f32.mrb[6].mxu0  ;;  %v2330_v57 = vadd.f32 %v2329_v22, %v2305_v6  ;;  %v2271_v16 = vadd.f32 %v2270_v23, %v2245_v53  ;;  %v2323_v19 = vadd.f32 %v2322_v34, %v2300_v43 }
 0x31f   :  { %v2309_v49 = vmul.f32 %v2248_v4, %v7370_v24  ;;  %v2254_v50 = vmul.f32 %v7338_v41, %v7390_v45  ;;  %v7398_v51 = vpop.f32.mrb[7].mxu0  ;;  %v2312_v43 = vmul.f32 %v7319_v11, %v2251_v54 }
 0x320   :  { %v2277_v58 = vadd.f32 %v2249_v40, %v2248_v4  ;;  %v2310_v61 = vmul.f32 %v2249_v40, %v7380_v31  ;;  %v2255_v62 = vmul.f32 %v7340_v42, %v7398_v51  ;;  %v2331_v29 = vadd.f32 %v2330_v57, %v2306_v63 }
 0x321   :  { %v2315_v9 = vmul.f32 %v2254_v50, %v7390_v45 }
 0x322   :  { %v2337_v55 = vadd.f32 %v2310_v61, %v2309_v49  ;;  %v2285_v27 = vadd.f32 %v2255_v62, %v2254_v50  ;;  %v2316_v32 = vmul.f32 %v2255_v62, %v7398_v51  ;;  %v2278_v48 = vadd.f32 %v2277_v58, %v2250_v36 }
 0x324   :  { %v2345_v59 = vadd.f32 %v2316_v32, %v2315_v9  ;;  %v7414_v46 = vpop.f32.mrb[16].mxu0  ;;  %v2338_v12 = vadd.f32 %v2337_v55, %v2311_v39  ;;  %v2286_v57 = vadd.f32 %v2285_v27, %v2256_v37  ;;  %v2318_v39 = vmul.f32 %v7323_v52, %v2257_v60 }
 0x325   :  { %v2240_v3 = vmul.f32 %v7374_v28, %v7414_v46  ;;  %v7419_v1 = vpop.f32.mrb[17].mxu0 }
 0x326   :  { %v2241_v13 = vmul.f32 %v7382_v35, %v7419_v1  ;;  %v7424_v17 = vpop.f32.mrb[18].mxu0  ;;  %v2346_v63 = vadd.f32 %v2345_v59, %v2317_v10 }
 0x327   :  { %v2301_v15 = vmul.f32 %v2240_v3, %v7414_v46  ;;  %v2246_v20 = vmul.f32 %v7374_v28, %v7424_v17  ;;  %v7429_v21 = vpop.f32.mrb[19].mxu0  ;;  %v2263_v22 = vadd.f32 %v2262_v5, %v2240_v3 }
 0x328   :  { %v2302_v4 = vmul.f32 %v2241_v13, %v7419_v1  ;;  %v2247_v40 = vmul.f32 %v7382_v35, %v7429_v21  ;;  %v2265_v47 = vsel %vm2264_vm13, %v2241_v13, 0.0  ;;  %v2279_v13 = vadd.f32 %v2278_v48, %v2251_v54 }
 0x329   :  { %v2307_v49 = vmul.f32 %v2246_v20, %v7424_v17  ;;  %v2266_v50 = vadd.f32 %v2265_v47, %v2263_v22  ;;  %v2272_v53 = vadd.f32 %v2271_v16, %v2246_v20  ;;  %v2324_v61 = vadd.f32 %v2323_v19, %v2301_v15 }
 0x32a   :  { %v2308_v62 = vmul.f32 %v2247_v40, %v7429_v21  ;;  %v2273_v6 = vsel %vm2264_vm13, %v2247_v40, 0.0  ;;  %v2325_v9 = vsel %vm2264_vm13, %v2302_v4, 0.0  ;;  %v2339_v16 = vadd.f32 %v2338_v12, %v2312_v43 }
 0x32b   :  { %2267 = vadd.xlane.f32.xlu0 %v2266_v50  ;;  %v2274_v23 = vadd.f32 %v2273_v6, %v2272_v53  ;;  %v2326_v32 = vadd.f32 %v2325_v9, %v2324_v61  ;;  %v2332_v34 = vadd.f32 %v2331_v29, %v2307_v49  ;;  %v2287_v20 = vadd.f32 %v2286_v57, %v2257_v60 }
 0x32c   :  { %v7440_v36 = vpop.f32.mrb[20].mxu0  ;;  %v2333_v58 = vsel %vm2264_vm13, %v2308_v62, 0.0  ;;  %v2347_v4 = vadd.f32 %v2346_v63, %v2318_v39 }
 0x32d   :  { %v2252_v3 = vmul.f32 %v7374_v28, %v7440_v36  ;;  %v7445_v5 = vpop.f32.mrb[21].mxu0  ;;  %2275 = vadd.xlane.f32.xlu1 %v2274_v23  ;;  %v2334_v55 = vadd.f32 %v2333_v58, %v2332_v34 }
 0x32e   :  { %v2253_v37 = vmul.f32 %v7382_v35, %v7445_v5  ;;  %v7450_v27 = vpop.f32.mrb[22].mxu0 }
 0x32f   :  { %v2313_v19 = vmul.f32 %v2252_v3, %v7440_v36  ;;  %v2258_v59 = vmul.f32 %v7374_v28, %v7450_v27  ;;  %v7455_v10 = vpop.f32.mrb[23].mxu0  ;;  %2327 = vadd.xlane.f32.xlu0 %v2326_v32  ;;  %v2280_v15 = vadd.f32 %v2279_v13, %v2252_v3 }
 0x330   :  { %v2314_v54 = vmul.f32 %v2253_v37, %v7445_v5  ;;  %v2259_v22 = vmul.f32 %v7382_v35, %v7455_v10  ;;  %v2281_v29 = vsel %vm2264_vm13, %v2253_v37, 0.0 }
 0x331   :  { %v2319_v40 = vmul.f32 %v2258_v59, %v7450_v27  ;;  %v2282_v47 = vadd.f32 %v2281_v29, %v2280_v15  ;;  %v2340_v48 = vadd.f32 %v2339_v16, %v2313_v19  ;;  %v2288_v49 = vadd.f32 %v2287_v20, %v2258_v59 }
 0x332   :  { %v2320_v50 = vmul.f32 %v2259_v22, %v7455_v10  ;;  %v2341_v53 = vsel %vm2264_vm13, %v2314_v54, 0.0  ;;  %v2289_v61 = vsel %vm2264_vm13, %v2259_v22, 0.0 }
 0x333   :  { %2283 = vadd.xlane.f32.xlu1 %v2282_v47  ;;  %2335 = vadd.xlane.f32.xlu0 %v2334_v55  ;;  %v2342_v60 = vadd.f32 %v2341_v53, %v2340_v48  ;;  %v2290_v62 = vadd.f32 %v2289_v61, %v2288_v49  ;;  %v2348_v6 = vadd.f32 %v2347_v4, %v2319_v40  ;;  %v2201_v61 = vld [vmem:[%s8447_s4] sm:$0xff] }
 0x334   :  { %v2349_v9 = vsel %vm2264_vm13, %v2320_v50, 0.0 }
 0x335   :  { %v2350_v12 = vadd.f32 %v2349_v9, %v2348_v6  ;;  %v2202_v9 = vld [vmem:[%s8447_s4 + $0x8] sm:$0xff] }
 0x337   :  { %2343 = vadd.xlane.f32.xlu1 %v2342_v60  ;;  %2291 = vadd.xlane.f32.xlu0 %v2290_v62 }
 0x33b   :  { %2351 = vadd.xlane.f32.xlu0 %v2350_v12 }
 0x3b8   :  { %v2268_v23 = vpop.xlane.xlu0 %2267 }
 0x3b9   :  { %v2293_v32 = vmul.f32 0.001953125, %v2268_v23 }
 0x3ba   :  { %v2276_v34 = vpop.xlane.xlu1 %2275 }
 0x3bb   :  { %v2357_v43 = vmul.f32 %v2293_v32, %v2293_v32  ;;  %v2294_v58 = vmul.f32 0.001953125, %v2276_v34 }
 0x3bc   :  { %v2328_v57 = vpop.xlane.xlu0 %2327 }
 0x3bd   :  { %v2353_v63 = vmul.f32 0.001953125, %v2328_v57  ;;  %v2358_v55 = vmul.f32 %v2294_v58, %v2294_v58  ;;  %v2203_v57 = vld [vmem:[%s8447_s4 + $0x10] sm:$0xff] }
 0x3bf   :  { %v2361_v3 = vsub.f32 %v2353_v63, %v2357_v43 }
 0x3c0   :  { %v2284_v13 = vpop.xlane.xlu1 %2283  ;;  %v2336_v39 = vpop.xlane.xlu0 %2335 }
 0x3c1   :  { %v2365_v37 = vadd.f32 1e-05, %v2361_v3  ;;  %v2295_v16 = vmul.f32 0.001953125, %v2284_v13  ;;  %v2354_v19 = vmul.f32 0.001953125, %v2336_v39  ;;  %v2204_v13 = vld [vmem:[%s8447_s4 + $0x18] sm:$0xff] }
 0x3c3   :  { %6637 = vrsqrt.f32 %v2365_v37  ;;  %v2362_v59 = vsub.f32 %v2354_v19, %v2358_v55  ;;  %v2359_v54 = vmul.f32 %v2295_v16, %v2295_v16  ;;  %v6696_v19 = vmov 1  }
 0x3c4   :  { %v2344_v15 = vpop.xlane.xlu1 %2343  ;;  %v2292_v20 = vpop.xlane.xlu0 %2291 }
 0x3c5   :  { %v2366_v22 = vadd.f32 1e-05, %v2362_v59  ;;  %v2355_v29 = vmul.f32 0.001953125, %v2344_v15  ;;  %v2296_v4 = vmul.f32 0.001953125, %v2292_v20 }
 0x3c7   :  { %6639 = vrsqrt.f32 %v2366_v22  ;;  %v2363_v40 = vsub.f32 %v2355_v29, %v2359_v54  ;;  %v2360_v49 = vmul.f32 %v2296_v4, %v2296_v4 }
 0x3c8   :  { %v2352_v47 = vpop.xlane.xlu0 %2351 }
 0x3c9   :  { %v2367_v48 = vadd.f32 1e-05, %v2363_v40  ;;  %v2356_v50 = vmul.f32 0.001953125, %v2352_v47 }
 0x3cb   :  { %6641 = vrsqrt.f32 %v2367_v48  ;;  %v2364_v53 = vsub.f32 %v2356_v50, %v2360_v49 }
 0x3cd   :  { %v6638_v60 = vpop.eup %6637  ;;  %v2368_v62 = vadd.f32 1e-05, %v2364_v53 }
 0x3ce   :  { %v2373_v6 = vmul.f32 %v6638_v60, %v2201_v61 }
 0x3cf   :  { %6643 = vrsqrt.f32 %v2368_v62 }
 0x3d0   :  { %v2421_v12 = vmul.f32 %v2373_v6, %v2293_v32 }
 0x3d1   :  { %v6640_v23 = vpop.eup %6639 }
 0x3d2   :  { %2429 = vrot.lane.b32.xlu1 %v2421_v12, %s6695_s19  ;;  %v2374_v34 = vmul.f32 %v6640_v23, %v2202_v9 }
 0x3d4   :  { %v2422_v43 = vmul.f32 %v2374_v34, %v2294_v58 }
 0x3d5   :  { %v6642_v63 = vpop.eup %6641 }
 0x3d6   :  { %2431 = vrot.lane.b32.xlu0 %v2422_v43, %s6695_s19  ;;  %v2375_v3 = vmul.f32 %v6642_v63, %v2203_v57 }
 0x3d8   :  { %v2423_v39 = vmul.f32 %v2375_v3, %v2295_v16 }
 0x3d9   :  { %v6644_v32 = vpop.eup %6643 }
 0x3da   :  { %2433 = vrot.lane.b32.xlu1 %v2423_v39, %s6695_s19  ;;  %2379 = vperm.xlu0 %6566, %v2373_v6   ;;  %v2376_v55 = vmul.f32 %v6644_v32, %v2204_v13 }
 0x3dc   :  { %v2424_v37 = vmul.f32 %v2376_v55, %v2296_v4 }
 0x3de   :  { %2435 = vrot.lane.b32.xlu1 %v2424_v37, %s6695_s19  ;;  %6569 = vset.pattern.permute.xlu0 %v6696_v19 }
 0x3e2   :  { %2384 = vperm.xlu1 %6567, %v2374_v34  }
 0x3e6   :  { %2389 = vperm.xlu1 %6567, %v2375_v3  }
 0x3ea   :  { %2394 = vperm.xlu1 %6567, %v2376_v55  }
 0x3ee   :  { %6568 = vset.pattern.permute.xlu1 %v6696_v19 }
 0x444   :  { %v2430_v58 = vpop.permute.xlu1 %2429 }
 0x445   :  { %v2441_v59 = vsub.f32 %v2201_v61, %v2430_v58 }
 0x447   :  { %2447 = vperm.xlu1 %6568, %v2441_v59  }
 0x448   :  { %v2432_v15 = vpop.permute.xlu0 %2431 }
 0x449   :  { %v2442_v20 = vsub.f32 %v2202_v9, %v2432_v15 }
 0x44b   :  { %2452 = vperm.xlu0 %6569, %v2442_v20  }
 0x44c   :  { %v2434_v16 = vpop.permute.xlu1 %2433 }
 0x44d   :  { %v2443_v54 = vsub.f32 %v2203_v57, %v2434_v16 }
 0x44f   :  { %2457 = vperm.xlu0 %6569, %v2443_v54  }
 0x450   :  { %v2436_v22 = vpop.permute.xlu1 %2435 }
 0x451   :  { %v2444_v29 = vsub.f32 %v2204_v13, %v2436_v22 }
 0x453   :  { %2462 = vperm.xlu1 %6568, %v2444_v29  }
 0x459   :  { %v2380_v47 = vpop.permute.xlu0 %2379 }
 0x45a   :  { %v2398_v49 = vmul.f32 %v2380_v47, %v7347_v44  ;;  %v2397_v50 = vmul.f32 %v2380_v47, %v7342_v56  ;;  %v2399_v53 = vmul.f32 %v7325_v26, %v2380_v47  ;;  %v2400_v61 = vmul.f32 %v7327_v30, %v2380_v47 }
 0x45b   :  { %v2401_v60 = vmul.f32 %v2380_v47, %v7414_v46  ;;  %v2402_v62 = vmul.f32 %v2380_v47, %v7419_v1 }
 0x461   :  { %v2385_v4 = vpop.permute.xlu1 %2384 }
 0x462   :  { %v2404_v6 = vmul.f32 %v2385_v4, %v7356_v2  ;;  %v2403_v9 = vmul.f32 %v2385_v4, %v7351_v0  ;;  %v2405_v12 = vmul.f32 %v7329_v33, %v2385_v4  ;;  %v2406_v23 = vmul.f32 %v7331_v38, %v2385_v4 }
 0x463   :  { %v2407_v26 = vmul.f32 %v2385_v4, %v7424_v17  ;;  %v2408_v30 = vmul.f32 %v2385_v4, %v7429_v21 }
 0x465   :  { %v2390_v40 = vpop.permute.xlu1 %2389 }
 0x466   :  { %v2410_v44 = vmul.f32 %v2390_v40, %v7380_v31  ;;  %v2409_v56 = vmul.f32 %v2390_v40, %v7370_v24  ;;  %v2411_v1 = vmul.f32 %v7317_v7, %v2390_v40  ;;  %v2412_v2 = vmul.f32 %v7319_v11, %v2390_v40 }
 0x467   :  { %v2413_v33 = vmul.f32 %v2390_v40, %v7440_v36  ;;  %v7500_v38 = vmul.f32 %v2390_v40, %v7445_v5 }
 0x469   :  { %v2395_v48 = vpop.permute.xlu1 %2394 }
 0x46a   :  { %v2416_v24 = vmul.f32 %v2395_v48, %v7398_v51  ;;  %v2415_v17 = vmul.f32 %v2395_v48, %v7390_v45  ;;  %v2417_v13 = vmul.f32 %v7321_v18, %v2395_v48  ;;  %v2418_v7 = vmul.f32 %v7323_v52, %v2395_v48 }
 0x46b   :  { %v2419_v11 = vmul.f32 %v2395_v48, %v7450_v27  ;;  %v7510_v5 = vmul.f32 %v2395_v48, %v7455_v10 }
 0x4c6   :  { %v2448_v34 = vpop.permute.xlu1 %2447 }
 0x4c7   :  { %v2466_v46 = vadd.f32 %v2448_v34, %v2398_v49  ;;  %v2465_v57 = vadd.f32 %v2448_v34, %v2397_v50  ;;  %v2467_v0 = vadd.f32 %v2448_v34, %v2399_v53  ;;  %v2469_v43 = vadd.f32 %v2448_v34, %v2401_v60 }
 0x4c8   :  { %v2470_v63 = vadd.f32 %v2448_v34, %v2402_v62  ;;  %v7507_v36 = vadd.f32 %v2448_v34, %v2400_v61 }
 0x4c9   :  { %v2490_v31 = vmax.f32 %v2466_v46, 0.0  ;;  %v2489_v3 = vmax.f32 %v2465_v57, 0.0  ;;  %v2491_v51 = vmax.f32 %v2467_v0, 0.0  ;;  %v2493_v45 = vmax.f32 %v2469_v43, 0.0 }
 0x4ca   :  { %v2453_v21 = vpop.permute.xlu0 %2452  ;;  %v2494_v18 = vmax.f32 %v2470_v63, 0.0  ;;  %v2492_v47 = vmax.f32 %v7507_v36, 0.0 }
 0x4cb   :  { %v2472_v39 = vadd.f32 %v2453_v21, %v2404_v6  ;;  %v2471_v32 = vadd.f32 %v2453_v21, %v2403_v9  ;;  %v2473_v55 = vadd.f32 %v2453_v21, %v2405_v12  ;;  %v2474_v37 = vadd.f32 %v2453_v21, %v2406_v23 }
 0x4cc   :  { %v2514_v58 = vmul.f32 %v2490_v31, %v7340_v42  ;;  %v2513_v52 = vmul.f32 %v2489_v3, %v7338_v41  ;;  %v2475_v16 = vadd.f32 %v2453_v21, %v2407_v26  ;;  %v2515_v4 = vmul.f32 %v2491_v51, %v7363_v8 }
 0x4cd   :  { %v2496_v19 = vmax.f32 %v2472_v39, 0.0  ;;  %v2495_v59 = vmax.f32 %v2471_v32, 0.0  ;;  %v2497_v27 = vmax.f32 %v2473_v55, 0.0  ;;  %v2498_v20 = vmax.f32 %v2474_v37, 0.0 }
 0x4ce   :  { %v2458_v15 = vpop.permute.xlu0 %2457  ;;  %v2517_v61 = vmul.f32 %v2493_v45, %v7374_v28  ;;  %v2476_v9 = vadd.f32 %v2453_v21, %v2408_v30  ;;  %v2518_v12 = vmul.f32 %v2494_v18, %v7382_v35 }
 0x4cf   :  { %v2520_v54 = vmul.f32 %v2496_v19, %v7340_v42  ;;  %v2519_v10 = vmul.f32 %v2495_v59, %v7338_v41  ;;  %v2478_v22 = vadd.f32 %v2458_v15, %v2410_v44  ;;  %v2477_v29 = vadd.f32 %v2458_v15, %v2409_v56 }
 0x4d0   :  { %v2521_v40 = vmul.f32 %v2497_v27, %v7363_v8  ;;  %v2479_v48 = vadd.f32 %v2458_v15, %v2411_v1  ;;  %v2522_v6 = vmul.f32 %v2498_v20, %v7372_v25  ;;  %v2480_v44 = vadd.f32 %v2458_v15, %v2412_v2 }
 0x4d1   :  { %v2538_v49 = vpack.c.bf16 %v2520_v54, %v2514_v58  ;;  %v2537_v50 = vpack.c.bf16 %v2519_v10, %v2513_v52  ;;  %v2502_v53 = vmax.f32 %v2478_v22, 0.0  ;;  %v2501_v62 = vmax.f32 %v2477_v29, 0.0 }
 0x4d2   :  { %v2463_v60 = vpop.permute.xlu1 %2462  ;;  %v2499_v56 = vmax.f32 %v2475_v16, 0.0  ;;  %v2539_v26 = vpack.c.bf16 %v2521_v40, %v2515_v4  ;;  %v2503_v57 = vmax.f32 %v2479_v48, 0.0  ;;  %v2500_v3 = vmax.f32 %v2476_v9, 0.0 }
 0x4d3   :  { %2563 = vrot.lane.b32.xlu1 %v2538_v49, %s6684_s9  ;;  %2561 = vrot.lane.b32.xlu0 %v2537_v50, %s6684_s9  ;;  %v2484_v23 = vadd.f32 %v2463_v60, %v2416_v24  ;;  %v2483_v34 = vadd.f32 %v2463_v60, %v2415_v17  ;;  %v2485_v46 = vadd.f32 %v2463_v60, %v2417_v13  ;;  %v2504_v59 = vmax.f32 %v2480_v44, 0.0 }
 0x4d4   :  { %v2486_v1 = vadd.f32 %v2463_v60, %v2418_v7  ;;  %v2526_v43 = vmul.f32 %v2502_v53, %v7340_v42  ;;  %v2523_v30 = vmul.f32 %v2499_v56, %v7374_v28  ;;  %v2525_v63 = vmul.f32 %v2501_v62, %v7338_v41 }
 0x4d5   :  { %v2508_v0 = vmax.f32 %v2484_v23, 0.0  ;;  %v2507_v31 = vmax.f32 %v2483_v34, 0.0  ;;  %v2509_v21 = vmax.f32 %v2485_v46, 0.0  ;;  %v2481_v39 = vadd.f32 %v2458_v15, %v2413_v33 }
 0x4d6   :  { %v2541_v17 = vpack.c.bf16 %v2523_v30, %v2517_v61  ;;  %v2487_v13 = vadd.f32 %v2463_v60, %v2419_v11  ;;  %v2510_v32 = vmax.f32 %v2486_v1, 0.0  ;;  %v2524_v36 = vmul.f32 %v2500_v3, %v7382_v35 }
 0x4d7   :  { %2565 = vrot.lane.b32.xlu0 %v2539_v26, %s6684_s9  ;;  %v2532_v2 = vmul.f32 %v2508_v0, %v7340_v42  ;;  %v2531_v24 = vmul.f32 %v2507_v31, %v7338_v41  ;;  %v2533_v7 = vmul.f32 %v2509_v21, %v7363_v8  ;;  %v2505_v55 = vmax.f32 %v2481_v39, 0.0 }
 0x4d8   :  { %v2511_v45 = vmax.f32 %v2487_v13, 0.0  ;;  %v2482_v19 = vadd.f32 %v2458_v15, %v7500_v38  ;;  %v2516_v33 = vmul.f32 %v2492_v47, %v7372_v25  ;;  %v2527_v58 = vmul.f32 %v2503_v57, %v7363_v8 }
 0x4d9   :  { %v2544_v51 = vpack.c.bf16 %v2532_v2, %v2526_v43  ;;  %v2543_v37 = vpack.c.bf16 %v2531_v24, %v2525_v63  ;;  %v2542_v18 = vpack.c.bf16 %v2524_v36, %v2518_v12  ;;  %v2529_v11 = vmul.f32 %v2505_v55, %v7374_v28 }
 0x4da   :  { %v2535_v52 = vmul.f32 %v2511_v45, %v7374_v28  ;;  %v2488_v27 = vadd.f32 %v2463_v60, %v7510_v5  ;;  %v2506_v20 = vmax.f32 %v2482_v19, 0.0  ;;  %v2540_v16 = vpack.c.bf16 %v2522_v6, %v2516_v33 }
 0x4db   :  { %2575 = vrot.lane.b32.xlu0 %v2544_v51, %s6684_s9  ;;  %2573 = vrot.lane.b32.xlu1 %v2543_v37, %s6684_s9  ;;  %v2545_v54 = vpack.c.bf16 %v2533_v7, %v2527_v58  ;;  %v2534_v38 = vmul.f32 %v2510_v32, %v7372_v25  ;;  %v2528_v22 = vmul.f32 %v2504_v59, %v7372_v25  ;;  %v6594_v37 = vld [vmem:[%s8446_s3 + $0x10] sm:$0xff]  }
 0x4dc   :  { %v2547_v15 = vpack.c.bf16 %v2535_v52, %v2529_v11  ;;  %v2512_v10 = vmax.f32 %v2488_v27, 0.0  ;;  %v2530_v29 = vmul.f32 %v2506_v20, %v7382_v35  ;;  %v6595_v27 = vld [vmem:[%s8446_s3 + $0x18] sm:$0xff]  }
 0x4dd   :  { %v2546_v40 = vpack.c.bf16 %v2534_v38, %v2528_v22 }
 0x4de   :  { %v2536_v4 = vmul.f32 %v2512_v10, %v7382_v35 }
 0x4df   :  { %2567 = vrot.lane.b32.xlu0 %v2540_v16, %s6684_s9  ;;  %2577 = vrot.lane.b32.xlu1 %v2545_v54, %s6684_s9 }
 0x4e0   :  { %v2548_v47 = vpack.c.bf16 %v2536_v4, %v2530_v29 }
 0x4e3   :  { %2579 = vrot.lane.b32.xlu0 %v2546_v40, %s6684_s9  ;;  %2569 = vrot.lane.b32.xlu1 %v2541_v17, %s6684_s9 }
 0x4e7   :  { %2571 = vrot.lane.b32.xlu0 %v2542_v18, %s6684_s9  ;;  %2581 = vrot.lane.b32.xlu1 %v2547_v15, %s6684_s9 }
 0x4eb   :  { %2583 = vrot.lane.b32.xlu1 %v2548_v47, %s6684_s9 }
 0x545   :  { %v2564_v5 = vpop.permute.xlu1 %2563  ;;  %v2562_v48 = vpop.permute.xlu0 %2561 }
 0x546   :  { %v7552_v49 = vsel %vm73_vm0, %v2562_v48, %v2564_v5  ;;  %v7557_v53 = vsel %vm73_vm0, 0, %v2562_v48 }
 0x547   :  { %2628 = vrot.lane.b32.xlu0 %v7552_v49, %s6686_s0 }
 0x549   :  { %v2566_v50 = vpop.permute.xlu0 %2565 }
 0x54a   :  { %v7560_v61 = vsel %vm73_vm0, %v2564_v5, %v2566_v50 }
 0x54b   :  { %2626 = vrot.lane.b32.xlu0 %v7557_v53, %s6686_s0  ;;  %2630 = vrot.lane.b32.xlu1 %v7560_v61, %s6686_s0 }
 0x54d   :  { %v2574_v60 = vpop.permute.xlu1 %2573  ;;  %v2576_v62 = vpop.permute.xlu0 %2575 }
 0x54e   :  { %v7567_v6 = vsel %vm73_vm0, %v2574_v60, %v2576_v62  ;;  %v7572_v23 = vsel %vm73_vm0, 0, %v2574_v60 }
 0x54f   :  { %2640 = vrot.lane.b32.xlu1 %v7567_v6, %s6686_s0 }
 0x551   :  { %v2578_v9 = vpop.permute.xlu1 %2577  ;;  %v2568_v12 = vpop.permute.xlu0 %2567 }
 0x552   :  { %v7575_v34 = vsel %vm73_vm0, %v2576_v62, %v2578_v9  ;;  %v7582_v26 = vsel %vm73_vm0, %v2566_v50, %v2568_v12 }
 0x553   :  { %2642 = vrot.lane.b32.xlu0 %v7575_v34, %s6686_s0  ;;  %2638 = vrot.lane.b32.xlu1 %v7572_v23, %s6686_s0 }
 0x555   :  { %v2570_v44 = vpop.permute.xlu1 %2569  ;;  %v2580_v56 = vpop.permute.xlu0 %2579 }
 0x556   :  { %v7585_v46 = vsel %vm73_vm0, %v2568_v12, %v2570_v44  ;;  %v7592_v0 = vsel %vm73_vm0, %v2578_v9, %v2580_v56  ;;  %v6596_v12 = vld [vmem:[%s8446_s3] sm:$0xff]  }
 0x557   :  { %2634 = vrot.lane.b32.xlu1 %v7585_v46, %s6686_s0  ;;  %2632 = vrot.lane.b32.xlu0 %v7582_v26, %s6686_s0 }
 0x559   :  { %v2582_v57 = vpop.permute.xlu1 %2581  ;;  %v2572_v1 = vpop.permute.xlu0 %2571 }
 0x55a   :  { %v7595_v43 = vsel %vm73_vm0, %v2580_v56, %v2582_v57  ;;  %v2589_v31 = vsel %vm73_vm0, %v2570_v44, %v2572_v1 }
 0x55b   :  { %2646 = vrot.lane.b32.xlu1 %v7595_v43, %s6686_s0  ;;  %2644 = vrot.lane.b32.xlu0 %v7592_v0, %s6686_s0  ;;  %v7603_v63 = vsel %vm83_vm1, %v2589_v31, 0 }
 0x55d   :  { %v2584_v30 = vpop.permute.xlu1 %2583 }
 0x55e   :  { %v2594_v21 = vsel %vm73_vm0, %v2582_v57, %v2584_v30  ;;  %v6597_v30 = vld [vmem:[%s8446_s3 + $0x8] sm:$0xff]  }
 0x55f   :  { %v7607_v3 = vsel %vm83_vm1, %v2594_v21, 0  ;;  %2636 = vrot.lane.b32.xlu0 %v7603_v63, %s6686_s0  ;;  %vm5505_vm1 = vcmask 490496  }
 0x560   :  { %2648 = vrot.lane.b32.xlu1 %v7607_v3, %s6686_s0 }
 0x563   :  { %2849 = vrot.lane.b32.xlu0 %v7552_v49, %s6687_s10 }
 0x564   :  { %2851 = vrot.lane.b32.xlu1 %v7560_v61, %s6687_s10 }
 0x567   :  { %2847 = vrot.lane.b32.xlu0 %v7557_v53, %s6687_s10 }
 0x568   :  { %2861 = vrot.lane.b32.xlu1 %v7567_v6, %s6687_s10 }
 0x56b   :  { %2863 = vrot.lane.b32.xlu0 %v7575_v34, %s6687_s10 }
 0x56c   :  { %2859 = vrot.lane.b32.xlu1 %v7572_v23, %s6687_s10 }
 0x56f   :  { %2853 = vrot.lane.b32.xlu0 %v7582_v26, %s6687_s10 }
 0x570   :  { %2855 = vrot.lane.b32.xlu1 %v7585_v46, %s6687_s10 }
 0x573   :  { %2865 = vrot.lane.b32.xlu0 %v7592_v0, %s6687_s10 }
 0x574   :  { %2867 = vrot.lane.b32.xlu1 %v7595_v43, %s6687_s10 }
 0x577   :  { %2857 = vrot.lane.b32.xlu0 %v7603_v63, %s6687_s10 }
 0x578   :  { %2869 = vrot.lane.b32.xlu1 %v7607_v3, %s6687_s10  ;;  %s6702_s10 = smov [#allocation2]  }
 0x57b   :  { %3075 = vrot.lane.b32.xlu0 %v7552_v49, %s6688_s11 }
 0x57c   :  { %3077 = vrot.lane.b32.xlu1 %v7560_v61, %s6688_s11 }
 0x57f   :  { %3073 = vrot.lane.b32.xlu0 %v7557_v53, %s6688_s11 }
 0x580   :  { %3087 = vrot.lane.b32.xlu1 %v7567_v6, %s6688_s11 }
 0x583   :  { %3089 = vrot.lane.b32.xlu0 %v7575_v34, %s6688_s11 }
 0x584   :  { %3085 = vrot.lane.b32.xlu1 %v7572_v23, %s6688_s11 }
 0x587   :  { %3079 = vrot.lane.b32.xlu0 %v7582_v26, %s6688_s11 }
 0x588   :  { %3081 = vrot.lane.b32.xlu1 %v7585_v46, %s6688_s11 }
 0x58b   :  { %3091 = vrot.lane.b32.xlu0 %v7592_v0, %s6688_s11 }
 0x58c   :  { %3093 = vrot.lane.b32.xlu1 %v7595_v43, %s6688_s11 }
 0x58f   :  { %3083 = vrot.lane.b32.xlu0 %v7603_v63, %s6688_s11 }
 0x590   :  { %3095 = vrot.lane.b32.xlu1 %v7607_v3, %s6688_s11  ;;  %s5773_s11 = sshll.u32 %s6702_s10, 4  ;;  %s5774_s11 = int_to_ptr.vmem [resolvable:$true] %s5773_s11 }
 0x591   :  { %p6664_p1 = scmp.lt.s32.totalorder %s5774_s11, %s5774_s11 }
 0x593   :  { %3325 = vrot.lane.b32.xlu0 %v7552_v49, %s6689_s12 }
 0x594   :  { %3327 = vrot.lane.b32.xlu1 %v7560_v61, %s6689_s12 }
 0x597   :  { %3323 = vrot.lane.b32.xlu0 %v7557_v53, %s6689_s12 }
 0x598   :  { %3337 = vrot.lane.b32.xlu1 %v7567_v6, %s6689_s12 }
 0x59b   :  { %3339 = vrot.lane.b32.xlu0 %v7575_v34, %s6689_s12 }
 0x59c   :  { %3335 = vrot.lane.b32.xlu1 %v7572_v23, %s6689_s12 }
 0x59f   :  { %3329 = vrot.lane.b32.xlu0 %v7582_v26, %s6689_s12 }
 0x5a0   :  { %3331 = vrot.lane.b32.xlu1 %v7585_v46, %s6689_s12 }
 0x5a3   :  { %3341 = vrot.lane.b32.xlu0 %v7592_v0, %s6689_s12 }
 0x5a4   :  { %3343 = vrot.lane.b32.xlu1 %v7595_v43, %s6689_s12 }
 0x5a7   :  { %3333 = vrot.lane.b32.xlu0 %v7603_v63, %s6689_s12 }
 0x5a8   :  { %3345 = vrot.lane.b32.xlu1 %v7607_v3, %s6689_s12  ;;  %s6659_s12 = scalar_lea.vmem %s5774_s11, 32 }
 0x5a9   :  { %p6660_p0 = scmp.ne.s32.totalorder %s5774_s11, %s6659_s12  ;;  %p6665_p2 = scmp.lt.s32.totalorder %s6659_s12, %s6659_s12 }
 0x5ab   :  { %3575 = vrot.lane.b32.xlu0 %v7552_v49, %s6690_s13  ;;  %p6666_p3 = por %p6665_p2, %p6664_p1 }
 0x5ac   :  { %3577 = vrot.lane.b32.xlu1 %v7560_v61, %s6690_s13 }
 0x5ad   :  { %p6667_p4 = pnand %p6666_p3, %p6660_p0 }
 0x5af   :  { %3573 = vrot.lane.b32.xlu0 %v7557_v53, %s6690_s13 }
 0x5b0   :  { %3587 = vrot.lane.b32.xlu1 %v7567_v6, %s6690_s13 }
 0x5b3   :  { %3589 = vrot.lane.b32.xlu0 %v7575_v34, %s6690_s13 }
 0x5b4   :  { %3585 = vrot.lane.b32.xlu1 %v7572_v23, %s6690_s13 }
 0x5b7   :  { %3579 = vrot.lane.b32.xlu0 %v7582_v26, %s6690_s13 }
 0x5b8   :  { %3581 = vrot.lane.b32.xlu1 %v7585_v46, %s6690_s13 }
 0x5b9   :  { %v2629_v39 = vpop.permute.xlu0 %2628 }
 0x5bb   :  { %3591 = vrot.lane.b32.xlu0 %v7592_v0, %s6690_s13 }
 0x5bc   :  { %3593 = vrot.lane.b32.xlu1 %v7595_v43, %s6690_s13 }
 0x5bd   :  { %v2631_v2 = vpop.permute.xlu1 %2630  ;;  %v2627_v24 = vpop.permute.xlu0 %2626 }
 0x5be   :  { %v2650_v17 = vsel %vm119_vm2, %v2627_v24, %v2629_v39  ;;  %v2651_v13 = vsel %vm119_vm2, %v2629_v39, %v2631_v2 }
 0x5bf   :  { %3583 = vrot.lane.b32.xlu0 %v7603_v63, %s6690_s13  ;;  %2678 = vmatprep.subr.bf16.mxu1 %v2651_v13 }
 0x5c0   :  { %3595 = vrot.lane.b32.xlu1 %v7607_v3, %s6690_s13  ;;  %2679 = vmatpush1.bf16.msra.mxu1 %v2650_v17 }
 0x5c1   :  { %v2641_v7 = vpop.permute.xlu1 %2640 }
 0x5c3   :  { %3825 = vrot.lane.b32.xlu0 %v7552_v49, %s6691_s14 }
 0x5c4   :  { %3827 = vrot.lane.b32.xlu1 %v7560_v61, %s6691_s14 }
 0x5c5   :  { %v2639_v32 = vpop.permute.xlu1 %2638  ;;  %v2643_v36 = vpop.permute.xlu0 %2642 }
 0x5c6   :  { %v2655_v55 = vsel %vm119_vm2, %v2639_v32, %v2641_v7  ;;  %v2656_v51 = vsel %vm119_vm2, %v2641_v7, %v2643_v36 }
 0x5c7   :  { %3823 = vrot.lane.b32.xlu0 %v7557_v53, %s6691_s14  ;;  %2680 = vmatprep.subr.bf16.mxu1 %v2656_v51 }
 0x5c8   :  { %3837 = vrot.lane.b32.xlu1 %v7567_v6, %s6691_s14  ;;  %2681 = vmatpush1.bf16.msra.mxu1 %v2655_v55 }
 0x5c9   :  { %v2635_v45 = vpop.permute.xlu1 %2634  ;;  %v2633_v19 = vpop.permute.xlu0 %2632 }
 0x5ca   :  { %v2653_v33 = vsel %vm119_vm2, %v2633_v19, %v2635_v45  ;;  %v2652_v58 = vsel %vm119_vm2, %v2631_v2, %v2633_v19 }
 0x5cb   :  { %3839 = vrot.lane.b32.xlu0 %v7575_v34, %s6691_s14  ;;  %5919 = vmatmul.mubr.msk.bf16.vlgmr.msra.gmra.mrb[8].mxu1 %vm73_vm0, %v6594_v37 }
 0x5cc   :  { %2731 = vmatprep.subr.bf16.mxu1 %v2653_v33  ;;  %3835 = vrot.lane.b32.xlu1 %v7572_v23, %s6691_s14 }
 0x5cd   :  { %2732 = vmatpush1.bf16.msra.mxu1 %v2652_v58  ;;  %v2647_v59 = vpop.permute.xlu1 %2646  ;;  %v2645_v18 = vpop.permute.xlu0 %2644  ;;  %2720 = vmatprep.mubr.bf16.mxu1 %v6685_v14 }
 0x5ce   :  { %v2658_v11 = vsel %vm119_vm2, %v2645_v18, %v2647_v59  ;;  %v2657_v52 = vsel %vm119_vm2, %v2643_v36, %v2645_v18 }
 0x5cf   :  { %3829 = vrot.lane.b32.xlu0 %v7582_v26, %s6691_s14  ;;  %2733 = vmatprep.subr.bf16.mxu1 %v2658_v11 }
 0x5d0   :  { %3831 = vrot.lane.b32.xlu1 %v7585_v46, %s6691_s14 }
 0x5d1   :  { %2734 = vmatpush1.bf16.msra.mxu1 %v2657_v52  ;;  %v2637_v20 = vpop.permute.xlu0 %2636 }
 0x5d2   :  { %2784 = vmatprep.subr.bf16.mxu1 %v2637_v20  ;;  %v2649_v16 = vpop.permute.xlu1 %2648  ;;  %v2654_v15 = vsel %vm119_vm2, %v2635_v45, %v2637_v20 }
 0x5d3   :  { %3841 = vrot.lane.b32.xlu0 %v7592_v0, %s6691_s14  ;;  %5920 = vmatmul.mubr.msk.bf16.gmra.mrb[12].mxu1 %vm73_vm0, %v6595_v27  ;;  %v2659_v10 = vsel %vm119_vm2, %v2647_v59, %v2649_v16  ;;  %vm5597_vm2 = vcmask 1040384  }
 0x5d4   :  { %3843 = vrot.lane.b32.xlu1 %v7595_v43, %s6691_s14  ;;  %2763 = vmatprep.mubr.bf16.mxu1 %v6685_v14 }
 0x5d5   :  { %v2850_v54 = vpop.permute.xlu0 %2849 }
 0x5d6   :  { %v2852_v38 = vpop.permute.xlu1 %2851 }
 0x5d7   :  { %3833 = vrot.lane.b32.xlu0 %v7603_v63, %s6691_s14  ;;  %v2872_v22 = vsel %vm332_vm5, %v2850_v54, %v2852_v38 }
 0x5d8   :  { %3845 = vrot.lane.b32.xlu1 %v7607_v3, %s6691_s14 }
 0x5d9   :  { %v2848_v29 = vpop.permute.xlu0 %2847 }
 0x5da   :  { %v2862_v4 = vpop.permute.xlu1 %2861  ;;  %v2871_v5 = vsel %vm332_vm5, %v2848_v29, %v2850_v54 }
 0x5db   :  { %4075 = vrot.lane.b32.xlu0 %v7552_v49, %s6692_s15  ;;  %5921 = vmatmul.mubr.msk.bf16.vlgmr.msra.gmra.mrb[16].mxu1 %vm73_vm0, %v6594_v37 }
 0x5dc   :  { %2785 = vmatpush1.bf16.msra.mxu1 %v2654_v15  ;;  %4077 = vrot.lane.b32.xlu1 %v7560_v61, %s6692_s15 }
 0x5dd   :  { %2786 = vmatprep.subr.bf16.mxu1 %v2649_v16  ;;  %2773 = vmatprep.mubr.bf16.mxu1 %v6685_v14  ;;  %v2864_v40 = vpop.permute.xlu0 %2863 }
 0x5de   :  { %v2860_v47 = vpop.permute.xlu1 %2859  ;;  %v2877_v48 = vsel %vm332_vm5, %v2862_v4, %v2864_v40 }
 0x5df   :  { %4073 = vrot.lane.b32.xlu0 %v7557_v53, %s6692_s15  ;;  %v2876_v62 = vsel %vm332_vm5, %v2860_v47, %v2862_v4  ;;  %v6600_v4 = vld [vmem:[%s8446_s3 + $0x30] sm:$0xff]  }
 0x5e0   :  { %2787 = vmatpush1.bf16.msra.mxu1 %v2659_v10  ;;  %4087 = vrot.lane.b32.xlu1 %v7567_v6, %s6692_s15 }
 0x5e1   :  { %2899 = vmatprep.subr.bf16.mxu1 %v2872_v22  ;;  %v2854_v50 = vpop.permute.xlu0 %2853 }
 0x5e2   :  { %v2856_v60 = vpop.permute.xlu1 %2855  ;;  %v2873_v57 = vsel %vm332_vm5, %v2852_v38, %v2854_v50 }
 0x5e3   :  { %4089 = vrot.lane.b32.xlu0 %v7575_v34, %s6692_s15  ;;  %5922 = vmatmul.mubr.msk.bf16.gmra.mrb[20].mxu1 %vm73_vm0, %v6595_v27  ;;  %v2874_v9 = vsel %vm332_vm5, %v2854_v50, %v2856_v60 }
 0x5e4   :  { %4085 = vrot.lane.b32.xlu1 %v7572_v23, %s6692_s15  ;;  %2816 = vmatprep.mubr.bf16.mxu1 %v6685_v14 }
 0x5e5   :  { %v2866_v44 = vpop.permute.xlu0 %2865 }
 0x5e6   :  { %v2868_v56 = vpop.permute.xlu1 %2867  ;;  %v2878_v31 = vsel %vm332_vm5, %v2864_v40, %v2866_v44 }
 0x5e7   :  { %4079 = vrot.lane.b32.xlu0 %v7582_v26, %s6692_s15  ;;  %v2879_v1 = vsel %vm332_vm5, %v2866_v44, %v2868_v56 }
 0x5e8   :  { %4081 = vrot.lane.b32.xlu1 %v7585_v46, %s6692_s15 }
 0x5e9   :  { %v2858_v21 = vpop.permute.xlu0 %2857 }
 0x5ea   :  { %v2870_v39 = vpop.permute.xlu1 %2869  ;;  %v2875_v17 = vsel %vm332_vm5, %v2856_v60, %v2858_v21  ;;  %v6601_v60 = vld [vmem:[%s8446_s3 + $0x38] sm:$0xff]  }
 0x5eb   :  { %4091 = vrot.lane.b32.xlu0 %v7592_v0, %s6692_s15  ;;  %5923 = vmatmul.mubr.msk.bf16.vlgmr.msra.gmra.mrb[24].mxu1 %vm73_vm0, %v6594_v37  ;;  %v2880_v13 = vsel %vm332_vm5, %v2868_v56, %v2870_v39  ;;  %v6599_v37 = vld [vmem:[%s8446_s3 + $0x28] sm:$0xff]  }
 0x5ec   :  { %2900 = vmatpush1.bf16.msra.mxu1 %v2871_v5  ;;  %4093 = vrot.lane.b32.xlu1 %v7595_v43, %s6692_s15 }
 0x5ed   :  { %2901 = vmatprep.subr.bf16.mxu1 %v2877_v48  ;;  %2826 = vmatprep.mubr.bf16.mxu1 %v6685_v14  ;;  %v3076_v2 = vpop.permute.xlu0 %3075 }
 0x5ee   :  { %v3078_v24 = vpop.permute.xlu1 %3077 }
 0x5ef   :  { %4083 = vrot.lane.b32.xlu0 %v7603_v63, %s6692_s15 }
 0x5f0   :  { %2902 = vmatpush1.bf16.msra.mxu1 %v2876_v62  ;;  %4095 = vrot.lane.b32.xlu1 %v7607_v3, %s6692_s15 }
 0x5f1   :  { %2952 = vmatprep.subr.bf16.mxu1 %v2874_v9  ;;  %v3074_v7 = vpop.permute.xlu0 %3073 }
 0x5f2   :  { %v3088_v32 = vpop.permute.xlu1 %3087 }
 0x5f3   :  { %4325 = vrot.lane.b32.xlu0 %v7552_v49, %s6693_s16  ;;  %5924 = vmatmul.mubr.msk.bf16.gmra.mrb[28].mxu1 %vm73_vm0, %v6595_v27 }
 0x5f4   :  { %4327 = vrot.lane.b32.xlu1 %v7560_v61, %s6693_s16  ;;  %2931 = vmatprep.mubr.bf16.mxu1 %v6685_v14 }
 0x5f7   :  { %4323 = vrot.lane.b32.xlu0 %v7557_v53, %s6693_s16 }
 0x5f8   :  { %4337 = vrot.lane.b32.xlu1 %v7567_v6, %s6693_s16 }
 0x5fb   :  { %4339 = vrot.lane.b32.xlu0 %v7575_v34, %s6693_s16  ;;  %5927 = vmatmul.mubr.msk.bf16.vlgmr.msra.gmra.mrb[8].mxu1 %vm73_vm0, %v6596_v12 }
 0x5fc   :  { %2953 = vmatpush1.bf16.msra.mxu1 %v2873_v57  ;;  %4335 = vrot.lane.b32.xlu1 %v7572_v23, %s6693_s16 }
 0x5fd   :  { %2954 = vmatprep.subr.bf16.mxu1 %v2879_v1  ;;  %2941 = vmatprep.mubr.bf16.mxu1 %v6685_v14 }
 0x5ff   :  { %4329 = vrot.lane.b32.xlu0 %v7582_v26, %s6693_s16 }
 0x600   :  { %2955 = vmatpush1.bf16.msra.mxu1 %v2878_v31  ;;  %4331 = vrot.lane.b32.xlu1 %v7585_v46, %s6693_s16 }
 0x601   :  { %3005 = vmatprep.subr.bf16.mxu1 %v2858_v21 }
 0x603   :  { %4341 = vrot.lane.b32.xlu0 %v7592_v0, %s6693_s16  ;;  %5928 = vmatmul.mubr.msk.bf16.gmra.mrb[12].mxu1 %vm73_vm0, %v6597_v30 }
 0x604   :  { %4343 = vrot.lane.b32.xlu1 %v7595_v43, %s6693_s16  ;;  %2984 = vmatprep.mubr.bf16.mxu1 %v6685_v14 }
 0x607   :  { %4333 = vrot.lane.b32.xlu0 %v7603_v63, %s6693_s16 }
 0x608   :  { %4345 = vrot.lane.b32.xlu1 %v7607_v3, %s6693_s16  ;;  %s6701_s16 = smov 60  }
 0x60b   :  { %4575 = vrot.lane.b32.xlu0 %v7552_v49, %s6694_s17  ;;  %5929 = vmatmul.mubr.msk.bf16.vlgmr.msra.gmra.mrb[16].mxu1 %vm73_vm0, %v6596_v12  ;;  %v3098_v49 = vsel %vm548_vm7, %v3076_v2, %v3078_v24 }
 0x60c   :  { %3006 = vmatpush1.bf16.msra.mxu1 %v2875_v17  ;;  %4577 = vrot.lane.b32.xlu1 %v7560_v61, %s6694_s17  ;;  %v3086_v61 = vpop.permute.xlu1 %3085 }
 0x60d   :  { %3007 = vmatprep.subr.bf16.mxu1 %v2870_v39  ;;  %2994 = vmatprep.mubr.bf16.mxu1 %v6685_v14 }
 0x60f   :  { %4573 = vrot.lane.b32.xlu0 %v7557_v53, %s6694_s17  ;;  %v3090_v53 = vpop.permute.xlu0 %3089 }
 0x610   :  { %3008 = vmatpush1.bf16.msra.mxu1 %v2880_v13  ;;  %4587 = vrot.lane.b32.xlu1 %v7567_v6, %s6694_s17  ;;  %v3097_v6 = vsel %vm548_vm7, %v3074_v7, %v3076_v2  ;;  %v3082_v36 = vpop.permute.xlu1 %3081 }
 0x611   :  { %3125 = vmatprep.subr.bf16.mxu1 %v3098_v49 }
 0x613   :  { %4589 = vrot.lane.b32.xlu0 %v7575_v34, %s6694_s17  ;;  %5930 = vmatmul.mubr.msk.bf16.gmra.mrb[20].mxu1 %vm73_vm0, %v6597_v30  ;;  %v3080_v34 = vpop.permute.xlu0 %3079 }
 0x614   :  { %4585 = vrot.lane.b32.xlu1 %v7572_v23, %s6694_s17  ;;  %3037 = vmatprep.mubr.bf16.mxu1 %v6685_v14  ;;  %v3103_v23 = vsel %vm548_vm7, %v3088_v32, %v3090_v53  ;;  %v3094_v55 = vpop.permute.xlu1 %3093 }
 0x617   :  { %4579 = vrot.lane.b32.xlu0 %v7582_v26, %s6694_s17  ;;  %v3102_v26 = vsel %vm548_vm7, %v3086_v61, %v3088_v32  ;;  %v6602_v32 = vld [vmem:[%s8446_s3 + $0x40] sm:$0xff]  }
 0x618   :  { %4581 = vrot.lane.b32.xlu1 %v7585_v46, %s6694_s17  ;;  %v3100_v46 = vsel %vm548_vm7, %v3080_v34, %v3082_v36  ;;  %v3096_v19 = vpop.permute.xlu1 %3095 }
 0x619   :  { %v3106_v18 = vsel %vm548_vm7, %v3094_v55, %v3096_v19 }
 0x61b   :  { %4591 = vrot.lane.b32.xlu0 %v7592_v0, %s6694_s17  ;;  %5931 = vmatmul.mubr.msk.bf16.vlgmr.msra.gmra.mrb[24].mxu1 %vm73_vm0, %v6596_v12  ;;  %v6598_v0 = vld [vmem:[%s8446_s3 + $0x20] sm:$0xff]  }
 0x61c   :  { %3126 = vmatpush1.bf16.msra.mxu1 %v3097_v6  ;;  %4593 = vrot.lane.b32.xlu1 %v7595_v43, %s6694_s17  ;;  %v3092_v43 = vpop.permute.xlu0 %3091  ;;  %v3328_v59 = vpop.permute.xlu1 %3327 }
 0x61d   :  { %3127 = vmatprep.subr.bf16.mxu1 %v3103_v23  ;;  %3047 = vmatprep.mubr.bf16.mxu1 %v6685_v14  ;;  %v3104_v51 = vsel %vm548_vm7, %v3090_v53, %v3092_v43 }
 0x61f   :  { %4583 = vrot.lane.b32.xlu0 %v7603_v63, %s6694_s17  ;;  %v3099_v63 = vsel %vm548_vm7, %v3078_v24, %v3080_v34 }
 0x620   :  { %3128 = vmatpush1.bf16.msra.mxu1 %v3102_v26  ;;  %4595 = vrot.lane.b32.xlu1 %v7607_v3, %s6694_s17  ;;  %v3105_v3 = vsel %vm548_vm7, %v3092_v43, %v3094_v55  ;;  %v3084_v45 = vpop.permute.xlu0 %3083  ;;  %v3338_v27 = vpop.permute.xlu1 %3337 }
 0x621   :  { %3178 = vmatprep.subr.bf16.mxu1 %v3100_v46  ;;  %v3101_v33 = vsel %vm548_vm7, %v3082_v36, %v3084_v45  ;;  %v6603_v36 = vld [vmem:[%s8446_s3 + $0x48] sm:$0xff]  }
 0x623   :  { %5932 = vmatmul.mubr.msk.bf16.gmra.mrb[28].mxu1 %vm73_vm0, %v6597_v30 }
 0x624   :  { %3157 = vmatprep.mubr.bf16.mxu1 %v6685_v14  ;;  %v3326_v58 = vpop.permute.xlu0 %3325  ;;  %v3336_v16 = vpop.permute.xlu1 %3335 }
 0x625   :  { %v3348_v11 = vsel %vm788_vm12, %v3326_v58, %v3328_v59  ;;  %v3352_v22 = vsel %vm788_vm12, %v3336_v16, %v3338_v27 }
 0x628   :  { %v3324_v52 = vpop.permute.xlu0 %3323  ;;  %v3332_v10 = vpop.permute.xlu1 %3331 }
 0x629   :  { %v3347_v54 = vsel %vm788_vm12, %v3324_v52, %v3326_v58 }
 0x62b   :  { %5939 = vmatmul.mubr.msk.bf16.vlgmr.msra.gmra.mrb[8].mxu1 %vm73_vm0, %v6598_v0 }
 0x62c   :  { %3179 = vmatpush1.bf16.msra.mxu1 %v3099_v63  ;;  %3167 = vmatprep.mubr.bf16.mxu1 %v6685_v14  ;;  %v3340_v20 = vpop.permute.xlu0 %3339  ;;  %v3344_v47 = vpop.permute.xlu1 %3343 }
 0x62d   :  { %3180 = vmatprep.subr.bf16.mxu1 %v3105_v3  ;;  %v3353_v38 = vsel %vm788_vm12, %v3338_v27, %v3340_v20  ;;  %v6604_v27 = vld [vmem:[%s8446_s3 + $0x50] sm:$0xff]  }
 0x630   :  { %3181 = vmatpush1.bf16.msra.mxu1 %v3104_v51  ;;  %v3330_v15 = vpop.permute.xlu0 %3329  ;;  %v3346_v9 = vpop.permute.xlu1 %3345 }
 0x631   :  { %3231 = vmatprep.subr.bf16.mxu1 %v3084_v45  ;;  %v3350_v29 = vsel %vm788_vm12, %v3330_v15, %v3332_v10  ;;  %v3349_v5 = vsel %vm788_vm12, %v3328_v59, %v3330_v15  ;;  %v3356_v57 = vsel %vm788_vm12, %v3344_v47, %v3346_v9 }
 0x633   :  { %5940 = vmatmul.mubr.msk.bf16.gmra.mrb[12].mxu1 %vm73_vm0, %v6599_v37 }
 0x634   :  { %3210 = vmatprep.mubr.bf16.mxu1 %v6685_v14  ;;  %v3342_v40 = vpop.permute.xlu0 %3341  ;;  %v3578_v56 = vpop.permute.xlu1 %3577 }
 0x635   :  { %v3355_v48 = vsel %vm788_vm12, %v3342_v40, %v3344_v47  ;;  %v3354_v50 = vsel %vm788_vm12, %v3340_v20, %v3342_v40 }
 0x638   :  { %v3334_v62 = vpop.permute.xlu0 %3333  ;;  %v3588_v30 = vpop.permute.xlu1 %3587 }
 0x639   :  { %v3351_v12 = vsel %vm788_vm12, %v3332_v10, %v3334_v62  ;;  %v6605_v10 = vld [vmem:[%s8446_s3 + $0x58] sm:$0xff]  }
 0x63b   :  { %5941 = vmatmul.mubr.msk.bf16.vlgmr.msra.gmra.mrb[16].mxu1 %vm73_vm0, %v6598_v0 }
 0x63c   :  { %3232 = vmatpush1.bf16.msra.mxu1 %v3101_v33  ;;  %3220 = vmatprep.mubr.bf16.mxu1 %v6685_v14  ;;  %v3576_v44 = vpop.permute.xlu0 %3575  ;;  %v3586_v39 = vpop.permute.xlu1 %3585 }
 0x63d   :  { %3233 = vmatprep.subr.bf16.mxu1 %v3096_v19  ;;  %v3598_v1 = vsel %vm1028_vm6, %v3576_v44, %v3578_v56  ;;  %v3602_v49 = vsel %vm1028_vm6, %v3586_v39, %v3588_v30 }
 0x640   :  { %3234 = vmatpush1.bf16.msra.mxu1 %v3106_v18  ;;  %v3574_v31 = vpop.permute.xlu0 %3573  ;;  %v3582_v13 = vpop.permute.xlu1 %3581 }
 0x641   :  { %3375 = vmatprep.subr.bf16.mxu1 %v3348_v11  ;;  %v3597_v2 = vsel %vm1028_vm6, %v3574_v31, %v3576_v44 }
 0x643   :  { %5942 = vmatmul.mubr.msk.bf16.gmra.mrb[20].mxu1 %vm73_vm0, %v6599_v37 }
 0x644   :  { %3263 = vmatprep.mubr.bf16.mxu1 %v6685_v14  ;;  %v3590_v21 = vpop.permute.xlu0 %3589  ;;  %v3594_v61 = vpop.permute.xlu1 %3593 }
 0x645   :  { %v3603_v24 = vsel %vm1028_vm6, %v3588_v30, %v3590_v21  ;;  %v6606_v30 = vld [vmem:[%s8446_s3 + $0x60] sm:$0xff]  }
 0x648   :  { %v3580_v17 = vpop.permute.xlu0 %3579  ;;  %v3596_v46 = vpop.permute.xlu1 %3595 }
 0x649   :  { %v3600_v7 = vsel %vm1028_vm6, %v3580_v17, %v3582_v13  ;;  %v3599_v6 = vsel %vm1028_vm6, %v3578_v56, %v3580_v17  ;;  %v3606_v63 = vsel %vm1028_vm6, %v3594_v61, %v3596_v46 }
 0x64b   :  { %5943 = vmatmul.mubr.msk.bf16.vlgmr.msra.gmra.mrb[24].mxu1 %vm73_vm0, %v6598_v0 }
 0x64c   :  { %3376 = vmatpush1.bf16.msra.mxu1 %v3347_v54  ;;  %3273 = vmatprep.mubr.bf16.mxu1 %v6685_v14  ;;  %v3592_v53 = vpop.permute.xlu0 %3591  ;;  %v3828_v55 = vpop.permute.xlu1 %3827 }
 0x64d   :  { %3377 = vmatprep.subr.bf16.mxu1 %v3353_v38  ;;  %v3605_v23 = vsel %vm1028_vm6, %v3592_v53, %v3594_v61  ;;  %v3604_v34 = vsel %vm1028_vm6, %v3590_v21, %v3592_v53 }
 0x650   :  { %3378 = vmatpush1.bf16.msra.mxu1 %v3352_v22  ;;  %v3584_v26 = vpop.permute.xlu0 %3583 }
 0x651   :  { %3428 = vmatprep.subr.bf16.mxu1 %v3350_v29  ;;  %v3601_v0 = vsel %vm1028_vm6, %v3582_v13, %v3584_v26  ;;  %v6607_v13 = vld [vmem:[%s8446_s3 + $0x68] sm:$0xff]  }
 0x653   :  { %5944 = vmatmul.mubr.msk.bf16.gmra.mrb[28].mxu1 %vm73_vm0, %v6599_v37  ;;  %v3838_v37 = vpop.permute.xlu1 %3837 }
 0x654   :  { %3407 = vmatprep.mubr.bf16.mxu1 %v6685_v14  ;;  %v3826_v43 = vpop.permute.xlu0 %3825 }
 0x655   :  { %v3848_v3 = vsel %vm1268_vm8, %v3826_v43, %v3828_v55 }
 0x657   :  { %v3836_v19 = vpop.permute.xlu1 %3835 }
 0x658   :  { %v3824_v51 = vpop.permute.xlu0 %3823  ;;  %v3852_v11 = vsel %vm1268_vm8, %v3836_v19, %v3838_v37 }
 0x659   :  { %v3847_v33 = vsel %vm1268_vm8, %v3824_v51, %v3826_v43 }
 0x65b   :  { %5951 = vmatmul.mubr.msk.bf16.vlgmr.msra.gmra.mrb[8].mxu1 %vm73_vm0, %v6600_v4  ;;  %v3832_v18 = vpop.permute.xlu1 %3831 }
 0x65c   :  { %3429 = vmatpush1.bf16.msra.mxu1 %v3349_v5  ;;  %3417 = vmatprep.mubr.bf16.mxu1 %v6685_v14  ;;  %v3840_v45 = vpop.permute.xlu0 %3839 }
 0x65d   :  { %3430 = vmatprep.subr.bf16.mxu1 %v3355_v48  ;;  %v3853_v58 = vsel %vm1268_vm8, %v3838_v37, %v3840_v45  ;;  %v6608_v37 = vld [vmem:[%s8446_s3 + $0x70] sm:$0xff]  }
 0x65f   :  { %v3844_v16 = vpop.permute.xlu1 %3843 }
 0x660   :  { %3431 = vmatpush1.bf16.msra.mxu1 %v3354_v50  ;;  %v3830_v59 = vpop.permute.xlu0 %3829 }
 0x661   :  { %3481 = vmatprep.subr.bf16.mxu1 %v3334_v62  ;;  %v3850_v52 = vsel %vm1268_vm8, %v3830_v59, %v3832_v18  ;;  %v3849_v54 = vsel %vm1268_vm8, %v3828_v55, %v3830_v59 }
 0x663   :  { %5952 = vmatmul.mubr.msk.bf16.gmra.mrb[12].mxu1 %vm73_vm0, %v6601_v60  ;;  %v3846_v29 = vpop.permute.xlu1 %3845 }
 0x664   :  { %3460 = vmatprep.mubr.bf16.mxu1 %v6685_v14  ;;  %v3842_v20 = vpop.permute.xlu0 %3841  ;;  %v3856_v5 = vsel %vm1268_vm8, %v3844_v16, %v3846_v29 }
 0x665   :  { %v3855_v38 = vsel %vm1268_vm8, %v3842_v20, %v3844_v16  ;;  %v3854_v15 = vsel %vm1268_vm8, %v3840_v45, %v3842_v20 }
 0x667   :  { %v4078_v47 = vpop.permute.xlu1 %4077 }
 0x668   :  { %v3834_v22 = vpop.permute.xlu0 %3833 }
 0x66b   :  { %5953 = vmatmul.mubr.msk.bf16.vlgmr.msra.gmra.mrb[16].mxu1 %vm73_vm0, %v6600_v4 }
 0x66c   :  { %3482 = vmatpush1.bf16.msra.mxu1 %v3351_v12  ;;  %3470 = vmatprep.mubr.bf16.mxu1 %v6685_v14  ;;  %v4076_v40 = vpop.permute.xlu0 %4075 }
 0x66d   :  { %3483 = vmatprep.subr.bf16.mxu1 %v3346_v9  ;;  %v4098_v48 = vsel %vm1508_vm9, %v4076_v40, %v4078_v47 }
 0x670   :  { %3484 = vmatpush1.bf16.msra.mxu1 %v3356_v57  ;;  %v4074_v50 = vpop.permute.xlu0 %4073 }
 0x671   :  { %3625 = vmatprep.subr.bf16.mxu1 %v3598_v1  ;;  %v4097_v12 = vsel %vm1508_vm9, %v4074_v50, %v4076_v40 }
 0x673   :  { %5954 = vmatmul.mubr.msk.bf16.gmra.mrb[20].mxu1 %vm73_vm0, %v6601_v60 }
 0x674   :  { %3513 = vmatprep.mubr.bf16.mxu1 %v6685_v14  ;;  %v4090_v62 = vpop.permute.xlu0 %4089 }
 0x678   :  { %v4080_v56 = vpop.permute.xlu0 %4079 }
 0x67b   :  { %5955 = vmatmul.mubr.msk.bf16.vlgmr.msra.gmra.mrb[24].mxu1 %vm73_vm0, %v6600_v4  ;;  %v3851_v4 = vsel %vm1268_vm8, %v3832_v18, %v3834_v22  ;;  %v6609_v18 = vld [vmem:[%s8446_s3 + $0x78] sm:$0xff]  }
 0x67c   :  { %3626 = vmatpush1.bf16.msra.mxu1 %v3597_v2  ;;  %3523 = vmatprep.mubr.bf16.mxu1 %v6685_v14  ;;  %v4092_v21 = vpop.permute.xlu0 %4091  ;;  %v4099_v2 = vsel %vm1508_vm9, %v4078_v47, %v4080_v56 }
 0x67d   :  { %3627 = vmatprep.subr.bf16.mxu1 %v3603_v24  ;;  %v4104_v17 = vsel %vm1508_vm9, %v4090_v62, %v4092_v21 }
 0x680   :  { %3628 = vmatpush1.bf16.msra.mxu1 %v3602_v49  ;;  %v4084_v49 = vpop.permute.xlu0 %4083 }
 0x681   :  { %3678 = vmatprep.subr.bf16.mxu1 %v3600_v7 }
 0x683   :  { %5956 = vmatmul.mubr.msk.bf16.gmra.mrb[28].mxu1 %vm73_vm0, %v6601_v60  ;;  %v4088_v60 = vpop.permute.xlu1 %4087 }
 0x684   :  { %3657 = vmatprep.mubr.bf16.mxu1 %v6685_v14  ;;  %v4103_v44 = vsel %vm1508_vm9, %v4088_v60, %v4090_v62  ;;  %v4326_v53 = vpop.permute.xlu0 %4325 }
 0x687   :  { %v4086_v9 = vpop.permute.xlu1 %4085 }
 0x688   :  { %v4102_v1 = vsel %vm1508_vm9, %v4086_v9, %v4088_v60  ;;  %v6610_v60 = vld [vmem:[%s8446_s3 + $0x80] sm:$0xff]  }
 0x68b   :  { %5963 = vmatmul.mubr.msk.bf16.vlgmr.msra.gmra.mrb[8].mxu1 %vm73_vm0, %v6602_v32  ;;  %v4082_v57 = vpop.permute.xlu1 %4081 }
 0x68c   :  { %3679 = vmatpush1.bf16.msra.mxu1 %v3599_v6  ;;  %3667 = vmatprep.mubr.bf16.mxu1 %v6685_v14  ;;  %v4100_v31 = vsel %vm1508_vm9, %v4080_v56, %v4082_v57 }
 0x68d   :  { %3680 = vmatprep.subr.bf16.mxu1 %v3605_v23 }
 0x68f   :  { %v4094_v39 = vpop.permute.xlu1 %4093 }
 0x690   :  { %3681 = vmatpush1.bf16.msra.mxu1 %v3604_v34  ;;  %v4105_v24 = vsel %vm1508_vm9, %v4092_v21, %v4094_v39  ;;  %v4324_v34 = vpop.permute.xlu0 %4323 }
 0x691   :  { %3731 = vmatprep.subr.bf16.mxu1 %v3584_v26 }
 0x693   :  { %5964 = vmatmul.mubr.msk.bf16.gmra.mrb[12].mxu1 %vm73_vm0, %v6603_v36  ;;  %v4096_v7 = vpop.permute.xlu1 %4095 }
 0x694   :  { %3710 = vmatprep.mubr.bf16.mxu1 %v6685_v14  ;;  %v4106_v6 = vsel %vm1508_vm9, %v4094_v39, %v4096_v7  ;;  %v4340_v26 = vpop.permute.xlu0 %4339 }
 0x697   :  { %v4328_v61 = vpop.permute.xlu1 %4327 }
 0x698   :  { %v4348_v23 = vsel %vm1748_vm10, %v4326_v53, %v4328_v61  ;;  %v4330_v55 = vpop.permute.xlu0 %4329 }
 0x69b   :  { %5965 = vmatmul.mubr.msk.bf16.vlgmr.msra.gmra.mrb[16].mxu1 %vm73_vm0, %v6602_v32 }
 0x69c   :  { %3732 = vmatpush1.bf16.msra.mxu1 %v3601_v0  ;;  %3720 = vmatprep.mubr.bf16.mxu1 %v6685_v14  ;;  %v4347_v0 = vsel %vm1748_vm10, %v4324_v34, %v4326_v53  ;;  %v4342_v45 = vpop.permute.xlu0 %4341 }
 0x69d   :  { %3733 = vmatprep.subr.bf16.mxu1 %v3596_v46  ;;  %v4354_v59 = vsel %vm1748_vm10, %v4340_v26, %v4342_v45 }
 0x6a0   :  { %3734 = vmatpush1.bf16.msra.mxu1 %v3606_v63 }
 0x6a1   :  { %3875 = vmatprep.subr.bf16.mxu1 %v3848_v3 }
 0x6a3   :  { %5966 = vmatmul.mubr.msk.bf16.gmra.mrb[20].mxu1 %vm73_vm0, %v6603_v36 }
 0x6a4   :  { %3763 = vmatprep.mubr.bf16.mxu1 %v6685_v14 }
 0x6ab   :  { %5967 = vmatmul.mubr.msk.bf16.vlgmr.msra.gmra.mrb[24].mxu1 %vm73_vm0, %v6602_v32  ;;  %v4101_v32 = vsel %vm1508_vm9, %v4082_v57, %v4084_v49  ;;  %v6611_v57 = vld [vmem:[%s8446_s3 + $0x88] sm:$0xff]  }
 0x6ac   :  { %3876 = vmatpush1.bf16.msra.mxu1 %v3847_v33  ;;  %3773 = vmatprep.mubr.bf16.mxu1 %v6685_v14  ;;  %v4349_v33 = vsel %vm1748_vm10, %v4328_v61, %v4330_v55 }
 0x6ad   :  { %3877 = vmatprep.subr.bf16.mxu1 %v3853_v58 }
 0x6b0   :  { %3878 = vmatpush1.bf16.msra.mxu1 %v3852_v11  ;;  %v4334_v11 = vpop.permute.xlu0 %4333 }
 0x6b1   :  { %3928 = vmatprep.subr.bf16.mxu1 %v3850_v52 }
 0x6b3   :  { %5968 = vmatmul.mubr.msk.bf16.gmra.mrb[28].mxu1 %vm73_vm0, %v6603_v36  ;;  %v4338_v36 = vpop.permute.xlu1 %4337 }
 0x6b4   :  { %3907 = vmatprep.mubr.bf16.mxu1 %v6685_v14  ;;  %v4353_v43 = vsel %vm1748_vm10, %v4338_v36, %v4340_v26  ;;  %v4576_v20 = vpop.permute.xlu0 %4575 }
 0x6b7   :  { %v4336_v46 = vpop.permute.xlu1 %4335 }
 0x6b8   :  { %v4352_v3 = vsel %vm1748_vm10, %v4336_v46, %v4338_v36 }
 0x6bb   :  { %5975 = vmatmul.mubr.msk.bf16.vlgmr.msra.gmra.mrb[8].mxu1 %vm73_vm0, %v6604_v27  ;;  %v4332_v63 = vpop.permute.xlu1 %4331 }
 0x6bc   :  { %3929 = vmatpush1.bf16.msra.mxu1 %v3849_v54  ;;  %3917 = vmatprep.mubr.bf16.mxu1 %v6685_v14  ;;  %v4350_v51 = vsel %vm1748_vm10, %v4330_v55, %v4332_v63 }
 0x6bd   :  { %3930 = vmatprep.subr.bf16.mxu1 %v3855_v38 }
 0x6bf   :  { %v4344_v19 = vpop.permute.xlu1 %4343 }
 0x6c0   :  { %3931 = vmatpush1.bf16.msra.mxu1 %v3854_v15  ;;  %v4355_v58 = vsel %vm1748_vm10, %v4342_v45, %v4344_v19  ;;  %v4574_v15 = vpop.permute.xlu0 %4573 }
 0x6c1   :  { %3981 = vmatprep.subr.bf16.mxu1 %v3834_v22 }
 0x6c3   :  { %5976 = vmatmul.mubr.msk.bf16.gmra.mrb[12].mxu1 %vm73_vm0, %v6605_v10  ;;  %v4346_v52 = vpop.permute.xlu1 %4345 }
 0x6c4   :  { %3960 = vmatprep.mubr.bf16.mxu1 %v6685_v14  ;;  %v4356_v54 = vsel %vm1748_vm10, %v4344_v19, %v4346_v52  ;;  %v4590_v22 = vpop.permute.xlu0 %4589 }
 0x6c7   :  { %v4578_v16 = vpop.permute.xlu1 %4577 }
 0x6c8   :  { %v4598_v38 = vsel %vm1988_vm11, %v4576_v20, %v4578_v16  ;;  %v4580_v47 = vpop.permute.xlu0 %4579 }
 0x6cb   :  { %5977 = vmatmul.mubr.msk.bf16.vlgmr.msra.gmra.mrb[16].mxu1 %vm73_vm0, %v6604_v27 }
 0x6cc   :  { %3982 = vmatpush1.bf16.msra.mxu1 %v3851_v4  ;;  %3970 = vmatprep.mubr.bf16.mxu1 %v6685_v14  ;;  %v4597_v4 = vsel %vm1988_vm11, %v4574_v15, %v4576_v20  ;;  %v4592_v62 = vpop.permute.xlu0 %4591 }
 0x6cd   :  { %3983 = vmatprep.subr.bf16.mxu1 %v3846_v29  ;;  %v4604_v56 = vsel %vm1988_vm11, %v4590_v22, %v4592_v62 }
 0x6d0   :  { %3984 = vmatpush1.bf16.msra.mxu1 %v3856_v5 }
 0x6d1   :  { %4125 = vmatprep.subr.bf16.mxu1 %v4098_v48 }
 0x6d3   :  { %5978 = vmatmul.mubr.msk.bf16.gmra.mrb[20].mxu1 %vm73_vm0, %v6605_v10 }
 0x6d4   :  { %4013 = vmatprep.mubr.bf16.mxu1 %v6685_v14 }
 0x6db   :  { %5979 = vmatmul.mubr.msk.bf16.vlgmr.msra.gmra.mrb[24].mxu1 %vm73_vm0, %v6604_v27  ;;  %v4351_v27 = vsel %vm1748_vm10, %v4332_v63, %v4334_v11 }
 0x6dc   :  { %4126 = vmatpush1.bf16.msra.mxu1 %v4097_v12  ;;  %4023 = vmatprep.mubr.bf16.mxu1 %v6685_v14  ;;  %v4599_v12 = vsel %vm1988_vm11, %v4578_v16, %v4580_v47 }
 0x6dd   :  { %4127 = vmatprep.subr.bf16.mxu1 %v4103_v44 }
 0x6e0   :  { %4128 = vmatpush1.bf16.msra.mxu1 %v4102_v1  ;;  %v4584_v1 = vpop.permute.xlu0 %4583 }
 0x6e1   :  { %4178 = vmatprep.subr.bf16.mxu1 %v4100_v31 }
 0x6e3   :  { %5980 = vmatmul.mubr.msk.bf16.gmra.mrb[28].mxu1 %vm73_vm0, %v6605_v10  ;;  %v4588_v10 = vpop.permute.xlu1 %4587 }
 0x6e4   :  { %4157 = vmatprep.mubr.bf16.mxu1 %v6685_v14  ;;  %v4603_v40 = vsel %vm1988_vm11, %v4588_v10, %v4590_v22 }
 0x6e7   :  { %v4586_v29 = vpop.permute.xlu1 %4585 }
 0x6e8   :  { %v4602_v48 = vsel %vm1988_vm11, %v4586_v29, %v4588_v10 }
 0x6eb   :  { %5987 = vmatmul.mubr.msk.bf16.vlgmr.msra.gmra.mrb[8].mxu1 %vm73_vm0, %v6606_v30  ;;  %v4582_v5 = vpop.permute.xlu1 %4581 }
 0x6ec   :  { %4179 = vmatpush1.bf16.msra.mxu1 %v4099_v2  ;;  %4167 = vmatprep.mubr.bf16.mxu1 %v6685_v14  ;;  %v4600_v50 = vsel %vm1988_vm11, %v4580_v47, %v4582_v5  ;;  %v4601_v31 = vsel %vm1988_vm11, %v4582_v5, %v4584_v1 }
 0x6ed   :  { %4180 = vmatprep.subr.bf16.mxu1 %v4105_v24 }
 0x6ef   :  { %v4594_v9 = vpop.permute.xlu1 %4593 }
 0x6f0   :  { %4181 = vmatpush1.bf16.msra.mxu1 %v4104_v17  ;;  %v4605_v44 = vsel %vm1988_vm11, %v4592_v62, %v4594_v9 }
 0x6f1   :  { %4231 = vmatprep.subr.bf16.mxu1 %v4084_v49 }
 0x6f3   :  { %5988 = vmatmul.mubr.msk.bf16.gmra.mrb[12].mxu1 %vm73_vm0, %v6607_v13 }
 0x6f4   :  { %4210 = vmatprep.mubr.bf16.mxu1 %v6685_v14 }
 0x6fb   :  { %5989 = vmatmul.mubr.msk.bf16.vlgmr.msra.gmra.mrb[16].mxu1 %vm73_vm0, %v6606_v30 }
 0x6fc   :  { %4232 = vmatpush1.bf16.msra.mxu1 %v4101_v32  ;;  %4220 = vmatprep.mubr.bf16.mxu1 %v6685_v14 }
 0x6fd   :  { %4233 = vmatprep.subr.bf16.mxu1 %v4096_v7 }
 0x700   :  { %4234 = vmatpush1.bf16.msra.mxu1 %v4106_v6 }
 0x701   :  { %4375 = vmatprep.subr.bf16.mxu1 %v4348_v23 }
 0x703   :  { %5990 = vmatmul.mubr.msk.bf16.gmra.mrb[20].mxu1 %vm73_vm0, %v6607_v13 }
 0x704   :  { %4263 = vmatprep.mubr.bf16.mxu1 %v6685_v14 }
 0x70b   :  { %5991 = vmatmul.mubr.msk.bf16.vlgmr.msra.gmra.mrb[24].mxu1 %vm73_vm0, %v6606_v30  ;;  %v4596_v30 = vpop.permute.xlu1 %4595 }
 0x70c   :  { %4376 = vmatpush1.bf16.msra.mxu1 %v4347_v0  ;;  %4273 = vmatprep.mubr.bf16.mxu1 %v6685_v14  ;;  %v4606_v21 = vsel %vm1988_vm11, %v4594_v9, %v4596_v30 }
 0x70d   :  { %4377 = vmatprep.subr.bf16.mxu1 %v4353_v43 }
 0x710   :  { %4378 = vmatpush1.bf16.msra.mxu1 %v4352_v3 }
 0x711   :  { %4428 = vmatprep.subr.bf16.mxu1 %v4350_v51 }
 0x713   :  { %5992 = vmatmul.mubr.msk.bf16.gmra.mrb[28].mxu1 %vm73_vm0, %v6607_v13 }
 0x714   :  { %4407 = vmatprep.mubr.bf16.mxu1 %v6685_v14 }
 0x71b   :  { %5999 = vmatmul.mubr.msk.bf16.vlgmr.msra.gmra.mrb[8].mxu1 %vm73_vm0, %v6608_v37 }
 0x71c   :  { %4429 = vmatpush1.bf16.msra.mxu1 %v4349_v33  ;;  %4417 = vmatprep.mubr.bf16.mxu1 %v6685_v14 }
 0x71d   :  { %4430 = vmatprep.subr.bf16.mxu1 %v4355_v58 }
 0x720   :  { %4431 = vmatpush1.bf16.msra.mxu1 %v4354_v59 }
 0x721   :  { %4481 = vmatprep.subr.bf16.mxu1 %v4334_v11 }
 0x723   :  { %6000 = vmatmul.mubr.msk.bf16.gmra.mrb[12].mxu1 %vm73_vm0, %v6609_v18 }
 0x724   :  { %4460 = vmatprep.mubr.bf16.mxu1 %v6685_v14 }
 0x72b   :  { %6001 = vmatmul.mubr.msk.bf16.vlgmr.msra.gmra.mrb[16].mxu1 %vm73_vm0, %v6608_v37 }
 0x72c   :  { %4482 = vmatpush1.bf16.msra.mxu1 %v4351_v27  ;;  %4470 = vmatprep.mubr.bf16.mxu1 %v6685_v14 }
 0x72d   :  { %4483 = vmatprep.subr.bf16.mxu1 %v4346_v52 }
 0x730   :  { %4484 = vmatpush1.bf16.msra.mxu1 %v4356_v54 }
 0x731   :  { %4625 = vmatprep.subr.bf16.mxu1 %v4598_v38 }
 0x733   :  { %6002 = vmatmul.mubr.msk.bf16.gmra.mrb[20].mxu1 %vm73_vm0, %v6609_v18 }
 0x734   :  { %4513 = vmatprep.mubr.bf16.mxu1 %v6685_v14 }
 0x73b   :  { %6003 = vmatmul.mubr.msk.bf16.vlgmr.msra.gmra.mrb[24].mxu1 %vm73_vm0, %v6608_v37 }
 0x73c   :  { %4626 = vmatpush1.bf16.msra.mxu1 %v4597_v4  ;;  %4523 = vmatprep.mubr.bf16.mxu1 %v6685_v14 }
 0x73d   :  { %4627 = vmatprep.subr.bf16.mxu1 %v4603_v40 }
 0x740   :  { %4628 = vmatpush1.bf16.msra.mxu1 %v4602_v48 }
 0x741   :  { %4678 = vmatprep.subr.bf16.mxu1 %v4600_v50 }
 0x743   :  { %6004 = vmatmul.mubr.msk.bf16.gmra.mrb[28].mxu1 %vm73_vm0, %v6609_v18 }
 0x744   :  { %4657 = vmatprep.mubr.bf16.mxu1 %v6685_v14 }
 0x74b   :  { %6011 = vmatmul.mubr.msk.bf16.vlgmr.msra.gmra.mrb[8].mxu1 %vm73_vm0, %v6610_v60 }
 0x74c   :  { %4679 = vmatpush1.bf16.msra.mxu1 %v4599_v12  ;;  %4667 = vmatprep.mubr.bf16.mxu1 %v6685_v14 }
 0x74d   :  { %4680 = vmatprep.subr.bf16.mxu1 %v4605_v44 }
 0x750   :  { %4681 = vmatpush1.bf16.msra.mxu1 %v4604_v56 }
 0x751   :  { %4731 = vmatprep.subr.bf16.mxu1 %v4584_v1 }
 0x753   :  { %6012 = vmatmul.mubr.msk.bf16.gmra.mrb[12].mxu1 %vm73_vm0, %v6611_v57 }
 0x754   :  { %4710 = vmatprep.mubr.bf16.mxu1 %v6685_v14 }
 0x75b   :  { %6013 = vmatmul.mubr.msk.bf16.vlgmr.msra.gmra.mrb[16].mxu1 %vm73_vm0, %v6610_v60 }
 0x75c   :  { %4732 = vmatpush1.bf16.msra.mxu1 %v4601_v31  ;;  %4720 = vmatprep.mubr.bf16.mxu1 %v6685_v14 }
 0x75d   :  { %4733 = vmatprep.subr.bf16.mxu1 %v4596_v30 }
 0x760   :  { %4734 = vmatpush1.bf16.msra.mxu1 %v4606_v21 }
 0x763   :  { %6014 = vmatmul.mubr.msk.bf16.gmra.mrb[20].mxu1 %vm73_vm0, %v6611_v57 }
 0x764   :  { %4763 = vmatprep.mubr.bf16.mxu1 %v6685_v14 }
 0x76b   :  { %6015 = vmatmul.mubr.msk.bf16.vlgmr.msra.gmra.mrb[24].mxu1 %vm73_vm0, %v6610_v60 }
 0x76c   :  { %4773 = vmatprep.mubr.bf16.mxu1 %v6685_v14 }
 0x773   :  { %6016 = vmatmul.mubr.msk.bf16.gmra.mrb[28].mxu1 %vm73_vm0, %v6611_v57 }
 0x81e   :  { %v8056_v39 = vpop.f32.mrb[8].mxu1 }
 0x81f   :  { %v4808_v2 = vmul.f32 %v8056_v39, %v7338_v41  ;;  %v8060_v24 = vpop.f32.mrb[9].mxu1 }
 0x820   :  { %v4809_v17 = vmul.f32 %v8060_v24, %v7340_v42  ;;  %v8064_v13 = vpop.f32.mrb[10].mxu1 }
 0x821   :  { %v4868_v49 = vmul.f32 %v4808_v2, %v8056_v39  ;;  %v4814_v7 = vmul.f32 %v8064_v13, %v7338_v41  ;;  %v8069_v32 = vpop.f32.mrb[11].mxu1 }
 0x822   :  { %v4832_v53 = vadd.f32 %v4809_v17, %v4808_v2  ;;  %v4869_v61 = vmul.f32 %v4809_v17, %v8060_v24  ;;  %v4815_v6 = vmul.f32 %v8069_v32, %v7340_v42 }
 0x823   :  { %v4874_v23 = vmul.f32 %v4814_v7, %v8064_v13 }
 0x824   :  { %v4892_v34 = vadd.f32 %v4869_v61, %v4868_v49  ;;  %v4840_v36 = vadd.f32 %v4815_v6, %v4814_v7  ;;  %v4875_v26 = vmul.f32 %v4815_v6, %v8069_v32 }
 0x826   :  { %v4900_v46 = vadd.f32 %v4875_v26, %v4874_v23  ;;  %v8076_v0 = vpop.f32.mrb[12].mxu1 }
 0x827   :  { %v4820_v43 = vmul.f32 %v8076_v0, %v7338_v41  ;;  %v8080_v55 = vpop.f32.mrb[13].mxu1 }
 0x828   :  { %v4821_v63 = vmul.f32 %v8080_v55, %v7340_v42  ;;  %v8084_v3 = vpop.f32.mrb[14].mxu1 }
 0x829   :  { %v4880_v51 = vmul.f32 %v4820_v43, %v8076_v0  ;;  %v4826_v37 = vmul.f32 %v8084_v3, %v7338_v41  ;;  %v8089_v45 = vpop.f32.mrb[15].mxu1 }
 0x82a   :  { %v4848_v19 = vadd.f32 %v4821_v63, %v4820_v43  ;;  %v4881_v33 = vmul.f32 %v4821_v63, %v8080_v55  ;;  %v4827_v58 = vmul.f32 %v8089_v45, %v7340_v42 }
 0x82b   :  { %v4886_v59 = vmul.f32 %v4826_v37, %v8084_v3 }
 0x82c   :  { %v4908_v18 = vadd.f32 %v4881_v33, %v4880_v51  ;;  %v4856_v11 = vadd.f32 %v4827_v58, %v4826_v37  ;;  %v4887_v52 = vmul.f32 %v4827_v58, %v8089_v45 }
 0x82e   :  { %v4916_v27 = vadd.f32 %v4887_v52, %v4886_v59  ;;  %v8096_v20 = vpop.f32.mrb[16].mxu1 }
 0x82f   :  { %v4810_v41 = vmul.f32 %v8096_v20, %v7363_v8  ;;  %v8100_v16 = vpop.f32.mrb[17].mxu1 }
 0x830   :  { %v4811_v54 = vmul.f32 %v8100_v16, %v7372_v25  ;;  %v8104_v38 = vpop.f32.mrb[18].mxu1 }
 0x831   :  { %v4833_v42 = vadd.f32 %v4832_v53, %v4810_v41  ;;  %v4870_v15 = vmul.f32 %v4810_v41, %v8096_v20  ;;  %v4816_v10 = vmul.f32 %v8104_v38, %v7363_v8  ;;  %v8109_v22 = vpop.f32.mrb[19].mxu1 }
 0x832   :  { %v4871_v29 = vmul.f32 %v4811_v54, %v8100_v16  ;;  %v4817_v4 = vmul.f32 %v8109_v22, %v7372_v25 }
 0x833   :  { %v4893_v40 = vadd.f32 %v4892_v34, %v4870_v15  ;;  %v4834_v47 = vadd.f32 %v4833_v42, %v4811_v54  ;;  %v4841_v5 = vadd.f32 %v4840_v36, %v4816_v10  ;;  %v4876_v48 = vmul.f32 %v4816_v10, %v8104_v38 }
 0x834   :  { %v4877_v50 = vmul.f32 %v4817_v4, %v8109_v22 }
 0x835   :  { %v4894_v60 = vadd.f32 %v4893_v40, %v4871_v29  ;;  %v4901_v62 = vadd.f32 %v4900_v46, %v4876_v48  ;;  %v4842_v9 = vadd.f32 %v4841_v5, %v4817_v4 }
 0x836   :  { %v8116_v12 = vpop.f32.mrb[20].mxu1 }
 0x837   :  { %v4902_v44 = vadd.f32 %v4901_v62, %v4877_v50  ;;  %v4822_v56 = vmul.f32 %v8116_v12, %v7363_v8  ;;  %v8120_v57 = vpop.f32.mrb[21].mxu1 }
 0x838   :  { %v4823_v1 = vmul.f32 %v8120_v57, %v7372_v25  ;;  %v8124_v31 = vpop.f32.mrb[22].mxu1 }
 0x839   :  { %v4849_v30 = vadd.f32 %v4848_v19, %v4822_v56  ;;  %v4882_v21 = vmul.f32 %v4822_v56, %v8116_v12  ;;  %v4828_v2 = vmul.f32 %v8124_v31, %v7363_v8  ;;  %v8129_v17 = vpop.f32.mrb[23].mxu1 }
 0x83a   :  { %v4883_v49 = vmul.f32 %v4823_v1, %v8120_v57  ;;  %v4829_v7 = vmul.f32 %v8129_v17, %v7372_v25 }
 0x83b   :  { %v4909_v53 = vadd.f32 %v4908_v18, %v4882_v21  ;;  %v4850_v61 = vadd.f32 %v4849_v30, %v4823_v1  ;;  %v4857_v6 = vadd.f32 %v4856_v11, %v4828_v2  ;;  %v4888_v23 = vmul.f32 %v4828_v2, %v8124_v31 }
 0x83c   :  { %v4889_v34 = vmul.f32 %v4829_v7, %v8129_v17 }
 0x83d   :  { %v4910_v36 = vadd.f32 %v4909_v53, %v4883_v49  ;;  %v4917_v26 = vadd.f32 %v4916_v27, %v4888_v23  ;;  %v4858_v46 = vadd.f32 %v4857_v6, %v4829_v7 }
 0x83e   :  { %v8136_v43 = vpop.f32.mrb[24].mxu1 }
 0x83f   :  { %v4918_v8 = vadd.f32 %v4917_v26, %v4889_v34  ;;  %v4812_v63 = vmul.f32 %v8136_v43, %v7374_v28  ;;  %v8140_v51 = vpop.f32.mrb[25].mxu1 }
 0x840   :  { %v4813_v25 = vmul.f32 %v8140_v51, %v7382_v35  ;;  %v8144_v37 = vpop.f32.mrb[26].mxu1 }
 0x841   :  { %v4835_v19 = vadd.f32 %v4834_v47, %v4812_v63  ;;  %v4872_v33 = vmul.f32 %v4812_v63, %v8136_v43  ;;  %v4818_v58 = vmul.f32 %v8144_v37, %v7374_v28  ;;  %v8149_v59 = vpop.f32.mrb[27].mxu1 }
 0x842   :  { %v4873_v18 = vmul.f32 %v4813_v25, %v8140_v51  ;;  %v4819_v11 = vmul.f32 %v8149_v59, %v7382_v35  ;;  %v4836_v52 = vsel %vm2264_vm13, %v4813_v25, 0.0 }
 0x843   :  { %v4895_v27 = vadd.f32 %v4894_v60, %v4872_v33  ;;  %v4843_v41 = vadd.f32 %v4842_v9, %v4818_v58  ;;  %v4878_v54 = vmul.f32 %v4818_v58, %v8144_v37  ;;  %v4837_v42 = vadd.f32 %v4836_v52, %v4835_v19 }
 0x844   :  { %v4879_v15 = vmul.f32 %v4819_v11, %v8149_v59  ;;  %v4844_v10 = vsel %vm2264_vm13, %v4819_v11, 0.0  ;;  %v4896_v29 = vsel %vm2264_vm13, %v4873_v18, 0.0 }
 0x845   :  { %v4903_v4 = vadd.f32 %v4902_v44, %v4878_v54  ;;  %4838 = vadd.xlane.f32.xlu0 %v4837_v42  ;;  %v4845_v40 = vadd.f32 %v4844_v10, %v4843_v41  ;;  %v4897_v47 = vadd.f32 %v4896_v29, %v4895_v27 }
 0x846   :  { %v8159_v5 = vpop.f32.mrb[28].mxu1  ;;  %v4904_v48 = vsel %vm2264_vm13, %v4879_v15, 0.0 }
 0x847   :  { %v4824_v50 = vmul.f32 %v8159_v5, %v7374_v28  ;;  %4846 = vadd.xlane.f32.xlu1 %v4845_v40  ;;  %v8164_v60 = vpop.f32.mrb[29].mxu1  ;;  %v4905_v62 = vadd.f32 %v4904_v48, %v4903_v4 }
 0x848   :  { %v4825_v9 = vmul.f32 %v8164_v60, %v7382_v35  ;;  %v8168_v56 = vpop.f32.mrb[30].mxu1 }
 0x849   :  { %v4851_v44 = vadd.f32 %v4850_v61, %v4824_v50  ;;  %v4884_v1 = vmul.f32 %v4824_v50, %v8159_v5  ;;  %v4830_v30 = vmul.f32 %v8168_v56, %v7374_v28  ;;  %4898 = vadd.xlane.f32.xlu0 %v4897_v47  ;;  %v8173_v21 = vpop.f32.mrb[31].mxu1 }
 0x84a   :  { %v4885_v2 = vmul.f32 %v4825_v9, %v8164_v60  ;;  %v4831_v49 = vmul.f32 %v8173_v21, %v7382_v35  ;;  %v4852_v7 = vsel %vm2264_vm13, %v4825_v9, 0.0 }
 0x84b   :  { %v4911_v53 = vadd.f32 %v4910_v36, %v4884_v1  ;;  %v4859_v6 = vadd.f32 %v4858_v46, %v4830_v30  ;;  %v4890_v23 = vmul.f32 %v4830_v30, %v8168_v56  ;;  %v4853_v61 = vadd.f32 %v4852_v7, %v4851_v44 }
 0x84c   :  { %v4860_v34 = vsel %vm2264_vm13, %v4831_v49, 0.0  ;;  %v4891_v26 = vmul.f32 %v4831_v49, %v8173_v21  ;;  %v4912_v28 = vsel %vm2264_vm13, %v4885_v2, 0.0  ;;  %v6697_v36 = vmov 2  }
 0x84d   :  { %v4919_v63 = vadd.f32 %v4918_v8, %v4890_v23  ;;  %4906 = vadd.xlane.f32.xlu0 %v4905_v62  ;;  %4854 = vadd.xlane.f32.xlu1 %v4853_v61  ;;  %v4913_v25 = vadd.f32 %v4912_v28, %v4911_v53  ;;  %v4861_v19 = vadd.f32 %v4860_v34, %v4859_v6  ;;  %v6655_v61 = vld [vmem:[%s8447_s4] sm:$0xff] }
 0x84e   :  { %v4920_v35 = vsel %vm2264_vm13, %v4891_v26, 0.0  ;;  %6570 = vset.pattern.permute.xlu0 %v6697_v36  ;;  %6571 = vset.pattern.permute.xlu1 %v6697_v36 }
 0x84f   :  { %v4921_v33 = vadd.f32 %v4920_v35, %v4919_v63  ;;  %v6656_v63 = vld [vmem:[%s8447_s4 + $0x8] sm:$0xff] }
 0x851   :  { %4914 = vadd.xlane.f32.xlu1 %v4913_v25  ;;  %4862 = vadd.xlane.f32.xlu0 %v4861_v19 }
 0x855   :  { %4922 = vadd.xlane.f32.xlu0 %v4921_v33  ;;  %v6657_v33 = vld [vmem:[%s8447_s4 + $0x10] sm:$0xff] }
 0x8d2   :  { %v4839_v46 = vpop.xlane.xlu0 %4838 }
 0x8d3   :  { %v4864_v58 = vmul.f32 0.001953125, %v4839_v46 }
 0x8d4   :  { %v4847_v18 = vpop.xlane.xlu1 %4846 }
 0x8d5   :  { %v4928_v52 = vmul.f32 %v4864_v58, %v4864_v58  ;;  %v4865_v27 = vmul.f32 0.001953125, %v4847_v18 }
 0x8d6   :  { %v4899_v11 = vpop.xlane.xlu0 %4898 }
 0x8d7   :  { %v4924_v8 = vmul.f32 0.001953125, %v4899_v11  ;;  %v4929_v15 = vmul.f32 %v4865_v27, %v4865_v27 }
 0x8d9   :  { %v4932_v41 = vsub.f32 %v4924_v8, %v4928_v52 }
 0x8da   :  { %v4907_v54 = vpop.xlane.xlu0 %4906  ;;  %v4855_v42 = vpop.xlane.xlu1 %4854 }
 0x8db   :  { %v4936_v10 = vadd.f32 1e-05, %v4932_v41  ;;  %v4925_v29 = vmul.f32 0.001953125, %v4907_v54  ;;  %v4866_v4 = vmul.f32 0.001953125, %v4855_v42 }
 0x8dd   :  { %6645 = vrsqrt.f32 %v4936_v10  ;;  %v4933_v40 = vsub.f32 %v4925_v29, %v4929_v15  ;;  %v4930_v62 = vmul.f32 %v4866_v4, %v4866_v4 }
 0x8de   :  { %v4915_v47 = vpop.xlane.xlu1 %4914  ;;  %v4863_v48 = vpop.xlane.xlu0 %4862 }
 0x8df   :  { %v4937_v50 = vadd.f32 1e-05, %v4933_v40  ;;  %v4926_v9 = vmul.f32 0.001953125, %v4915_v47  ;;  %v4867_v44 = vmul.f32 0.001953125, %v4863_v48  ;;  %v5098_v40 = vld [vmem:[%s8448_s5 + $0x6] sm:$0x1] }
 0x8e1   :  { %6647 = vrsqrt.f32 %v4937_v50  ;;  %v4934_v1 = vsub.f32 %v4926_v9, %v4930_v62  ;;  %v4931_v49 = vmul.f32 %v4867_v44, %v4867_v44 }
 0x8e2   :  { %v4923_v30 = vpop.xlane.xlu0 %4922 }
 0x8e3   :  { %v4938_v2 = vadd.f32 1e-05, %v4934_v1  ;;  %v4927_v7 = vmul.f32 0.001953125, %v4923_v30 }
 0x8e5   :  { %6649 = vrsqrt.f32 %v4938_v2  ;;  %v4935_v53 = vsub.f32 %v4927_v7, %v4931_v49 }
 0x8e7   :  { %v6646_v6 = vpop.eup %6645  ;;  %v4939_v23 = vadd.f32 1e-05, %v4935_v53 }
 0x8e8   :  { %v4944_v34 = vmul.f32 %v6655_v61, %v6646_v6 }
 0x8e9   :  { %6651 = vrsqrt.f32 %v4939_v23 }
 0x8ea   :  { %v4992_v26 = vmul.f32 %v4944_v34, %v4864_v58  ;;  %v6658_v58 = vld [vmem:[%s8447_s4 + $0x18] sm:$0xff] }
 0x8eb   :  { %v6648_v28 = vpop.eup %6647 }
 0x8ec   :  { %5000 = vrot.lane.b32.xlu1 %v4992_v26, %s6695_s19  ;;  %v4945_v25 = vmul.f32 %v6656_v63, %v6648_v28 }
 0x8ee   :  { %v4993_v19 = vmul.f32 %v4945_v25, %v4865_v27  ;;  %v6698_v27 = vmov 3  }
 0x8ef   :  { %v6650_v35 = vpop.eup %6649 }
 0x8f0   :  { %5002 = vrot.lane.b32.xlu0 %v4993_v19, %s6695_s19  ;;  %v4946_v36 = vmul.f32 %v6657_v33, %v6650_v35 }
 0x8f2   :  { %v4994_v46 = vmul.f32 %v4946_v36, %v4866_v4 }
 0x8f3   :  { %v6652_v18 = vpop.eup %6651 }
 0x8f4   :  { %5004 = vrot.lane.b32.xlu1 %v4994_v46, %s6695_s19  ;;  %4950 = vperm.xlu0 %6570, %v4944_v34   ;;  %v4947_v11 = vmul.f32 %v6658_v58, %v6652_v18 }
 0x8f6   :  { %v4995_v52 = vmul.f32 %v4947_v11, %v4867_v44 }
 0x8f8   :  { %5006 = vrot.lane.b32.xlu1 %v4995_v52, %s6695_s19  ;;  %6573 = vset.pattern.permute.xlu0 %v6698_v27 }
 0x8fc   :  { %4955 = vperm.xlu1 %6571, %v4945_v25  }
 0x900   :  { %4960 = vperm.xlu1 %6571, %v4946_v36  }
 0x904   :  { %4965 = vperm.xlu1 %6571, %v4947_v11  }
 0x908   :  { %6572 = vset.pattern.permute.xlu1 %v6698_v27 }
 0x95e   :  { %v5001_v8 = vpop.permute.xlu1 %5000 }
 0x95f   :  { %v5012_v41 = vsub.f32 %v6655_v61, %v5001_v8 }
 0x961   :  { %5018 = vperm.xlu1 %6572, %v5012_v41  }
 0x962   :  { %v5003_v54 = vpop.permute.xlu0 %5002 }
 0x963   :  { %v5013_v42 = vsub.f32 %v6656_v63, %v5003_v54 }
 0x965   :  { %5023 = vperm.xlu0 %6573, %v5013_v42  }
 0x966   :  { %v5005_v15 = vpop.permute.xlu1 %5004 }
 0x967   :  { %v5014_v10 = vsub.f32 %v6657_v33, %v5005_v15 }
 0x969   :  { %5028 = vperm.xlu0 %6573, %v5014_v10  }
 0x96a   :  { %v5007_v29 = vpop.permute.xlu1 %5006 }
 0x96b   :  { %v5015_v4 = vsub.f32 %v6658_v58, %v5007_v29 }
 0x96d   :  { %5033 = vperm.xlu1 %6572, %v5015_v4   ;;  %6574 = vset.pattern.permute.xlu0 %v6685_v14 }
 0x96e   :  { %5101 = vperm.xlu0 %6574, %v5098_v40  }
 0x973   :  { %v4951_v50 = vpop.permute.xlu0 %4950 }
 0x974   :  { %v4968_v9 = vmul.f32 %v4951_v50, %v8056_v39  ;;  %v4970_v44 = vmul.f32 %v4951_v50, %v8096_v20  ;;  %v4972_v1 = vmul.f32 %v4951_v50, %v8136_v43  ;;  %v4969_v30 = vmul.f32 %v4951_v50, %v8060_v24 }
 0x975   :  { %v4971_v2 = vmul.f32 %v4951_v50, %v8100_v16  ;;  %v4973_v49 = vmul.f32 %v4951_v50, %v8140_v51 }
 0x97b   :  { %v4956_v47 = vpop.permute.xlu1 %4955 }
 0x97c   :  { %v4974_v7 = vmul.f32 %v4956_v47, %v8064_v13  ;;  %v4976_v53 = vmul.f32 %v4956_v47, %v8104_v38  ;;  %v4978_v6 = vmul.f32 %v4956_v47, %v8144_v37  ;;  %v4975_v23 = vmul.f32 %v4956_v47, %v8069_v32 }
 0x97d   :  { %v4977_v43 = vmul.f32 %v4956_v47, %v8109_v22  ;;  %v4979_v24 = vmul.f32 %v4956_v47, %v8149_v59 }
 0x97f   :  { %v4961_v48 = vpop.permute.xlu1 %4960 }
 0x980   :  { %v4980_v39 = vmul.f32 %v4961_v48, %v8076_v0  ;;  %v4982_v20 = vmul.f32 %v4961_v48, %v8116_v12  ;;  %v4984_v16 = vmul.f32 %v4961_v48, %v8159_v5  ;;  %v4981_v13 = vmul.f32 %v4961_v48, %v8080_v55 }
 0x981   :  { %v4983_v37 = vmul.f32 %v4961_v48, %v8120_v57  ;;  %v4985_v32 = vmul.f32 %v4961_v48, %v8164_v60 }
 0x983   :  { %v4966_v62 = vpop.permute.xlu1 %4965 }
 0x984   :  { %v4986_v0 = vmul.f32 %v4966_v62, %v8084_v3  ;;  %v4988_v12 = vmul.f32 %v4966_v62, %v8124_v31  ;;  %v4990_v22 = vmul.f32 %v4966_v62, %v8168_v56  ;;  %v4987_v59 = vmul.f32 %v4966_v62, %v8089_v45 }
 0x985   :  { %v4989_v47 = vmul.f32 %v4966_v62, %v8129_v17 }
 0x9e0   :  { %v5019_v61 = vpop.permute.xlu1 %5018 }
 0x9e1   :  { %v5037_v51 = vadd.f32 %v5019_v61, %v4969_v30  ;;  %v5036_v34 = vadd.f32 %v5019_v61, %v4968_v9  ;;  %v5039_v38 = vadd.f32 %v5019_v61, %v4971_v2  ;;  %v5038_v26 = vadd.f32 %v5019_v61, %v4970_v44 }
 0x9e2   :  { %v5041_v25 = vadd.f32 %v5019_v61, %v4973_v49  ;;  %v5040_v19 = vadd.f32 %v5019_v61, %v4972_v1  ;;  %v4991_v9 = vmul.f32 %v4966_v62, %v8173_v21  ;;  %v5084_v21 = vld [vmem:[%s8448_s5 + $0x5] sm:$0x1] }
 0x9e3   :  { %v5061_v5 = vmax.f32 %v5037_v51, 0.0  ;;  %v5060_v63 = vmax.f32 %v5036_v34, 0.0  ;;  %v5063_v57 = vmax.f32 %v5039_v38, 0.0  ;;  %v5062_v46 = vmax.f32 %v5038_v26, 0.0 }
 0x9e4   :  { %v5024_v28 = vpop.permute.xlu0 %5023  ;;  %v5065_v52 = vmax.f32 %v5041_v25, 0.0  ;;  %v5064_v27 = vmax.f32 %v5040_v19, 0.0  ;;  %v8262_v25 = vld [vmem:[%s8449_s6 + $0x50] sm:$0xff]  }
 0x9e5   :  { %v5043_v55 = vadd.f32 %v5024_v28, %v4975_v23  ;;  %v5042_v35 = vadd.f32 %v5024_v28, %v4974_v7  ;;  %v5045_v33 = vadd.f32 %v5024_v28, %v4977_v43  ;;  %v5044_v36 = vadd.f32 %v5024_v28, %v4976_v53  ;;  %v8268_v19 = vld [vmem:[%s8449_s6 + $0x10] sm:$0xff]  }
 0x9e6   :  { %v5047_v60 = vadd.f32 %v5024_v28, %v4979_v24  ;;  %v5046_v18 = vadd.f32 %v5024_v28, %v4978_v6  ;;  %v8238_v28 = vld [vmem:[%s8449_s6 + $0x40] sm:$0xff]  }
 0x9e7   :  { %v5067_v3 = vmax.f32 %v5043_v55, 0.0  ;;  %v5066_v58 = vmax.f32 %v5042_v35, 0.0  ;;  %v5069_v31 = vmax.f32 %v5045_v33, 0.0  ;;  %v5068_v11 = vmax.f32 %v5044_v36, 0.0  ;;  %v8274_v55 = vld [vmem:[%s8449_s6 + $0x58] sm:$0xff]   ;;  %v8286_v33 = vld [vmem:[%s8449_s6 + $0x60] sm:$0xff]  }
 0x9e8   :  { %v5029_v56 = vpop.permute.xlu0 %5028  ;;  %v5071_v45 = vmax.f32 %v5047_v60, 0.0  ;;  %v5070_v8 = vmax.f32 %v5046_v18, 0.0  ;;  %v8280_v35 = vld [vmem:[%s8449_s6 + $0x18] sm:$0xff]   ;;  %v8292_v36 = vld [vmem:[%s8449_s6 + $0x20] sm:$0xff]   ;;  %v8311_v60 = vld [vmem:[%s8449_s6 + $0x70] sm:$0xff]  }
 0x9e9   :  { %v5087_v41 = vpack.c.bf16 %v5067_v3, %v5061_v5  ;;  %v5086_v54 = vpack.c.bf16 %v5066_v58, %v5060_v63  ;;  %v5049_v42 = vadd.f32 %v5029_v56, %v4981_v13  ;;  %v5048_v15 = vadd.f32 %v5029_v56, %v4980_v39  ;;  %v8243_v5 = vld [vmem:[%s8449_s6] sm:$0xff]   ;;  %v8249_v63 = vld [vmem:[%s8449_s6 + $0x48] sm:$0xff]   ;;  %v8316_v18 = vld [vmem:[%s8449_s6 + $0x30] sm:$0xff]  }
 0x9ea   :  { %v5089_v10 = vpack.c.bf16 %v5069_v31, %v5063_v57  ;;  %v5088_v29 = vpack.c.bf16 %v5068_v11, %v5062_v46  ;;  %v5051_v4 = vadd.f32 %v5029_v56, %v4983_v37  ;;  %v5050_v40 = vadd.f32 %v5029_v56, %v4982_v20  ;;  %v8298_v57 = vld [vmem:[%s8449_s6 + $0x68] sm:$0xff]   ;;  %v8322_v3 = vld [vmem:[%s8449_s6 + $0x78] sm:$0xff]  }
 0x9eb   :  { %5107 = vmatprep.subr.bf16.mxu0 %v5087_v41  ;;  %v5091_v48 = vpack.c.bf16 %v5071_v45, %v5065_v52  ;;  %v5090_v50 = vpack.c.bf16 %v5070_v8, %v5064_v27  ;;  %v5073_v1 = vmax.f32 %v5049_v42, 0.0  ;;  %v5072_v30 = vmax.f32 %v5048_v15, 0.0  ;;  %v8304_v46 = vld [vmem:[%s8449_s6 + $0x28] sm:$0xff]   ;;  %v8328_v58 = vld [vmem:[%s8449_s6 + $0x38] sm:$0xff]  }
 0x9ec   :  { %v5034_v44 = vpop.permute.xlu1 %5033  ;;  %5108 = vmatpush1.bf16.msra.mxu0 %v5086_v54  ;;  %v5053_v2 = vadd.f32 %v5029_v56, %v4985_v32  ;;  %v5052_v49 = vadd.f32 %v5029_v56, %v4984_v16  ;;  %v5075_v39 = vmax.f32 %v5051_v4, 0.0  ;;  %v5074_v61 = vmax.f32 %v5050_v40, 0.0 }
 0x9ed   :  { %v5055_v7 = vadd.f32 %v5034_v44, %v4987_v59  ;;  %v5054_v53 = vadd.f32 %v5034_v44, %v4986_v0  ;;  %v5057_v6 = vadd.f32 %v5034_v44, %v4989_v47  ;;  %v5056_v23 = vadd.f32 %v5034_v44, %v4988_v12  ;;  %v5102_v11 = vpop.permute.xlu0 %5101 }
 0x9ee   :  { %v5059_v20 = vadd.f32 %v5034_v44, %v4991_v9  ;;  %v5058_v43 = vadd.f32 %v5034_v44, %v4990_v22  ;;  %v5077_v62 = vmax.f32 %v5053_v2, 0.0  ;;  %v5076_v38 = vmax.f32 %v5052_v49, 0.0  ;;  %v8342_v9 = vld [vmem:[%s8449_s6 + $0x88] sm:$0xff]  }
 0x9ef   :  { %v5079_v24 = vmax.f32 %v5055_v7, 0.0  ;;  %v5078_v17 = vmax.f32 %v5054_v53, 0.0  ;;  %v5081_v51 = vmax.f32 %v5057_v6, 0.0  ;;  %v5080_v34 = vmax.f32 %v5056_v23, 0.0  ;;  %v6630_v7 = vld [vmem:[%s8449_s6 + $0x90] sm:$0xff]  }
 0x9f0   :  { %v5083_v13 = vmax.f32 %v5059_v20, 0.0  ;;  %v5082_v16 = vmax.f32 %v5058_v43, 0.0  ;;  %v5085_v22 = vpack.c.bf16 %v5084_v21, %v5084_v21  ;;  %v6699_v31 = vmov 0.0   ;;  %v6631_v20 = vld [vmem:[%s8449_s6 + $0x98] sm:$0xff]  }
 0x9f1   :  { %v5093_v26 = vpack.c.bf16 %v5079_v24, %v5073_v1  ;;  %v5092_v37 = vpack.c.bf16 %v5078_v17, %v5072_v30  ;;  %v5095_v32 = vpack.c.bf16 %v5081_v51, %v5075_v39  ;;  %v5094_v0 = vpack.c.bf16 %v5080_v34, %v5074_v61  ;;  %v6632_v17 = vld [vmem:[%s8449_s6 + $0xa0] ss:$0 sps:$4 sm:$0x33]  }
 0x9f2   :  { %v5097_v12 = vpack.c.bf16 %v5083_v13, %v5077_v62  ;;  %v5096_v59 = vpack.c.bf16 %v5082_v16, %v5076_v38  ;;  %v5411_v21 = vsel %vm132_vm3, %v6632_v17, 0  ;;  %vm5671_vm3 = vcmask 254976  }
 0x9f3   :  { %5109 = vmatprep.subr.bf16.mxu0 %v5093_v26 }
 0x9f4   :  { %5110 = vmatpush1.bf16.msra.mxu0 %v5092_v37 }
 0x9f5   :  { %5148 = vmatprep.subr.bf16.mxu0 %v5089_v10  ;;  %v8336_v10 = vld [vmem:[%s8449_s6 + $0x80] sm:$0xff]  }
 0x9f7   :  { %6017 = vmatmul.mubr.msk.bf16.vlgmr.msra.gmra.mrb[24].mxu0 %vm73_vm0, %v5085_v22 }
 0x9f8   :  { %5149 = vmatpush1.bf16.msra.mxu0 %v5088_v29  ;;  %5180 = vmatprep.mubr.bf16.mxu0 %v6685_v14 }
 0x9f9   :  { %5150 = vmatprep.subr.bf16.mxu0 %v5095_v32 }
 0x9fc   :  { %5151 = vmatpush1.bf16.msra.mxu0 %v5094_v0 }
 0x9fd   :  { %5189 = vmatprep.subr.bf16.mxu0 %v5091_v48 }
 0x9ff   :  { %6018 = vmatmul.mubr.msk.bf16.vlgmr.msra.gmra.mrb[28].mxu0 %vm73_vm0, %v5085_v22 }
 0xa00   :  { %5190 = vmatpush1.bf16.msra.mxu0 %v5090_v50  ;;  %5221 = vmatprep.mubr.bf16.mxu0 %v6685_v14  ;;  %v8256_v14 = vld [vmem:[%s8449_s6 + $0x8] sm:$0xff]  }
 0xa01   :  { %5191 = vmatprep.subr.bf16.mxu0 %v5097_v12 }
 0xa04   :  { %5192 = vmatpush1.bf16.msra.mxu0 %v5096_v59 }
 0xa05   :  { %6054 = vmatprep.subr.bf16.mxu0 %v8238_v28 }
 0xa07   :  { %6019 = vmatmul.mubr.msk.bf16.vlgmr.msra.gmra.mrb[32].mxu0 %vm73_vm0, %v5085_v22 }
 0xa08   :  { %6055 = vmatpush3.bf16.msra.mxu0 %v8243_v5 }
 0xa09   :  { %6056 = vmatprep.subr.bf16.mxu0 %v8249_v63 }
 0xa0c   :  { %6057 = vmatpush3.bf16.msra.mxu0 %v8256_v14 }
 0xa0d   :  { %6058 = vmatprep.subr.bf16.mxu0 %v8262_v25 }
 0xa10   :  { %6059 = vmatpush3.bf16.msra.mxu0 %v8268_v19 }
 0xa11   :  { %6060 = vmatprep.subr.bf16.mxu0 %v8274_v55 }
 0xa14   :  { %6061 = vmatpush3.bf16.msra.mxu0 %v8280_v35 }
 0xa15   :  { %6062 = vmatprep.subr.bf16.mxu0 %v8286_v33 }
 0xa18   :  { %6063 = vmatpush3.bf16.msra.mxu0 %v8292_v36 }
 0xa19   :  { %6064 = vmatprep.subr.bf16.mxu0 %v8298_v57 }
 0xa1c   :  { %6065 = vmatpush3.bf16.msra.mxu0 %v8304_v46 }
 0xa1d   :  { %6066 = vmatprep.subr.bf16.mxu0 %v8311_v60 }
 0xa20   :  { %6067 = vmatpush3.bf16.msra.mxu0 %v8316_v18 }
 0xa21   :  { %6068 = vmatprep.subr.bf16.mxu0 %v8322_v3 }
 0xa24   :  { %6069 = vmatpush3.bf16.msra.mxu0 %v8328_v58 }
 0xa25   :  { %6116 = vmatprep.subr.bf16.mxu0 %v6699_v31 }
 0xaca   :  { %v5141_v56 = vpop.f32.mrb[24].mxu0 }
 0xacb   :  { %v5143_v52 = vpop.f32.mrb[25].mxu0  ;;  %v5142_v45 = vadd.f32 %v5141_v56, %v5102_v11 }
 0xacc   :  { %v5145_v27 = vpop.f32.mrb[26].mxu0  ;;  %v5144_v8 = vadd.f32 %v5143_v52, %v5102_v11 }
 0xacd   :  { %v5146_v41 = vpop.f32.mrb[27].mxu0  ;;  %v5230_v54 = vmax.f32 %v5142_v45, 0.0  ;;  %v6043_v45 = vld [vmem:[%s8448_s5] ss:$0 sm:$0xff] }
 0xace   :  { %v5231_v42 = vmax.f32 %v5144_v8, 0.0 }
 0xacf   :  { %v5236_v29 = vpack.c.bf16 %v5230_v54, %v5230_v54 }
 0xad0   :  { %v5237_v15 = vpack.c.bf16 %v5231_v42, %v5231_v42 }
 0xad2   :  { %5445 = vmatprep.mubr.bf16.mxu0 %v5237_v15  ;;  %v5182_v4 = vpop.f32.mrb[28].mxu0  ;;  %v6044_v15 = vld [vmem:[%s8448_s5 + $0x1] ss:$0 sm:$0xff] }
 0xad3   :  { %5446 = vmatmul.mubr.bf16.vlgmr.msra.gmra.mrb[36].mxu0 %v5236_v29  ;;  %v5183_v40 = vadd.f32 %v5182_v4, %v5102_v11  ;;  %v5184_v47 = vpop.f32.mrb[29].mxu0 }
 0xad4   :  { %6117 = vmatpush3.bf16.msra.mxu0 %v8336_v10  ;;  %v5185_v48 = vadd.f32 %v5184_v47, %v5102_v11  ;;  %v5186_v50 = vpop.f32.mrb[30].mxu0  ;;  %6126 = vmatprep.mubr.msk.bf16.mxu0 %vm6700_vm14, %v6699_v31 }
 0xad5   :  { %v5232_v44 = vmax.f32 %v5183_v40, 0.0  ;;  %6118 = vmatprep.subr.bf16.mxu0 %v6699_v31  ;;  %v5187_v1 = vpop.f32.mrb[31].mxu0 }
 0xad6   :  { %v5233_v30 = vmax.f32 %v5185_v48, 0.0  ;;  %v6636_v1 = vld [vmem:[%s8450_s7 + $0x18] sm:$0xff]  }
 0xad7   :  { %v5238_v2 = vpack.c.bf16 %v5232_v44, %v5232_v44  ;;  %v6635_v44 = vld [vmem:[%s8450_s7 + $0x10] sm:$0xff]  }
 0xad8   :  { %v5239_v49 = vpack.c.bf16 %v5233_v30, %v5233_v30  ;;  %6119 = vmatpush3.bf16.msra.mxu0 %v8342_v9 }
 0xad9   :  { %6120 = vmatprep.subr.bf16.mxu0 %v6699_v31  ;;  %5497 = vrot.lane.b32.xlu0 %v5238_v2, %s6701_s16 }
 0xada   :  { %v5223_v53 = vpop.f32.mrb[32].mxu0  ;;  %5499 = vrot.lane.b32.xlu1 %v5239_v49, %s6701_s16 }
 0xadb   :  { %v5224_v6 = vadd.f32 %v5223_v53, %v5102_v11  ;;  %v5225_v23 = vpop.f32.mrb[33].mxu0 }
 0xadc   :  { %v5226_v39 = vadd.f32 %v5225_v23, %v5102_v11  ;;  %6121 = vmatpush3.bf16.msra.mxu0 %v6630_v7  ;;  %v5227_v61 = vpop.f32.mrb[34].mxu0 }
 0xadd   :  { %v5234_v43 = vmax.f32 %v5224_v6, 0.0  ;;  %6122 = vmatprep.subr.bf16.mxu0 %v6699_v31  ;;  %v5228_v24 = vpop.f32.mrb[35].mxu0 }
 0xade   :  { %v5235_v34 = vmax.f32 %v5226_v39, 0.0 }
 0xadf   :  { %v5240_v51 = vpack.c.bf16 %v5234_v43, %v5234_v43 }
 0xae0   :  { %6123 = vmatpush3.bf16.msra.mxu0 %v6631_v20  ;;  %v5241_v62 = vpack.c.bf16 %v5235_v34, %v5235_v34 }
 0xae1   :  { %5501 = vrot.lane.b32.xlu1 %v5240_v51, %s6701_s16  ;;  %6124 = vmatprep.subr.bf16.mxu0 %v6699_v31 }
 0xae4   :  { %6125 = vmatpush3.bf16.msra.mxu0 %v5411_v21 }
 0xae5   :  { %5503 = vrot.lane.b32.xlu1 %v5241_v62, %s6701_s16  ;;  %6082 = vmatprep.subr.bf16.mxu0 %v8238_v28 }
 0xae7   :  { %6127 = vmatmul.mubr.msk.bf16.vlgmr.msra.gmra.mrb[40].mxu0 %vm5406_vm15, %v5238_v2 }
 0xae8   :  { %6083 = vmatpush3.bf16.msra.mxu0 %v8243_v5 }
 0xae9   :  { %6084 = vmatprep.subr.bf16.mxu0 %v8249_v63 }
 0xaec   :  { %6085 = vmatpush3.bf16.msra.mxu0 %v8256_v14 }
 0xaed   :  { %6086 = vmatprep.subr.bf16.mxu0 %v8262_v25 }
 0xaf0   :  { %6087 = vmatpush3.bf16.msra.mxu0 %v8268_v19 }
 0xaf1   :  { %6088 = vmatprep.subr.bf16.mxu0 %v8274_v55 }
 0xaf4   :  { %6089 = vmatpush3.bf16.msra.mxu0 %v8280_v35  ;;  %v6633_v35 = vld [vmem:[%s8450_s7] sm:$0xff]  }
 0xaf5   :  { %6090 = vmatprep.subr.bf16.mxu0 %v8286_v33  ;;  %v6634_v33 = vld [vmem:[%s8450_s7 + $0x8] sm:$0xff]  }
 0xaf8   :  { %6091 = vmatpush3.bf16.msra.mxu0 %v8292_v36 }
 0xaf9   :  { %6092 = vmatprep.subr.bf16.mxu0 %v8298_v57 }
 0xafc   :  { %6093 = vmatpush3.bf16.msra.mxu0 %v8304_v46 }
 0xafd   :  { %6094 = vmatprep.subr.bf16.mxu0 %v8311_v60 }
 0xb00   :  { %6095 = vmatpush3.bf16.msra.mxu0 %v8316_v18 }
 0xb01   :  { %6096 = vmatprep.subr.bf16.mxu0 %v8322_v3 }
 0xb04   :  { %6097 = vmatpush3.bf16.msra.mxu0 %v8328_v58 }
 0xb05   :  { %6130 = vmatprep.subr.bf16.mxu0 %v6699_v31 }
 0xb4b   :  { %v5498_v38 = vpop.permute.xlu0 %5497 }
 0xb4c   :  { %v5500_v13 = vpop.permute.xlu1 %5499 }
 0xb4d   :  { %v5506_v37 = vsel %vm5505_vm1, %v5498_v38, %v5500_v13 }
 0xb53   :  { %v5502_v16 = vpop.permute.xlu1 %5501 }
 0xb54   :  { %v5507_v26 = vsel %vm5505_vm1, %v5500_v13, %v5502_v16 }
 0xb55   :  { %5546 = vmatprep.mubr.bf16.mxu0 %v5507_v26 }
 0xb56   :  { %5547 = vmatmul.mubr.bf16.vlgmr.msra.gmra.mrb[44].mxu0 %v5506_v37 }
 0xb57   :  { %6131 = vmatpush3.bf16.msra.mxu0 %v8336_v10  ;;  %6140 = vmatprep.mubr.msk.bf16.mxu0 %vm6700_vm14, %v6699_v31  ;;  %v5504_v32 = vpop.permute.xlu1 %5503 }
 0xb58   :  { %6132 = vmatprep.subr.bf16.mxu0 %v6699_v31  ;;  %v5508_v0 = vsel %vm5505_vm1, %v5502_v16, %v5504_v32 }
 0xb5b   :  { %6133 = vmatpush3.bf16.msra.mxu0 %v8342_v9 }
 0xb5c   :  { %6134 = vmatprep.subr.bf16.mxu0 %v6699_v31 }
 0xb5f   :  { %6135 = vmatpush3.bf16.msra.mxu0 %v6630_v7 }
 0xb60   :  { %6136 = vmatprep.subr.bf16.mxu0 %v6699_v31 }
 0xb63   :  { %6137 = vmatpush3.bf16.msra.mxu0 %v6631_v20  ;;  %v6048_v20 = vld [vmem:[%s8448_s5 + $0x2] ss:$0 sm:$0xff] }
 0xb64   :  { %6138 = vmatprep.subr.bf16.mxu0 %v6699_v31 }
 0xb67   :  { %6139 = vmatpush3.bf16.msra.mxu0 %v5411_v21  ;;  %v6050_v21 = vld [vmem:[%s8448_s5 + $0x4] ss:$0 sm:$0xff] }
 0xb68   :  { %6144 = vmatprep.subr.bf16.mxu0 %v6699_v31 }
 0xb6a   :  { %6141 = vmatmul.mubr.msk.bf16.vlgmr.msra.gmra.mrb[48].mxu0 %vm5406_vm15, %v5508_v0 }
 0xb6b   :  { %6148 = vmatprep.mubr.msk.bf16.mxu0 %vm6700_vm14, %v6699_v31  ;;  %6145 = vmatpush3.bf16.msra.mxu0 %v6633_v35 }
 0xb6c   :  { %6146 = vmatprep.subr.bf16.mxu0 %v6699_v31 }
 0xb6f   :  { %6147 = vmatpush3.bf16.msra.mxu0 %v6634_v33 }
 0xb70   :  { %6152 = vmatprep.subr.bf16.mxu0 %v6699_v31 }
 0xba6   :  { %v6070_v12 = vpop.f32.mrb[36].mxu0 }
 0xba7   :  { %v6071_v59 = vpop.f32.mrb[37].mxu0 }
 0xba8   :  { %v6072_v22 = vadd.f32 %v6071_v59, %v6070_v12  ;;  %v6073_v28 = vpop.f32.mrb[38].mxu0 }
 0xba9   :  { %v6074_v5 = vpop.f32.mrb[39].mxu0 }
 0xbba   :  { %v5487_v63 = vpop.f32.mrb[40].mxu0 }
 0xbbb   :  { %v5488_v14 = vadd.f32 %v6072_v22, %v5487_v63  ;;  %v6128_v25 = vpop.f32.mrb[41].mxu0 }
 0xbbc   :  { %v5490_v19 = vpop.f32.mrb[42].mxu0 }
 0xbbd   :  { %v6129_v55 = vpop.f32.mrb[43].mxu0 }
 0xc29   :  { %v6098_v36 = vpop.f32.mrb[44].mxu0 }
 0xc2a   :  { %v6099_v57 = vpop.f32.mrb[45].mxu0 }
 0xc2b   :  { %v6100_v46 = vadd.f32 %v6099_v57, %v6098_v36  ;;  %v6101_v60 = vpop.f32.mrb[46].mxu0 }
 0xc2c   :  { %v6102_v18 = vpop.f32.mrb[47].mxu0 }
 0xc3d   :  { %v5588_v3 = vpop.f32.mrb[48].mxu0 }
 0xc3e   :  { %v5589_v58 = vadd.f32 %v6100_v46, %v5588_v3  ;;  %v6142_v11 = vpop.f32.mrb[49].mxu0 }
 0xc3f   :  { %v5591_v56 = vpop.f32.mrb[50].mxu0 }
 0xc40   :  { %v5595_v52 = vrot.slane %v5589_v58, 7  ;;  %v6143_v27 = vpop.f32.mrb[51].mxu0 }
 0xc42   :  { %v5598_v8 = vsel %vm5597_vm2, %v5488_v14, %v5595_v52 }
 0xc43   :  { %v5604_v41 = vadd.f32 %v6043_v45, %v5598_v8 }
 0xc45   :  { %v5605_v54 = vmax.f32 %v5604_v41, 0.0 }
 0xc47   :  { %v5606_v42 = vpack.c.bf16 %v5605_v54, %v5605_v54 }
 0xc49   :  { %6149 = vmatmul.mubr.msk.bf16.vlgmr.msra.gmra.mrb[52].mxu0 %vm73_vm0, %v5606_v42 }
 0xc4a   :  { %6156 = vmatprep.mubr.msk.bf16.mxu0 %vm6700_vm14, %v6699_v31  ;;  %6153 = vmatpush3.bf16.msra.mxu0 %v6635_v44 }
 0xc4b   :  { %6154 = vmatprep.subr.bf16.mxu0 %v6699_v31  ;;  %v6049_v31 = vld [vmem:[%s8448_s5 + $0x3] ss:$0 sm:$0xff] }
 0xc4e   :  { %6155 = vmatpush3.bf16.msra.mxu0 %v6636_v1 }
 0xd1c   :  { %v5665_v10 = vpop.f32.mrb[52].mxu0 }
 0xd1d   :  { %v5666_v29 = vadd.f32 %v6044_v15, %v5665_v10  ;;  %v6150_v4 = vpop.f32.mrb[53].mxu0 }
 0xd1e   :  { %v5668_v40 = vpop.f32.mrb[54].mxu0 }
 0xd1f   :  { %v6151_v47 = vpop.f32.mrb[55].mxu0  ;;  %v5672_v48 = vsel %vm5671_vm3, %v5666_v29, 0.0  ;;  %v5677_v50 = vmul.f32 %v5666_v29, %v5666_v29 }
 0xd20   :  { %5673 = vadd.xlane.f32.xlu0 %v5672_v48 }
 0xd21   :  { %v5678_v9 = vsel %vm5671_vm3, %v5677_v50, 0.0 }
 0xd22   :  { %5679 = vadd.xlane.f32.xlu1 %v5678_v9 }
 0xdad   :  { %v5674_v30 = vpop.xlane.xlu0 %5673 }
 0xdae   :  { %v5676_v2 = vmul.f32 0.03125, %v5674_v30 }
 0xdaf   :  { %v5680_v49 = vpop.xlane.xlu1 %5679 }
 0xdb0   :  { %v5683_v7 = vmul.f32 %v5676_v2, %v5676_v2  ;;  %v5681_v53 = vmul.f32 0.03125, %v5680_v49  ;;  %v5682_v39 = vsub.f32 %v5666_v29, %v5676_v2 }
 0xdb2   :  { %v5684_v6 = vsub.f32 %v5681_v53, %v5683_v7 }
 0xdb4   :  { %v5685_v23 = vadd.f32 1e-05, %v5684_v6 }
 0xdb6   :  { %6653 = vrsqrt.f32 %v5685_v23 }
 0xdc0   :  { %v6654_v61 = vpop.eup %6653 }
 0xdc1   :  { %v5687_v43 = vmul.f32 %v6654_v61, %v5682_v39 }
 0xdc3   :  { %v5693_v24 = vmul.f32 %v6048_v20, %v5687_v43 }
 0xdc5   :  { %v5699_v17 = vadd.f32 %v6049_v31, %v5693_v24 }
 0xdc7   :  { %v5700_v51 = vmax.f32 %v5699_v17, 0.0 }
 0xdc9   :  { %v5701_v34 = vpack.c.bf16 %v5700_v51, %v5700_v51 }
 0xdcb   :  { %6157 = vmatmul.mubr.msk.bf16.vlgmr.msra.gmra.mrb[56].mxu0 %vm73_vm0, %v5701_v34 }
 0xe9e   :  { %v5760_v62 = vpop.f32.mrb[56].mxu0 }
 0xe9f   :  { %v5761_v13 = vadd.f32 %v6050_v21, %v5760_v62  ;;  %v6158_v38 = vpop.f32.mrb[57].mxu0 }
 0xea0   :  { %v5763_v16 = vpop.f32.mrb[58].mxu0 }
 0xea1   :  { %5766 = vst.msk [vmem:[#allocation2] sm:$0x3] %vm5671_vm3, %v5761_v13  ;;  %v6159_v26 = vpop.f32.mrb[59].mxu0 }
 0xea2   :  { %6670 = shalt.err (!%p6667_p4)
}
 0xea3   :  { %s6671_s5 = scalar_lea.hbm %s8451_s8, 32 }
 0xea4   :  { %p6672_p5 = scmp.ne.s32.totalorder %s8451_s8, %s6671_s5  ;;  %p6675_p6 = scmp.lt.u32.totalorder %s6671_s5, %s8451_s8 }
 0xea6   :  { %p6677_p7 = pnand %p6675_p6, %p6672_p5 }
 0xea8   :  { %6680 = shalt.err (!%p6677_p7)
}
 0xea9   :  { %5776 = dma.vmem_to_hbm [thread:$0]  %s5774_s11, 32, %s8451_s8, [#allocation3]  }
 0xeaa   :  { %6681 = dma.done.wait [#allocation3], 32  }
 0xeab   :  { %6682 = vsyncadd [#allocation3], 4294967264 }
 0xeac   :  { %5780 = vsyncpa [#allocation3], 1 }

</bundles_post_ra>
